<compile_context>
chip_gen: v7x
topology: tpu7x:2x2x1
jax: 0.10.0
libtpu: 0.0.40
codegen_flags: <defaults>
</compile_context>

<pallas_src>
import functools

import numpy as np

import jax
import jax.numpy as jnp
from jax import lax
from jax.experimental import pallas as pl
from jax.experimental.pallas import tpu as pltpu

EPS = 1e-5
_REF_PREC = lax.Precision.HIGHEST   # reference (XLA) only; never used inside the kernel


# ----------------------------------------------------------------------------
# Fused kernel: conv (MXU matmul, bf16 operands / f32 accum) + training-mode BN
#               [+ residual add] [+ ReLU]
# ----------------------------------------------------------------------------
def _make_conv_bn_kernel(n_taps, h_out, w_out, has_residual, apply_relu):
    """n_taps == 9: stride-1 3x3 conv. The 9 im2col taps are built *in VMEM* from the
    halo-padded flat (C_in, P + 2*halo) activation via static lane-offset slices and
    positional validity masks (virtual zero padding) -- no HBM patch tensor.
    n_taps == 1: plain matmul (1x1 conv, or pre-built patches for the strided fallback)."""
    fused_taps = n_taps > 1

    def kernel(*refs):
        it = iter(refs)
        w_ref = next(it)                             # (n_taps, c_tile, K)  f32
        x_ref = next(it)                             # (K, P) or (K, P + 2*halo)
        g_ref = next(it)                             # (c_tile, 1) f32
        b_ref = next(it)                             # (c_tile, 1) f32
        ii_ref = next(it) if fused_taps else None    # (1, P) int32: row index of flat position
        jj_ref = next(it) if fused_taps else None    # (1, P) int32: col index of flat position
        r_ref = next(it) if has_residual else None   # (c_tile, P)
        o_ref = next(it)                             # (c_tile, P)

        c_tile, p = o_ref.shape

        if not fused_taps:
            xb = x_ref[...].astype(jnp.bfloat16)
            wb = w_ref[0].astype(jnp.bfloat16)
            acc = jnp.dot(wb, xb, preferred_element_type=jnp.float32)
        else:
            halo = (x_ref.shape[1] - p) // 2
            ii = ii_ref[...]
            jj = jj_ref[...]
            acc = jnp.zeros((c_tile, p), jnp.float32)
            for t in range(n_taps):                  # statically unrolled: 9 taps of the 3x3
                di, dj = t // 3 - 1, t % 3 - 1
                s = halo + di * w_out + dj           # static lane offset of this tap
                xt = x_ref[:, s:s + p]               # shifted view of the flat activation
                valid = ((ii + di >= 0) & (ii + di < h_out) &
                         (jj + dj >= 0) & (jj + dj < w_out))
                tap = jnp.where(valid, xt, jnp.zeros_like(xt)).astype(jnp.bfloat16)
                wb = w_ref[t].astype(jnp.bfloat16)
                acc = acc + jnp.dot(wb, tap, preferred_element_type=jnp.float32)

        # Training-mode BN: single-pass per-channel stats over the full position axis (f32).
        inv_p = 1.0 / p
        mean = jnp.sum(acc, axis=1, keepdims=True) * inv_p
        ex2 = jnp.sum(acc * acc, axis=1, keepdims=True) * inv_p
        var = jnp.maximum(ex2 - mean * mean, 0.0)     # clamp: avoid rsqrt(<0) from cancellation
        scale = g_ref[...] * lax.rsqrt(var + EPS)
        shift = b_ref[...] - mean * scale
        y = acc * scale + shift                       # folded BN affine: 2 VPU ops / element
        if has_residual:
            y = y + r_ref[...].astype(jnp.float32)
        if apply_relu:
            y = jnp.maximum(y, 0.0)
        o_ref[...] = y.astype(o_ref.dtype)

    return kernel


def conv_bn_act(w_taps, x_cp, gamma, beta, *, spatial=None, residual=None,
                apply_relu=True, out_dtype=jnp.float32, channel_tile=None):
    """One fused pallas_call: y = BN(conv(x)) [+ residual] [relu].

    w_taps : (n_taps, C_out, K)  conv weights; n_taps=9 -> fused 3x3 taps (K = C_in),
                                 n_taps=1 -> plain matmul (1x1 conv or pre-built patches).
    x_cp   : (K, P)              activation, P = N*H*W flattened in (n, h, w) order (lane-dense).
    spatial: (H_out, W_out)      required when n_taps == 9 (tap shifts / validity masks).
    residual: optional (C_out, P) added after BN (before the optional relu).
    """
    n_taps, c_out, k = w_taps.shape
    kx, p = x_cp.shape
    assert kx == k, (kx, k)
    fused_taps = n_taps > 1

    # Output-channel tile: the only axis that tiles cleanly under full-batch BN stats.
    min_ct = 8 if jnp.dtype(out_dtype).itemsize >= 4 else 16
    if residual is not None and residual.dtype == jnp.bfloat16:
        min_ct = max(min_ct, 16)
    ct = channel_tile if channel_tile is not None else 128
    ct = min(max(ct, min_ct), c_out)
    if c_out % ct != 0 or (ct != c_out and ct % min_ct != 0):
        ct = c_out
    grid = (c_out // ct,)

    args = [w_taps.astype(jnp.float32), x_cp,
            gamma.reshape(c_out, 1).astype(jnp.float32),
            beta.reshape(c_out, 1).astype(jnp.float32)]
    in_specs = [
        pl.BlockSpec((n_taps, ct, k), lambda i: (0, i, 0)),
        None,                                   # x spec filled below
        pl.BlockSpec((ct, 1), lambda i: (i, 0)),
        pl.BlockSpec((ct, 1), lambda i: (i, 0)),
    ]
    if fused_taps:
        h_out, w_out = spatial
        halo = w_out + 1                        # covers the largest tap offset (+-(W+1))
        args[1] = jnp.pad(x_cp, ((0, 0), (halo, halo)))
        in_specs[1] = pl.BlockSpec((k, p + 2 * halo), lambda i: (0, 0))
        pos = np.arange(p, dtype=np.int32)      # compile-time positional (row, col) indices
        args += [jnp.asarray(((pos // w_out) % h_out).reshape(1, p)),
                 jnp.asarray((pos % w_out).reshape(1, p))]
        in_specs += [pl.BlockSpec((1, p), lambda i: (0, 0)),
                     pl.BlockSpec((1, p), lambda i: (0, 0))]
    else:
        h_out = w_out = None
        in_specs[1] = pl.BlockSpec((k, p), lambda i: (0, 0))
    if residual is not None:
        args.append(residual)
        in_specs.append(pl.BlockSpec((ct, p), lambda i: (i, 0)))

    kernel = _make_conv_bn_kernel(n_taps, h_out, w_out, residual is not None, apply_relu)
    return pl.pallas_call(
        kernel,
        out_shape=jax.ShapeDtypeStruct((c_out, p), out_dtype),
        grid=grid,
        in_specs=in_specs,
        out_specs=pl.BlockSpec((ct, p), lambda i: (i, 0)),
        compiler_params=pltpu.CompilerParams(
            dimension_semantics=("parallel",),          # channel tiles independent (v7x 2 TCs)
            vmem_limit_bytes=32 * 1024 * 1024),         # v5e default scoped VMEM is only 16 MiB
    )(*args)


# ----------------------------------------------------------------------------
# Wrapper-side layout helpers (only the strided 3x3 conv still uses im2col)
# ----------------------------------------------------------------------------
def im2col(x, ksize, stride, padding):
    """(N, C, H, W) -> (C*k*k, N*Ho*Wo). Row order (c, ki, kj) matches weight.reshape(C_out, -1);
    column order flattens (n, h, w)."""
    n, c, h, w = x.shape
    xp = jnp.pad(x, ((0, 0), (0, 0), (padding, padding), (padding, padding)))
    h_out = (h + 2 * padding - ksize) // stride + 1
    w_out = (w + 2 * padding - ksize) // stride + 1
    cols = []
    for ki in range(ksize):
        for kj in range(ksize):
            cols.append(xp[:, :, ki:ki + stride * h_out:stride,
                           kj:kj + stride * w_out:stride])       # (N, C, Ho, Wo)
    pat = jnp.stack(cols, axis=0).reshape(ksize, ksize, n, c, h_out, w_out)
    pat = pat.transpose(3, 0, 1, 2, 4, 5)                         # (C, ki, kj, N, Ho, Wo)
    return pat.reshape(c * ksize * ksize, n * h_out * w_out), h_out, w_out


# ----------------------------------------------------------------------------
# BasicBlock forward (Pallas)
# ----------------------------------------------------------------------------
def basic_block_forward(x, params, stride=1, is_last=False, channel_tile=None):
    n, c_in, h, w = x.shape
    planes = params["w1"].shape[0]
    x_cp = x.transpose(1, 0, 2, 3).reshape(c_in, n * h * w)       # lane-dense (C, N*H*W)

    # conv1 (3x3) + bn1 + relu -> one fused kernel; im2col fused in-kernel when stride == 1.
    if stride == 1:
        w1 = params["w1"].transpose(2, 3, 0, 1).reshape(9, planes, c_in)
        h1 = conv_bn_act(w1, x_cp, params["g1"], params["b1"], spatial=(h, w),
                         apply_relu=True, out_dtype=jnp.bfloat16,
                         channel_tile=channel_tile)
        h1_h, h1_w = h, w
    else:
        # TODO(synk): strided 3x3 conv still builds im2col patches wrapper-side; a fused
        # space-to-depth (phase) decomposition would bring it in-kernel as well.
        p1, h1_h, h1_w = im2col(x, 3, stride, 1)
        w1 = params["w1"].reshape(1, planes, c_in * 9)
        h1 = conv_bn_act(w1, p1, params["g1"], params["b1"],
                         apply_relu=True, out_dtype=jnp.bfloat16,
                         channel_tile=channel_tile)

    # shortcut: identity, or 1x1 stride-s conv + BN (subsample + matmul, no im2col blowup).
    if stride != 1 or c_in != planes:
        xs = x[:, :, ::stride, ::stride]
        xs_cp = xs.transpose(1, 0, 2, 3).reshape(c_in, -1)
        ws = params["ws"].reshape(1, planes, c_in)
        short = conv_bn_act(ws, xs_cp, params["gs"], params["bs"],
                            apply_relu=False, out_dtype=jnp.bfloat16,
                            channel_tile=channel_tile)
    else:
        short = x_cp           # identity shortcut: already in (C, P) layout, no transpose

    # conv2 (3x3, stride 1) + bn2 + residual add (+ relu unless is_last) -> one fused kernel.
    w2 = params["w2"].transpose(2, 3, 0, 1).reshape(9, planes, planes)
    y = conv_bn_act(w2, h1, params["g2"], params["b2"], spatial=(h1_h, h1_w),
                    residual=short, apply_relu=not is_last, out_dtype=jnp.float32,
                    channel_tile=channel_tile)
    y_nchw = y.reshape(planes, n, h1_h, h1_w).transpose(1, 0, 2, 3)
    if is_last:
        # Kernel stored only preact (saves one full (C_out, P) store); ReLU is one cheap
        # VPU max recomputed here by the consumer.
        return jnp.maximum(y_nchw, 0.0), y_nchw
    return y_nchw


# ----------------------------------------------------------------------------
# Pure-JAX reference (training-mode BN), f32 / HIGHEST precision
# ----------------------------------------------------------------------------
def _bn_ref(x, gamma, beta):
    mean = jnp.mean(x, axis=(0, 2, 3), keepdims=True)
    var = jnp.mean((x - mean) ** 2, axis=(0, 2, 3), keepdims=True)
    return ((x - mean) * lax.rsqrt(var + EPS)
            * gamma.reshape(1, -1, 1, 1) + beta.reshape(1, -1, 1, 1))


def _conv_ref(x, w, stride, padding):
    return lax.conv_general_dilated(
        x, w, window_strides=(stride, stride),
        padding=[(padding, padding), (padding, padding)],
        dimension_numbers=("NCHW", "OIHW", "NCHW"), precision=_REF_PREC)


def basic_block_ref(x, params, stride=1, is_last=False):
    planes = params["w1"].shape[0]
    out = jax.nn.relu(_bn_ref(_conv_ref(x, params["w1"], stride, 1),
                              params["g1"], params["b1"]))
    out = _bn_ref(_conv_ref(out, params["w2"], 1, 1), params["g2"], params["b2"])
    if stride != 1 or x.shape[1] != planes:
        sc = _bn_ref(_conv_ref(x, params["ws"], stride, 0), params["gs"], params["bs"])
    else:
        sc = x
    preact = out + sc
    out = jax.nn.relu(preact)
    return (out, preact) if is_last else out


if __name__ == "__main__":
    key = jax.random.PRNGKey(0)
    ks = jax.random.split(key, 8)

    # Config A: identity shortcut (stride=1, in_planes == planes), is_last=False.
    # channel_tile=8 exercises the multi-step "parallel" channel grid on the f32-output conv.
    n, c, hh, ww, planes = 2, 16, 16, 16, 16          # P = 2*16*16 = 512 (multiple of 128)
    x = jax.random.normal(ks[0], (n, c, hh, ww), dtype=jnp.float32)
    pa = {
        "w1": jax.random.normal(ks[1], (planes, c, 3, 3), jnp.float32) * 0.1,
        "g1": 1.0 + 0.1 * jax.random.normal(ks[2], (planes,), jnp.float32),
        "b1": 0.1 * jax.random.normal(ks[3], (planes,), jnp.float32),
        "w2": jax.random.normal(ks[4], (planes, planes, 3, 3), jnp.float32) * 0.1,
        "g2": 1.0 + 0.1 * jax.random.normal(ks[5], (planes,), jnp.float32),
        "b2": 0.1 * jax.random.normal(ks[6], (planes,), jnp.float32),
    }
    fwd_a = jax.jit(functools.partial(basic_block_forward, stride=1, is_last=False,
                                      channel_tile=8))
    out_a = jax.block_until_ready(fwd_a(x, pa))
    ref_a = basic_block_ref(x, pa, stride=1, is_last=False)
    assert out_a.shape == ref_a.shape
    err_a = float(jnp.max(jnp.abs(out_a - ref_a)))
    assert jnp.allclose(out_a, ref_a, atol=5e-2, rtol=5e-2), ("config A mismatch", err_a)

    # Config B: downsample shortcut (stride=2, channel change), is_last=True.
    c_in_b, planes_b = 8, 16                          # P = 2*8*8 = 128 (lane-dense)
    xb = jax.random.normal(ks[7], (n, c_in_b, hh, ww), dtype=jnp.float32)
    kb = jax.random.split(jax.random.PRNGKey(1), 9)
    pb = {
        "w1": jax.random.normal(kb[0], (planes_b, c_in_b, 3, 3), jnp.float32) * 0.1,
        "g1": 1.0 + 0.1 * jax.random.normal(kb[1], (planes_b,), jnp.float32),
        "b1": 0.1 * jax.random.normal(kb[2], (planes_b,), jnp.float32),
        "w2": jax.random.normal(kb[3], (planes_b, planes_b, 3, 3), jnp.float32) * 0.1,
        "g2": 1.0 + 0.1 * jax.random.normal(kb[4], (planes_b,), jnp.float32),
        "b2": 0.1 * jax.random.normal(kb[5], (planes_b,), jnp.float32),
        "ws": jax.random.normal(kb[6], (planes_b, c_in_b, 1, 1), jnp.float32) * 0.1,
        "gs": 1.0 + 0.1 * jax.random.normal(kb[7], (planes_b,), jnp.float32),
        "bs": 0.1 * jax.random.normal(kb[8], (planes_b,), jnp.float32),
    }
    fwd_b = jax.jit(functools.partial(basic_block_forward, stride=2, is_last=True))
    out_b, preact_b = fwd_b(xb, pb)
    out_b = jax.block_until_ready(out_b)
    ref_out_b, ref_pre_b = basic_block_ref(xb, pb, stride=2, is_last=True)
    err_b = float(jnp.max(jnp.abs(out_b - ref_out_b)))
    err_p = float(jnp.max(jnp.abs(preact_b - ref_pre_b)))
    assert jnp.allclose(out_b, ref_out_b, atol=5e-2, rtol=5e-2), ("config B out mismatch", err_b)
    assert jnp.allclose(preact_b, ref_pre_b, atol=5e-2, rtol=5e-2), ("config B preact mismatch", err_p)

    print("KERNEL_OK")
</pallas_src>

<mosaic_0001>
module attributes {stable_mosaic.version = 11 : i64} {
  func.func @kernel(%arg0: i32, %arg1: memref<9x8x16xf32, #tpu.memory_space<vmem>>, %arg2: memref<16x546xbf16, #tpu.memory_space<vmem>>, %arg3: memref<8x1xf32, #tpu.memory_space<vmem>>, %arg4: memref<8x1xf32, #tpu.memory_space<vmem>>, %arg5: memref<1x512xi32, #tpu.memory_space<vmem>>, %arg6: memref<1x512xi32, #tpu.memory_space<vmem>>, %arg7: memref<8x512xf32, #tpu.memory_space<vmem>>, %arg8: memref<8x512xf32, #tpu.memory_space<vmem>>) attributes {dimension_semantics = [#tpu.dimension_semantics<parallel>], iteration_bounds = array<i64: 2>, scalar_prefetch = 0 : i64, scratch_operands = 0 : i64, tpu.core_type = #tpu.core_type<tc>, window_params = [{transform_indices = @transform_0, window_bounds = array<i64: 9, 8, 16>}, {pipeline_mode = #tpu.pipeline_mode<synchronous>, transform_indices = @transform_1, window_bounds = array<i64: 16, 546>}, {transform_indices = @transform_2, window_bounds = array<i64: 8, 1>}, {transform_indices = @transform_3, window_bounds = array<i64: 8, 1>}, {pipeline_mode = #tpu.pipeline_mode<synchronous>, transform_indices = @transform_4, window_bounds = array<i64: 1, 512>}, {pipeline_mode = #tpu.pipeline_mode<synchronous>, transform_indices = @transform_5, window_bounds = array<i64: 1, 512>}, {transform_indices = @transform_6, window_bounds = array<i64: 8, 512>}, {transform_indices = @transform_7, window_bounds = array<i64: 8, 512>}]} {
    %c0 = arith.constant 0 : index
    %c0_0 = arith.constant 0 : index
    %0 = vector.load %arg5[%c0, %c0_0] : memref<1x512xi32, #tpu.memory_space<vmem>>, vector<1x512xi32>
    %c0_1 = arith.constant 0 : index
    %c0_2 = arith.constant 0 : index
    %1 = vector.load %arg6[%c0_1, %c0_2] : memref<1x512xi32, #tpu.memory_space<vmem>>, vector<1x512xi32>
    %cst = arith.constant 0.000000e+00 : f32
    %2 = vector.broadcast %cst : f32 to vector<8x512xf32>
    %c0_3 = arith.constant 0 : index
    %c0_4 = arith.constant 0 : index
    %3 = vector.load %arg2[%c0_3, %c0_4] : memref<16x546xbf16, #tpu.memory_space<vmem>>, vector<16x512xbf16>
    %c-1_i32 = arith.constant -1 : i32
    %4 = vector.broadcast %c-1_i32 : i32 to vector<1x512xi32>
    %5 = arith.addi %0, %4 : vector<1x512xi32>
    %c0_i32 = arith.constant 0 : i32
    %6 = vector.broadcast %c0_i32 : i32 to vector<1x512xi32>
    %7 = arith.cmpi sge, %5, %6 : vector<1x512xi32>
    %c-1_i32_5 = arith.constant -1 : i32
    %8 = vector.broadcast %c-1_i32_5 : i32 to vector<1x512xi32>
    %9 = arith.addi %0, %8 : vector<1x512xi32>
    %c16_i32 = arith.constant 16 : i32
    %10 = vector.broadcast %c16_i32 : i32 to vector<1x512xi32>
    %11 = arith.cmpi slt, %9, %10 : vector<1x512xi32>
    %12 = arith.andi %7, %11 : vector<1x512xi1>
    %c-1_i32_6 = arith.constant -1 : i32
    %13 = vector.broadcast %c-1_i32_6 : i32 to vector<1x512xi32>
    %14 = arith.addi %1, %13 : vector<1x512xi32>
    %c0_i32_7 = arith.constant 0 : i32
    %15 = vector.broadcast %c0_i32_7 : i32 to vector<1x512xi32>
    %16 = arith.cmpi sge, %14, %15 : vector<1x512xi32>
    %17 = arith.andi %12, %16 : vector<1x512xi1>
    %c-1_i32_8 = arith.constant -1 : i32
    %18 = vector.broadcast %c-1_i32_8 : i32 to vector<1x512xi32>
    %19 = arith.addi %1, %18 : vector<1x512xi32>
    %c16_i32_9 = arith.constant 16 : i32
    %20 = vector.broadcast %c16_i32_9 : i32 to vector<1x512xi32>
    %21 = arith.cmpi slt, %19, %20 : vector<1x512xi32>
    %22 = arith.andi %17, %21 : vector<1x512xi1>
    %cst_10 = arith.constant 0.000000e+00 : bf16
    %23 = vector.broadcast %cst_10 : bf16 to vector<16x512xbf16>
    %24 = vector.shape_cast %22 : vector<1x512xi1> to vector<1x512xi1>
    %25 = vector.broadcast %24 : vector<1x512xi1> to vector<16x512xi1>
    %26 = arith.select %25, %3, %23 : vector<16x512xi1>, vector<16x512xbf16>
    %c0_11 = arith.constant 0 : index
    %c0_12 = arith.constant 0 : index
    %c0_13 = arith.constant 0 : index
    %27 = vector.load %arg1[%c0_11, %c0_12, %c0_13] : memref<9x8x16xf32, #tpu.memory_space<vmem>>, vector<1x8x16xf32>
    %28 = vector.shape_cast %27 : vector<1x8x16xf32> to vector<8x16xf32>
    %29 = arith.truncf %28 : vector<8x16xf32> to vector<8x16xbf16>
    %cst_14 = arith.constant dense<0.000000e+00> : vector<8x512xf32>
    %30 = tpu.matmul %29, %26, %cst_14 {dimension_numbers = #tpu.dot_dimension_numbers<[1], [0], [0], [1], [0, 0, 1, 1], [], []>} : vector<8x16xbf16>, vector<16x512xbf16>, vector<8x512xf32> -> vector<8x512xf32>
    %31 = arith.addf %2, %30 : vector<8x512xf32>
    %c0_15 = arith.constant 0 : index
    %c1 = arith.constant 1 : index
    %32 = vector.load %arg2[%c0_15, %c1] : memref<16x546xbf16, #tpu.memory_space<vmem>>, vector<16x512xbf16>
    %c-1_i32_16 = arith.constant -1 : i32
    %33 = vector.broadcast %c-1_i32_16 : i32 to vector<1x512xi32>
    %34 = arith.addi %0, %33 : vector<1x512xi32>
    %c0_i32_17 = arith.constant 0 : i32
    %35 = vector.broadcast %c0_i32_17 : i32 to vector<1x512xi32>
    %36 = arith.cmpi sge, %34, %35 : vector<1x512xi32>
    %c-1_i32_18 = arith.constant -1 : i32
    %37 = vector.broadcast %c-1_i32_18 : i32 to vector<1x512xi32>
    %38 = arith.addi %0, %37 : vector<1x512xi32>
    %c16_i32_19 = arith.constant 16 : i32
    %39 = vector.broadcast %c16_i32_19 : i32 to vector<1x512xi32>
    %40 = arith.cmpi slt, %38, %39 : vector<1x512xi32>
    %41 = arith.andi %36, %40 : vector<1x512xi1>
    %c0_i32_20 = arith.constant 0 : i32
    %42 = vector.broadcast %c0_i32_20 : i32 to vector<1x512xi32>
    %43 = arith.addi %1, %42 : vector<1x512xi32>
    %c0_i32_21 = arith.constant 0 : i32
    %44 = vector.broadcast %c0_i32_21 : i32 to vector<1x512xi32>
    %45 = arith.cmpi sge, %43, %44 : vector<1x512xi32>
    %46 = arith.andi %41, %45 : vector<1x512xi1>
    %c0_i32_22 = arith.constant 0 : i32
    %47 = vector.broadcast %c0_i32_22 : i32 to vector<1x512xi32>
    %48 = arith.addi %1, %47 : vector<1x512xi32>
    %c16_i32_23 = arith.constant 16 : i32
    %49 = vector.broadcast %c16_i32_23 : i32 to vector<1x512xi32>
    %50 = arith.cmpi slt, %48, %49 : vector<1x512xi32>
    %51 = arith.andi %46, %50 : vector<1x512xi1>
    %cst_24 = arith.constant 0.000000e+00 : bf16
    %52 = vector.broadcast %cst_24 : bf16 to vector<16x512xbf16>
    %53 = vector.shape_cast %51 : vector<1x512xi1> to vector<1x512xi1>
    %54 = vector.broadcast %53 : vector<1x512xi1> to vector<16x512xi1>
    %55 = arith.select %54, %32, %52 : vector<16x512xi1>, vector<16x512xbf16>
    %c1_25 = arith.constant 1 : index
    %c0_26 = arith.constant 0 : index
    %c0_27 = arith.constant 0 : index
    %56 = vector.load %arg1[%c1_25, %c0_26, %c0_27] : memref<9x8x16xf32, #tpu.memory_space<vmem>>, vector<1x8x16xf32>
    %57 = vector.shape_cast %56 : vector<1x8x16xf32> to vector<8x16xf32>
    %58 = arith.truncf %57 : vector<8x16xf32> to vector<8x16xbf16>
    %cst_28 = arith.constant dense<0.000000e+00> : vector<8x512xf32>
    %59 = tpu.matmul %58, %55, %cst_28 {dimension_numbers = #tpu.dot_dimension_numbers<[1], [0], [0], [1], [0, 0, 1, 1], [], []>} : vector<8x16xbf16>, vector<16x512xbf16>, vector<8x512xf32> -> vector<8x512xf32>
    %60 = arith.addf %31, %59 : vector<8x512xf32>
    %c0_29 = arith.constant 0 : index
    %c2 = arith.constant 2 : index
    %61 = vector.load %arg2[%c0_29, %c2] : memref<16x546xbf16, #tpu.memory_space<vmem>>, vector<16x512xbf16>
    %c-1_i32_30 = arith.constant -1 : i32
    %62 = vector.broadcast %c-1_i32_30 : i32 to vector<1x512xi32>
    %63 = arith.addi %0, %62 : vector<1x512xi32>
    %c0_i32_31 = arith.constant 0 : i32
    %64 = vector.broadcast %c0_i32_31 : i32 to vector<1x512xi32>
    %65 = arith.cmpi sge, %63, %64 : vector<1x512xi32>
    %c-1_i32_32 = arith.constant -1 : i32
    %66 = vector.broadcast %c-1_i32_32 : i32 to vector<1x512xi32>
    %67 = arith.addi %0, %66 : vector<1x512xi32>
    %c16_i32_33 = arith.constant 16 : i32
    %68 = vector.broadcast %c16_i32_33 : i32 to vector<1x512xi32>
    %69 = arith.cmpi slt, %67, %68 : vector<1x512xi32>
    %70 = arith.andi %65, %69 : vector<1x512xi1>
    %c1_i32 = arith.constant 1 : i32
    %71 = vector.broadcast %c1_i32 : i32 to vector<1x512xi32>
    %72 = arith.addi %1, %71 : vector<1x512xi32>
    %c0_i32_34 = arith.constant 0 : i32
    %73 = vector.broadcast %c0_i32_34 : i32 to vector<1x512xi32>
    %74 = arith.cmpi sge, %72, %73 : vector<1x512xi32>
    %75 = arith.andi %70, %74 : vector<1x512xi1>
    %c1_i32_35 = arith.constant 1 : i32
    %76 = vector.broadcast %c1_i32_35 : i32 to vector<1x512xi32>
    %77 = arith.addi %1, %76 : vector<1x512xi32>
    %c16_i32_36 = arith.constant 16 : i32
    %78 = vector.broadcast %c16_i32_36 : i32 to vector<1x512xi32>
    %79 = arith.cmpi slt, %77, %78 : vector<1x512xi32>
    %80 = arith.andi %75, %79 : vector<1x512xi1>
    %cst_37 = arith.constant 0.000000e+00 : bf16
    %81 = vector.broadcast %cst_37 : bf16 to vector<16x512xbf16>
    %82 = vector.shape_cast %80 : vector<1x512xi1> to vector<1x512xi1>
    %83 = vector.broadcast %82 : vector<1x512xi1> to vector<16x512xi1>
    %84 = arith.select %83, %61, %81 : vector<16x512xi1>, vector<16x512xbf16>
    %c2_38 = arith.constant 2 : index
    %c0_39 = arith.constant 0 : index
    %c0_40 = arith.constant 0 : index
    %85 = vector.load %arg1[%c2_38, %c0_39, %c0_40] : memref<9x8x16xf32, #tpu.memory_space<vmem>>, vector<1x8x16xf32>
    %86 = vector.shape_cast %85 : vector<1x8x16xf32> to vector<8x16xf32>
    %87 = arith.truncf %86 : vector<8x16xf32> to vector<8x16xbf16>
    %cst_41 = arith.constant dense<0.000000e+00> : vector<8x512xf32>
    %88 = tpu.matmul %87, %84, %cst_41 {dimension_numbers = #tpu.dot_dimension_numbers<[1], [0], [0], [1], [0, 0, 1, 1], [], []>} : vector<8x16xbf16>, vector<16x512xbf16>, vector<8x512xf32> -> vector<8x512xf32>
    %89 = arith.addf %60, %88 : vector<8x512xf32>
    %c0_42 = arith.constant 0 : index
    %c16 = arith.constant 16 : index
    %90 = vector.load %arg2[%c0_42, %c16] : memref<16x546xbf16, #tpu.memory_space<vmem>>, vector<16x512xbf16>
    %c0_i32_43 = arith.constant 0 : i32
    %91 = vector.broadcast %c0_i32_43 : i32 to vector<1x512xi32>
    %92 = arith.addi %0, %91 : vector<1x512xi32>
    %c0_i32_44 = arith.constant 0 : i32
    %93 = vector.broadcast %c0_i32_44 : i32 to vector<1x512xi32>
    %94 = arith.cmpi sge, %92, %93 : vector<1x512xi32>
    %c0_i32_45 = arith.constant 0 : i32
    %95 = vector.broadcast %c0_i32_45 : i32 to vector<1x512xi32>
    %96 = arith.addi %0, %95 : vector<1x512xi32>
    %c16_i32_46 = arith.constant 16 : i32
    %97 = vector.broadcast %c16_i32_46 : i32 to vector<1x512xi32>
    %98 = arith.cmpi slt, %96, %97 : vector<1x512xi32>
    %99 = arith.andi %94, %98 : vector<1x512xi1>
    %c-1_i32_47 = arith.constant -1 : i32
    %100 = vector.broadcast %c-1_i32_47 : i32 to vector<1x512xi32>
    %101 = arith.addi %1, %100 : vector<1x512xi32>
    %c0_i32_48 = arith.constant 0 : i32
    %102 = vector.broadcast %c0_i32_48 : i32 to vector<1x512xi32>
    %103 = arith.cmpi sge, %101, %102 : vector<1x512xi32>
    %104 = arith.andi %99, %103 : vector<1x512xi1>
    %c-1_i32_49 = arith.constant -1 : i32
    %105 = vector.broadcast %c-1_i32_49 : i32 to vector<1x512xi32>
    %106 = arith.addi %1, %105 : vector<1x512xi32>
    %c16_i32_50 = arith.constant 16 : i32
    %107 = vector.broadcast %c16_i32_50 : i32 to vector<1x512xi32>
    %108 = arith.cmpi slt, %106, %107 : vector<1x512xi32>
    %109 = arith.andi %104, %108 : vector<1x512xi1>
    %cst_51 = arith.constant 0.000000e+00 : bf16
    %110 = vector.broadcast %cst_51 : bf16 to vector<16x512xbf16>
    %111 = vector.shape_cast %109 : vector<1x512xi1> to vector<1x512xi1>
    %112 = vector.broadcast %111 : vector<1x512xi1> to vector<16x512xi1>
    %113 = arith.select %112, %90, %110 : vector<16x512xi1>, vector<16x512xbf16>
    %c3 = arith.constant 3 : index
    %c0_52 = arith.constant 0 : index
    %c0_53 = arith.constant 0 : index
    %114 = vector.load %arg1[%c3, %c0_52, %c0_53] : memref<9x8x16xf32, #tpu.memory_space<vmem>>, vector<1x8x16xf32>
    %115 = vector.shape_cast %114 : vector<1x8x16xf32> to vector<8x16xf32>
    %116 = arith.truncf %115 : vector<8x16xf32> to vector<8x16xbf16>
    %cst_54 = arith.constant dense<0.000000e+00> : vector<8x512xf32>
    %117 = tpu.matmul %116, %113, %cst_54 {dimension_numbers = #tpu.dot_dimension_numbers<[1], [0], [0], [1], [0, 0, 1, 1], [], []>} : vector<8x16xbf16>, vector<16x512xbf16>, vector<8x512xf32> -> vector<8x512xf32>
    %118 = arith.addf %89, %117 : vector<8x512xf32>
    %c0_55 = arith.constant 0 : index
    %c17 = arith.constant 17 : index
    %119 = vector.load %arg2[%c0_55, %c17] : memref<16x546xbf16, #tpu.memory_space<vmem>>, vector<16x512xbf16>
    %c0_i32_56 = arith.constant 0 : i32
    %120 = vector.broadcast %c0_i32_56 : i32 to vector<1x512xi32>
    %121 = arith.addi %0, %120 : vector<1x512xi32>
    %c0_i32_57 = arith.constant 0 : i32
    %122 = vector.broadcast %c0_i32_57 : i32 to vector<1x512xi32>
    %123 = arith.cmpi sge, %121, %122 : vector<1x512xi32>
    %c0_i32_58 = arith.constant 0 : i32
    %124 = vector.broadcast %c0_i32_58 : i32 to vector<1x512xi32>
    %125 = arith.addi %0, %124 : vector<1x512xi32>
    %c16_i32_59 = arith.constant 16 : i32
    %126 = vector.broadcast %c16_i32_59 : i32 to vector<1x512xi32>
    %127 = arith.cmpi slt, %125, %126 : vector<1x512xi32>
    %128 = arith.andi %123, %127 : vector<1x512xi1>
    %c0_i32_60 = arith.constant 0 : i32
    %129 = vector.broadcast %c0_i32_60 : i32 to vector<1x512xi32>
    %130 = arith.addi %1, %129 : vector<1x512xi32>
    %c0_i32_61 = arith.constant 0 : i32
    %131 = vector.broadcast %c0_i32_61 : i32 to vector<1x512xi32>
    %132 = arith.cmpi sge, %130, %131 : vector<1x512xi32>
    %133 = arith.andi %128, %132 : vector<1x512xi1>
    %c0_i32_62 = arith.constant 0 : i32
    %134 = vector.broadcast %c0_i32_62 : i32 to vector<1x512xi32>
    %135 = arith.addi %1, %134 : vector<1x512xi32>
    %c16_i32_63 = arith.constant 16 : i32
    %136 = vector.broadcast %c16_i32_63 : i32 to vector<1x512xi32>
    %137 = arith.cmpi slt, %135, %136 : vector<1x512xi32>
    %138 = arith.andi %133, %137 : vector<1x512xi1>
    %cst_64 = arith.constant 0.000000e+00 : bf16
    %139 = vector.broadcast %cst_64 : bf16 to vector<16x512xbf16>
    %140 = vector.shape_cast %138 : vector<1x512xi1> to vector<1x512xi1>
    %141 = vector.broadcast %140 : vector<1x512xi1> to vector<16x512xi1>
    %142 = arith.select %141, %119, %139 : vector<16x512xi1>, vector<16x512xbf16>
    %c4 = arith.constant 4 : index
    %c0_65 = arith.constant 0 : index
    %c0_66 = arith.constant 0 : index
    %143 = vector.load %arg1[%c4, %c0_65, %c0_66] : memref<9x8x16xf32, #tpu.memory_space<vmem>>, vector<1x8x16xf32>
    %144 = vector.shape_cast %143 : vector<1x8x16xf32> to vector<8x16xf32>
    %145 = arith.truncf %144 : vector<8x16xf32> to vector<8x16xbf16>
    %cst_67 = arith.constant dense<0.000000e+00> : vector<8x512xf32>
    %146 = tpu.matmul %145, %142, %cst_67 {dimension_numbers = #tpu.dot_dimension_numbers<[1], [0], [0], [1], [0, 0, 1, 1], [], []>} : vector<8x16xbf16>, vector<16x512xbf16>, vector<8x512xf32> -> vector<8x512xf32>
    %147 = arith.addf %118, %146 : vector<8x512xf32>
    %c0_68 = arith.constant 0 : index
    %c18 = arith.constant 18 : index
    %148 = vector.load %arg2[%c0_68, %c18] : memref<16x546xbf16, #tpu.memory_space<vmem>>, vector<16x512xbf16>
    %c0_i32_69 = arith.constant 0 : i32
    %149 = vector.broadcast %c0_i32_69 : i32 to vector<1x512xi32>
    %150 = arith.addi %0, %149 : vector<1x512xi32>
    %c0_i32_70 = arith.constant 0 : i32
    %151 = vector.broadcast %c0_i32_70 : i32 to vector<1x512xi32>
    %152 = arith.cmpi sge, %150, %151 : vector<1x512xi32>
    %c0_i32_71 = arith.constant 0 : i32
    %153 = vector.broadcast %c0_i32_71 : i32 to vector<1x512xi32>
    %154 = arith.addi %0, %153 : vector<1x512xi32>
    %c16_i32_72 = arith.constant 16 : i32
    %155 = vector.broadcast %c16_i32_72 : i32 to vector<1x512xi32>
    %156 = arith.cmpi slt, %154, %155 : vector<1x512xi32>
    %157 = arith.andi %152, %156 : vector<1x512xi1>
    %c1_i32_73 = arith.constant 1 : i32
    %158 = vector.broadcast %c1_i32_73 : i32 to vector<1x512xi32>
    %159 = arith.addi %1, %158 : vector<1x512xi32>
    %c0_i32_74 = arith.constant 0 : i32
    %160 = vector.broadcast %c0_i32_74 : i32 to vector<1x512xi32>
    %161 = arith.cmpi sge, %159, %160 : vector<1x512xi32>
    %162 = arith.andi %157, %161 : vector<1x512xi1>
    %c1_i32_75 = arith.constant 1 : i32
    %163 = vector.broadcast %c1_i32_75 : i32 to vector<1x512xi32>
    %164 = arith.addi %1, %163 : vector<1x512xi32>
    %c16_i32_76 = arith.constant 16 : i32
    %165 = vector.broadcast %c16_i32_76 : i32 to vector<1x512xi32>
    %166 = arith.cmpi slt, %164, %165 : vector<1x512xi32>
    %167 = arith.andi %162, %166 : vector<1x512xi1>
    %cst_77 = arith.constant 0.000000e+00 : bf16
    %168 = vector.broadcast %cst_77 : bf16 to vector<16x512xbf16>
    %169 = vector.shape_cast %167 : vector<1x512xi1> to vector<1x512xi1>
    %170 = vector.broadcast %169 : vector<1x512xi1> to vector<16x512xi1>
    %171 = arith.select %170, %148, %168 : vector<16x512xi1>, vector<16x512xbf16>
    %c5 = arith.constant 5 : index
    %c0_78 = arith.constant 0 : index
    %c0_79 = arith.constant 0 : index
    %172 = vector.load %arg1[%c5, %c0_78, %c0_79] : memref<9x8x16xf32, #tpu.memory_space<vmem>>, vector<1x8x16xf32>
    %173 = vector.shape_cast %172 : vector<1x8x16xf32> to vector<8x16xf32>
    %174 = arith.truncf %173 : vector<8x16xf32> to vector<8x16xbf16>
    %cst_80 = arith.constant dense<0.000000e+00> : vector<8x512xf32>
    %175 = tpu.matmul %174, %171, %cst_80 {dimension_numbers = #tpu.dot_dimension_numbers<[1], [0], [0], [1], [0, 0, 1, 1], [], []>} : vector<8x16xbf16>, vector<16x512xbf16>, vector<8x512xf32> -> vector<8x512xf32>
    %176 = arith.addf %147, %175 : vector<8x512xf32>
    %c0_81 = arith.constant 0 : index
    %c32 = arith.constant 32 : index
    %177 = vector.load %arg2[%c0_81, %c32] : memref<16x546xbf16, #tpu.memory_space<vmem>>, vector<16x512xbf16>
    %c1_i32_82 = arith.constant 1 : i32
    %178 = vector.broadcast %c1_i32_82 : i32 to vector<1x512xi32>
    %179 = arith.addi %0, %178 : vector<1x512xi32>
    %c0_i32_83 = arith.constant 0 : i32
    %180 = vector.broadcast %c0_i32_83 : i32 to vector<1x512xi32>
    %181 = arith.cmpi sge, %179, %180 : vector<1x512xi32>
    %c1_i32_84 = arith.constant 1 : i32
    %182 = vector.broadcast %c1_i32_84 : i32 to vector<1x512xi32>
    %183 = arith.addi %0, %182 : vector<1x512xi32>
    %c16_i32_85 = arith.constant 16 : i32
    %184 = vector.broadcast %c16_i32_85 : i32 to vector<1x512xi32>
    %185 = arith.cmpi slt, %183, %184 : vector<1x512xi32>
    %186 = arith.andi %181, %185 : vector<1x512xi1>
    %c-1_i32_86 = arith.constant -1 : i32
    %187 = vector.broadcast %c-1_i32_86 : i32 to vector<1x512xi32>
    %188 = arith.addi %1, %187 : vector<1x512xi32>
    %c0_i32_87 = arith.constant 0 : i32
    %189 = vector.broadcast %c0_i32_87 : i32 to vector<1x512xi32>
    %190 = arith.cmpi sge, %188, %189 : vector<1x512xi32>
    %191 = arith.andi %186, %190 : vector<1x512xi1>
    %c-1_i32_88 = arith.constant -1 : i32
    %192 = vector.broadcast %c-1_i32_88 : i32 to vector<1x512xi32>
    %193 = arith.addi %1, %192 : vector<1x512xi32>
    %c16_i32_89 = arith.constant 16 : i32
    %194 = vector.broadcast %c16_i32_89 : i32 to vector<1x512xi32>
    %195 = arith.cmpi slt, %193, %194 : vector<1x512xi32>
    %196 = arith.andi %191, %195 : vector<1x512xi1>
    %cst_90 = arith.constant 0.000000e+00 : bf16
    %197 = vector.broadcast %cst_90 : bf16 to vector<16x512xbf16>
    %198 = vector.shape_cast %196 : vector<1x512xi1> to vector<1x512xi1>
    %199 = vector.broadcast %198 : vector<1x512xi1> to vector<16x512xi1>
    %200 = arith.select %199, %177, %197 : vector<16x512xi1>, vector<16x512xbf16>
    %c6 = arith.constant 6 : index
    %c0_91 = arith.constant 0 : index
    %c0_92 = arith.constant 0 : index
    %201 = vector.load %arg1[%c6, %c0_91, %c0_92] : memref<9x8x16xf32, #tpu.memory_space<vmem>>, vector<1x8x16xf32>
    %202 = vector.shape_cast %201 : vector<1x8x16xf32> to vector<8x16xf32>
    %203 = arith.truncf %202 : vector<8x16xf32> to vector<8x16xbf16>
    %cst_93 = arith.constant dense<0.000000e+00> : vector<8x512xf32>
    %204 = tpu.matmul %203, %200, %cst_93 {dimension_numbers = #tpu.dot_dimension_numbers<[1], [0], [0], [1], [0, 0, 1, 1], [], []>} : vector<8x16xbf16>, vector<16x512xbf16>, vector<8x512xf32> -> vector<8x512xf32>
    %205 = arith.addf %176, %204 : vector<8x512xf32>
    %c0_94 = arith.constant 0 : index
    %c33 = arith.constant 33 : index
    %206 = vector.load %arg2[%c0_94, %c33] : memref<16x546xbf16, #tpu.memory_space<vmem>>, vector<16x512xbf16>
    %c1_i32_95 = arith.constant 1 : i32
    %207 = vector.broadcast %c1_i32_95 : i32 to vector<1x512xi32>
    %208 = arith.addi %0, %207 : vector<1x512xi32>
    %c0_i32_96 = arith.constant 0 : i32
    %209 = vector.broadcast %c0_i32_96 : i32 to vector<1x512xi32>
    %210 = arith.cmpi sge, %208, %209 : vector<1x512xi32>
    %c1_i32_97 = arith.constant 1 : i32
    %211 = vector.broadcast %c1_i32_97 : i32 to vector<1x512xi32>
    %212 = arith.addi %0, %211 : vector<1x512xi32>
    %c16_i32_98 = arith.constant 16 : i32
    %213 = vector.broadcast %c16_i32_98 : i32 to vector<1x512xi32>
    %214 = arith.cmpi slt, %212, %213 : vector<1x512xi32>
    %215 = arith.andi %210, %214 : vector<1x512xi1>
    %c0_i32_99 = arith.constant 0 : i32
    %216 = vector.broadcast %c0_i32_99 : i32 to vector<1x512xi32>
    %217 = arith.addi %1, %216 : vector<1x512xi32>
    %c0_i32_100 = arith.constant 0 : i32
    %218 = vector.broadcast %c0_i32_100 : i32 to vector<1x512xi32>
    %219 = arith.cmpi sge, %217, %218 : vector<1x512xi32>
    %220 = arith.andi %215, %219 : vector<1x512xi1>
    %c0_i32_101 = arith.constant 0 : i32
    %221 = vector.broadcast %c0_i32_101 : i32 to vector<1x512xi32>
    %222 = arith.addi %1, %221 : vector<1x512xi32>
    %c16_i32_102 = arith.constant 16 : i32
    %223 = vector.broadcast %c16_i32_102 : i32 to vector<1x512xi32>
    %224 = arith.cmpi slt, %222, %223 : vector<1x512xi32>
    %225 = arith.andi %220, %224 : vector<1x512xi1>
    %cst_103 = arith.constant 0.000000e+00 : bf16
    %226 = vector.broadcast %cst_103 : bf16 to vector<16x512xbf16>
    %227 = vector.shape_cast %225 : vector<1x512xi1> to vector<1x512xi1>
    %228 = vector.broadcast %227 : vector<1x512xi1> to vector<16x512xi1>
    %229 = arith.select %228, %206, %226 : vector<16x512xi1>, vector<16x512xbf16>
    %c7 = arith.constant 7 : index
    %c0_104 = arith.constant 0 : index
    %c0_105 = arith.constant 0 : index
    %230 = vector.load %arg1[%c7, %c0_104, %c0_105] : memref<9x8x16xf32, #tpu.memory_space<vmem>>, vector<1x8x16xf32>
    %231 = vector.shape_cast %230 : vector<1x8x16xf32> to vector<8x16xf32>
    %232 = arith.truncf %231 : vector<8x16xf32> to vector<8x16xbf16>
    %cst_106 = arith.constant dense<0.000000e+00> : vector<8x512xf32>
    %233 = tpu.matmul %232, %229, %cst_106 {dimension_numbers = #tpu.dot_dimension_numbers<[1], [0], [0], [1], [0, 0, 1, 1], [], []>} : vector<8x16xbf16>, vector<16x512xbf16>, vector<8x512xf32> -> vector<8x512xf32>
    %234 = arith.addf %205, %233 : vector<8x512xf32>
    %c0_107 = arith.constant 0 : index
    %c34 = arith.constant 34 : index
    %235 = vector.load %arg2[%c0_107, %c34] : memref<16x546xbf16, #tpu.memory_space<vmem>>, vector<16x512xbf16>
    %c1_i32_108 = arith.constant 1 : i32
    %236 = vector.broadcast %c1_i32_108 : i32 to vector<1x512xi32>
    %237 = arith.addi %0, %236 : vector<1x512xi32>
    %c0_i32_109 = arith.constant 0 : i32
    %238 = vector.broadcast %c0_i32_109 : i32 to vector<1x512xi32>
    %239 = arith.cmpi sge, %237, %238 : vector<1x512xi32>
    %c1_i32_110 = arith.constant 1 : i32
    %240 = vector.broadcast %c1_i32_110 : i32 to vector<1x512xi32>
    %241 = arith.addi %0, %240 : vector<1x512xi32>
    %c16_i32_111 = arith.constant 16 : i32
    %242 = vector.broadcast %c16_i32_111 : i32 to vector<1x512xi32>
    %243 = arith.cmpi slt, %241, %242 : vector<1x512xi32>
    %244 = arith.andi %239, %243 : vector<1x512xi1>
    %c1_i32_112 = arith.constant 1 : i32
    %245 = vector.broadcast %c1_i32_112 : i32 to vector<1x512xi32>
    %246 = arith.addi %1, %245 : vector<1x512xi32>
    %c0_i32_113 = arith.constant 0 : i32
    %247 = vector.broadcast %c0_i32_113 : i32 to vector<1x512xi32>
    %248 = arith.cmpi sge, %246, %247 : vector<1x512xi32>
    %249 = arith.andi %244, %248 : vector<1x512xi1>
    %c1_i32_114 = arith.constant 1 : i32
    %250 = vector.broadcast %c1_i32_114 : i32 to vector<1x512xi32>
    %251 = arith.addi %1, %250 : vector<1x512xi32>
    %c16_i32_115 = arith.constant 16 : i32
    %252 = vector.broadcast %c16_i32_115 : i32 to vector<1x512xi32>
    %253 = arith.cmpi slt, %251, %252 : vector<1x512xi32>
    %254 = arith.andi %249, %253 : vector<1x512xi1>
    %cst_116 = arith.constant 0.000000e+00 : bf16
    %255 = vector.broadcast %cst_116 : bf16 to vector<16x512xbf16>
    %256 = vector.shape_cast %254 : vector<1x512xi1> to vector<1x512xi1>
    %257 = vector.broadcast %256 : vector<1x512xi1> to vector<16x512xi1>
    %258 = arith.select %257, %235, %255 : vector<16x512xi1>, vector<16x512xbf16>
    %c8 = arith.constant 8 : index
    %c0_117 = arith.constant 0 : index
    %c0_118 = arith.constant 0 : index
    %259 = vector.load %arg1[%c8, %c0_117, %c0_118] : memref<9x8x16xf32, #tpu.memory_space<vmem>>, vector<1x8x16xf32>
    %260 = vector.shape_cast %259 : vector<1x8x16xf32> to vector<8x16xf32>
    %261 = arith.truncf %260 : vector<8x16xf32> to vector<8x16xbf16>
    %cst_119 = arith.constant dense<0.000000e+00> : vector<8x512xf32>
    %262 = tpu.matmul %261, %258, %cst_119 {dimension_numbers = #tpu.dot_dimension_numbers<[1], [0], [0], [1], [0, 0, 1, 1], [], []>} : vector<8x16xbf16>, vector<16x512xbf16>, vector<8x512xf32> -> vector<8x512xf32>
    %263 = arith.addf %234, %262 : vector<8x512xf32>
    %cst_120 = arith.constant dense<0.000000e+00> : vector<8xf32>
    %264 = vector.multi_reduction <add>, %263, %cst_120 [1] : vector<8x512xf32> to vector<8xf32>
    %265 = vector.shape_cast %264 : vector<8xf32> to vector<8x1xf32>
    %cst_121 = arith.constant 0.001953125 : f32
    %266 = vector.broadcast %cst_121 : f32 to vector<8x1xf32>
    %267 = arith.mulf %265, %266 : vector<8x1xf32>
    %268 = arith.mulf %263, %263 : vector<8x512xf32>
    %cst_122 = arith.constant dense<0.000000e+00> : vector<8xf32>
    %269 = vector.multi_reduction <add>, %268, %cst_122 [1] : vector<8x512xf32> to vector<8xf32>
    %270 = vector.shape_cast %269 : vector<8xf32> to vector<8x1xf32>
    %cst_123 = arith.constant 0.001953125 : f32
    %271 = vector.broadcast %cst_123 : f32 to vector<8x1xf32>
    %272 = arith.mulf %270, %271 : vector<8x1xf32>
    %273 = arith.mulf %267, %267 : vector<8x1xf32>
    %274 = arith.subf %272, %273 : vector<8x1xf32>
    %cst_124 = arith.constant 0.000000e+00 : f32
    %275 = vector.broadcast %cst_124 : f32 to vector<8x1xf32>
    %276 = arith.maximumf %274, %275 : vector<8x1xf32>
    %c0_125 = arith.constant 0 : index
    %c0_126 = arith.constant 0 : index
    %277 = vector.load %arg3[%c0_125, %c0_126] : memref<8x1xf32, #tpu.memory_space<vmem>>, vector<8x1xf32>
    %cst_127 = arith.constant 9.99999974E-6 : f32
    %278 = vector.broadcast %cst_127 : f32 to vector<8x1xf32>
    %279 = arith.addf %276, %278 : vector<8x1xf32>
    %280 = math.rsqrt %279 : vector<8x1xf32>
    %281 = arith.mulf %277, %280 : vector<8x1xf32>
    %c0_128 = arith.constant 0 : index
    %c0_129 = arith.constant 0 : index
    %282 = vector.load %arg4[%c0_128, %c0_129] : memref<8x1xf32, #tpu.memory_space<vmem>>, vector<8x1xf32>
    %283 = arith.mulf %267, %281 : vector<8x1xf32>
    %284 = arith.subf %282, %283 : vector<8x1xf32>
    %285 = vector.broadcast %281 : vector<8x1xf32> to vector<8x512xf32>
    %286 = arith.mulf %263, %285 : vector<8x512xf32>
    %287 = vector.broadcast %284 : vector<8x1xf32> to vector<8x512xf32>
    %288 = arith.addf %286, %287 : vector<8x512xf32>
    %c0_130 = arith.constant 0 : index
    %c0_131 = arith.constant 0 : index
    %289 = vector.load %arg7[%c0_130, %c0_131] : memref<8x512xf32, #tpu.memory_space<vmem>>, vector<8x512xf32>
    %290 = arith.addf %288, %289 : vector<8x512xf32>
    %cst_132 = arith.constant 0.000000e+00 : f32
    %291 = vector.broadcast %cst_132 : f32 to vector<8x512xf32>
    %292 = arith.maximumf %290, %291 : vector<8x512xf32>
    %c0_133 = arith.constant 0 : index
    %c0_134 = arith.constant 0 : index
    %293 = vector.load %arg8[%c0_133, %c0_134] : memref<8x512xf32, #tpu.memory_space<vmem>>, vector<8x512xf32>
    tpu.vector_store %arg8[%c0_133, %c0_134], %292 {strides = array<i32>} : memref<8x512xf32, #tpu.memory_space<vmem>>, vector<8x512xf32>,
    return
  }
  func.func @transform_0(%arg0: i32) -> (i32, i32, i32) {
    %c0_i32 = arith.constant 0 : i32
    %c0_i32_0 = arith.constant 0 : i32
    %c0_i32_1 = arith.constant 0 : i32
    return %c0_i32, %arg0, %c0_i32_0 : i32, i32, i32
  }
  func.func @transform_1(%arg0: i32) -> (i32, i32) {
    %c0_i32 = arith.constant 0 : i32
    %c0_i32_0 = arith.constant 0 : i32
    %c0_i32_1 = arith.constant 0 : i32
    return %c0_i32, %c0_i32_0 : i32, i32
  }
  func.func @transform_2(%arg0: i32) -> (i32, i32) {
    %c0_i32 = arith.constant 0 : i32
    %c0_i32_0 = arith.constant 0 : i32
    return %arg0, %c0_i32 : i32, i32
  }
  func.func @transform_3(%arg0: i32) -> (i32, i32) {
    %c0_i32 = arith.constant 0 : i32
    %c0_i32_0 = arith.constant 0 : i32
    return %arg0, %c0_i32 : i32, i32
  }
  func.func @transform_4(%arg0: i32) -> (i32, i32) {
    %c0_i32 = arith.constant 0 : i32
    %c0_i32_0 = arith.constant 0 : i32
    %c0_i32_1 = arith.constant 0 : i32
    return %c0_i32, %c0_i32_0 : i32, i32
  }
  func.func @transform_5(%arg0: i32) -> (i32, i32) {
    %c0_i32 = arith.constant 0 : i32
    %c0_i32_0 = arith.constant 0 : i32
    %c0_i32_1 = arith.constant 0 : i32
    return %c0_i32, %c0_i32_0 : i32, i32
  }
  func.func @transform_6(%arg0: i32) -> (i32, i32) {
    %c0_i32 = arith.constant 0 : i32
    %c0_i32_0 = arith.constant 0 : i32
    return %arg0, %c0_i32 : i32, i32
  }
  func.func @transform_7(%arg0: i32) -> (i32, i32) {
    %c0_i32 = arith.constant 0 : i32
    %c0_i32_0 = arith.constant 0 : i32
    return %arg0, %c0_i32 : i32, i32
  }
}

module attributes {stable_mosaic.version = 11 : i64} {
  func.func @kernel(%arg0: i32, %arg1: memref<9x16x16xf32, #tpu.memory_space<vmem>>, %arg2: memref<16x546xf32, #tpu.memory_space<vmem>>, %arg3: memref<16x1xf32, #tpu.memory_space<vmem>>, %arg4: memref<16x1xf32, #tpu.memory_space<vmem>>, %arg5: memref<1x512xi32, #tpu.memory_space<vmem>>, %arg6: memref<1x512xi32, #tpu.memory_space<vmem>>, %arg7: memref<16x512xbf16, #tpu.memory_space<vmem>>) attributes {dimension_semantics = [#tpu.dimension_semantics<parallel>], iteration_bounds = array<i64: 1>, scalar_prefetch = 0 : i64, scratch_operands = 0 : i64, tpu.core_type = #tpu.core_type<tc>, window_params = [{transform_indices = @transform_0, window_bounds = array<i64: 9, 16, 16>}, {pipeline_mode = #tpu.pipeline_mode<synchronous>, transform_indices = @transform_1, window_bounds = array<i64: 16, 546>}, {transform_indices = @transform_2, window_bounds = array<i64: 16, 1>}, {transform_indices = @transform_3, window_bounds = array<i64: 16, 1>}, {pipeline_mode = #tpu.pipeline_mode<synchronous>, transform_indices = @transform_4, window_bounds = array<i64: 1, 512>}, {pipeline_mode = #tpu.pipeline_mode<synchronous>, transform_indices = @transform_5, window_bounds = array<i64: 1, 512>}, {transform_indices = @transform_6, window_bounds = array<i64: 16, 512>}]} {
    %c0 = arith.constant 0 : index
    %c0_0 = arith.constant 0 : index
    %0 = vector.load %arg5[%c0, %c0_0] : memref<1x512xi32, #tpu.memory_space<vmem>>, vector<1x512xi32>
    %c0_1 = arith.constant 0 : index
    %c0_2 = arith.constant 0 : index
    %1 = vector.load %arg6[%c0_1, %c0_2] : memref<1x512xi32, #tpu.memory_space<vmem>>, vector<1x512xi32>
    %cst = arith.constant 0.000000e+00 : f32
    %2 = vector.broadcast %cst : f32 to vector<16x512xf32>
    %c0_3 = arith.constant 0 : index
    %c0_4 = arith.constant 0 : index
    %3 = vector.load %arg2[%c0_3, %c0_4] : memref<16x546xf32, #tpu.memory_space<vmem>>, vector<16x512xf32>
    %c-1_i32 = arith.constant -1 : i32
    %4 = vector.broadcast %c-1_i32 : i32 to vector<1x512xi32>
    %5 = arith.addi %0, %4 : vector<1x512xi32>
    %c0_i32 = arith.constant 0 : i32
    %6 = vector.broadcast %c0_i32 : i32 to vector<1x512xi32>
    %7 = arith.cmpi sge, %5, %6 : vector<1x512xi32>
    %c-1_i32_5 = arith.constant -1 : i32
    %8 = vector.broadcast %c-1_i32_5 : i32 to vector<1x512xi32>
    %9 = arith.addi %0, %8 : vector<1x512xi32>
    %c16_i32 = arith.constant 16 : i32
    %10 = vector.broadcast %c16_i32 : i32 to vector<1x512xi32>
    %11 = arith.cmpi slt, %9, %10 : vector<1x512xi32>
    %12 = arith.andi %7, %11 : vector<1x512xi1>
    %c-1_i32_6 = arith.constant -1 : i32
    %13 = vector.broadcast %c-1_i32_6 : i32 to vector<1x512xi32>
    %14 = arith.addi %1, %13 : vector<1x512xi32>
    %c0_i32_7 = arith.constant 0 : i32
    %15 = vector.broadcast %c0_i32_7 : i32 to vector<1x512xi32>
    %16 = arith.cmpi sge, %14, %15 : vector<1x512xi32>
    %17 = arith.andi %12, %16 : vector<1x512xi1>
    %c-1_i32_8 = arith.constant -1 : i32
    %18 = vector.broadcast %c-1_i32_8 : i32 to vector<1x512xi32>
    %19 = arith.addi %1, %18 : vector<1x512xi32>
    %c16_i32_9 = arith.constant 16 : i32
    %20 = vector.broadcast %c16_i32_9 : i32 to vector<1x512xi32>
    %21 = arith.cmpi slt, %19, %20 : vector<1x512xi32>
    %22 = arith.andi %17, %21 : vector<1x512xi1>
    %cst_10 = arith.constant 0.000000e+00 : f32
    %23 = vector.broadcast %cst_10 : f32 to vector<16x512xf32>
    %24 = vector.shape_cast %22 : vector<1x512xi1> to vector<1x512xi1>
    %25 = vector.broadcast %24 : vector<1x512xi1> to vector<16x512xi1>
    %26 = arith.select %25, %3, %23 : vector<16x512xi1>, vector<16x512xf32>
    %27 = arith.truncf %26 : vector<16x512xf32> to vector<16x512xbf16>
    %c0_11 = arith.constant 0 : index
    %c0_12 = arith.constant 0 : index
    %c0_13 = arith.constant 0 : index
    %28 = vector.load %arg1[%c0_11, %c0_12, %c0_13] : memref<9x16x16xf32, #tpu.memory_space<vmem>>, vector<1x16x16xf32>
    %29 = vector.shape_cast %28 : vector<1x16x16xf32> to vector<16x16xf32>
    %30 = arith.truncf %29 : vector<16x16xf32> to vector<16x16xbf16>
    %cst_14 = arith.constant dense<0.000000e+00> : vector<16x512xf32>
    %31 = tpu.matmul %30, %27, %cst_14 {dimension_numbers = #tpu.dot_dimension_numbers<[1], [0], [0], [1], [0, 0, 1, 1], [], []>} : vector<16x16xbf16>, vector<16x512xbf16>, vector<16x512xf32> -> vector<16x512xf32>
    %32 = arith.addf %2, %31 : vector<16x512xf32>
    %c0_15 = arith.constant 0 : index
    %c1 = arith.constant 1 : index
    %33 = vector.load %arg2[%c0_15, %c1] : memref<16x546xf32, #tpu.memory_space<vmem>>, vector<16x512xf32>
    %c-1_i32_16 = arith.constant -1 : i32
    %34 = vector.broadcast %c-1_i32_16 : i32 to vector<1x512xi32>
    %35 = arith.addi %0, %34 : vector<1x512xi32>
    %c0_i32_17 = arith.constant 0 : i32
    %36 = vector.broadcast %c0_i32_17 : i32 to vector<1x512xi32>
    %37 = arith.cmpi sge, %35, %36 : vector<1x512xi32>
    %c-1_i32_18 = arith.constant -1 : i32
    %38 = vector.broadcast %c-1_i32_18 : i32 to vector<1x512xi32>
    %39 = arith.addi %0, %38 : vector<1x512xi32>
    %c16_i32_19 = arith.constant 16 : i32
    %40 = vector.broadcast %c16_i32_19 : i32 to vector<1x512xi32>
    %41 = arith.cmpi slt, %39, %40 : vector<1x512xi32>
    %42 = arith.andi %37, %41 : vector<1x512xi1>
    %c0_i32_20 = arith.constant 0 : i32
    %43 = vector.broadcast %c0_i32_20 : i32 to vector<1x512xi32>
    %44 = arith.addi %1, %43 : vector<1x512xi32>
    %c0_i32_21 = arith.constant 0 : i32
    %45 = vector.broadcast %c0_i32_21 : i32 to vector<1x512xi32>
    %46 = arith.cmpi sge, %44, %45 : vector<1x512xi32>
    %47 = arith.andi %42, %46 : vector<1x512xi1>
    %c0_i32_22 = arith.constant 0 : i32
    %48 = vector.broadcast %c0_i32_22 : i32 to vector<1x512xi32>
    %49 = arith.addi %1, %48 : vector<1x512xi32>
    %c16_i32_23 = arith.constant 16 : i32
    %50 = vector.broadcast %c16_i32_23 : i32 to vector<1x512xi32>
    %51 = arith.cmpi slt, %49, %50 : vector<1x512xi32>
    %52 = arith.andi %47, %51 : vector<1x512xi1>
    %cst_24 = arith.constant 0.000000e+00 : f32
    %53 = vector.broadcast %cst_24 : f32 to vector<16x512xf32>
    %54 = vector.shape_cast %52 : vector<1x512xi1> to vector<1x512xi1>
    %55 = vector.broadcast %54 : vector<1x512xi1> to vector<16x512xi1>
    %56 = arith.select %55, %33, %53 : vector<16x512xi1>, vector<16x512xf32>
    %57 = arith.truncf %56 : vector<16x512xf32> to vector<16x512xbf16>
    %c1_25 = arith.constant 1 : index
    %c0_26 = arith.constant 0 : index
    %c0_27 = arith.constant 0 : index
    %58 = vector.load %arg1[%c1_25, %c0_26, %c0_27] : memref<9x16x16xf32, #tpu.memory_space<vmem>>, vector<1x16x16xf32>
    %59 = vector.shape_cast %58 : vector<1x16x16xf32> to vector<16x16xf32>
    %60 = arith.truncf %59 : vector<16x16xf32> to vector<16x16xbf16>
    %cst_28 = arith.constant dense<0.000000e+00> : vector<16x512xf32>
    %61 = tpu.matmul %60, %57, %cst_28 {dimension_numbers = #tpu.dot_dimension_numbers<[1], [0], [0], [1], [0, 0, 1, 1], [], []>} : vector<16x16xbf16>, vector<16x512xbf16>, vector<16x512xf32> -> vector<16x512xf32>
    %62 = arith.addf %32, %61 : vector<16x512xf32>
    %c0_29 = arith.constant 0 : index
    %c2 = arith.constant 2 : index
    %63 = vector.load %arg2[%c0_29, %c2] : memref<16x546xf32, #tpu.memory_space<vmem>>, vector<16x512xf32>
    %c-1_i32_30 = arith.constant -1 : i32
    %64 = vector.broadcast %c-1_i32_30 : i32 to vector<1x512xi32>
    %65 = arith.addi %0, %64 : vector<1x512xi32>
    %c0_i32_31 = arith.constant 0 : i32
    %66 = vector.broadcast %c0_i32_31 : i32 to vector<1x512xi32>
    %67 = arith.cmpi sge, %65, %66 : vector<1x512xi32>
    %c-1_i32_32 = arith.constant -1 : i32
    %68 = vector.broadcast %c-1_i32_32 : i32 to vector<1x512xi32>
    %69 = arith.addi %0, %68 : vector<1x512xi32>
    %c16_i32_33 = arith.constant 16 : i32
    %70 = vector.broadcast %c16_i32_33 : i32 to vector<1x512xi32>
    %71 = arith.cmpi slt, %69, %70 : vector<1x512xi32>
    %72 = arith.andi %67, %71 : vector<1x512xi1>
    %c1_i32 = arith.constant 1 : i32
    %73 = vector.broadcast %c1_i32 : i32 to vector<1x512xi32>
    %74 = arith.addi %1, %73 : vector<1x512xi32>
    %c0_i32_34 = arith.constant 0 : i32
    %75 = vector.broadcast %c0_i32_34 : i32 to vector<1x512xi32>
    %76 = arith.cmpi sge, %74, %75 : vector<1x512xi32>
    %77 = arith.andi %72, %76 : vector<1x512xi1>
    %c1_i32_35 = arith.constant 1 : i32
    %78 = vector.broadcast %c1_i32_35 : i32 to vector<1x512xi32>
    %79 = arith.addi %1, %78 : vector<1x512xi32>
    %c16_i32_36 = arith.constant 16 : i32
    %80 = vector.broadcast %c16_i32_36 : i32 to vector<1x512xi32>
    %81 = arith.cmpi slt, %79, %80 : vector<1x512xi32>
    %82 = arith.andi %77, %81 : vector<1x512xi1>
    %cst_37 = arith.constant 0.000000e+00 : f32
    %83 = vector.broadcast %cst_37 : f32 to vector<16x512xf32>
    %84 = vector.shape_cast %82 : vector<1x512xi1> to vector<1x512xi1>
    %85 = vector.broadcast %84 : vector<1x512xi1> to vector<16x512xi1>
    %86 = arith.select %85, %63, %83 : vector<16x512xi1>, vector<16x512xf32>
    %87 = arith.truncf %86 : vector<16x512xf32> to vector<16x512xbf16>
    %c2_38 = arith.constant 2 : index
    %c0_39 = arith.constant 0 : index
    %c0_40 = arith.constant 0 : index
    %88 = vector.load %arg1[%c2_38, %c0_39, %c0_40] : memref<9x16x16xf32, #tpu.memory_space<vmem>>, vector<1x16x16xf32>
    %89 = vector.shape_cast %88 : vector<1x16x16xf32> to vector<16x16xf32>
    %90 = arith.truncf %89 : vector<16x16xf32> to vector<16x16xbf16>
    %cst_41 = arith.constant dense<0.000000e+00> : vector<16x512xf32>
    %91 = tpu.matmul %90, %87, %cst_41 {dimension_numbers = #tpu.dot_dimension_numbers<[1], [0], [0], [1], [0, 0, 1, 1], [], []>} : vector<16x16xbf16>, vector<16x512xbf16>, vector<16x512xf32> -> vector<16x512xf32>
    %92 = arith.addf %62, %91 : vector<16x512xf32>
    %c0_42 = arith.constant 0 : index
    %c16 = arith.constant 16 : index
    %93 = vector.load %arg2[%c0_42, %c16] : memref<16x546xf32, #tpu.memory_space<vmem>>, vector<16x512xf32>
    %c0_i32_43 = arith.constant 0 : i32
    %94 = vector.broadcast %c0_i32_43 : i32 to vector<1x512xi32>
    %95 = arith.addi %0, %94 : vector<1x512xi32>
    %c0_i32_44 = arith.constant 0 : i32
    %96 = vector.broadcast %c0_i32_44 : i32 to vector<1x512xi32>
    %97 = arith.cmpi sge, %95, %96 : vector<1x512xi32>
    %c0_i32_45 = arith.constant 0 : i32
    %98 = vector.broadcast %c0_i32_45 : i32 to vector<1x512xi32>
    %99 = arith.addi %0, %98 : vector<1x512xi32>
    %c16_i32_46 = arith.constant 16 : i32
    %100 = vector.broadcast %c16_i32_46 : i32 to vector<1x512xi32>
    %101 = arith.cmpi slt, %99, %100 : vector<1x512xi32>
    %102 = arith.andi %97, %101 : vector<1x512xi1>
    %c-1_i32_47 = arith.constant -1 : i32
    %103 = vector.broadcast %c-1_i32_47 : i32 to vector<1x512xi32>
    %104 = arith.addi %1, %103 : vector<1x512xi32>
    %c0_i32_48 = arith.constant 0 : i32
    %105 = vector.broadcast %c0_i32_48 : i32 to vector<1x512xi32>
    %106 = arith.cmpi sge, %104, %105 : vector<1x512xi32>
    %107 = arith.andi %102, %106 : vector<1x512xi1>
    %c-1_i32_49 = arith.constant -1 : i32
    %108 = vector.broadcast %c-1_i32_49 : i32 to vector<1x512xi32>
    %109 = arith.addi %1, %108 : vector<1x512xi32>
    %c16_i32_50 = arith.constant 16 : i32
    %110 = vector.broadcast %c16_i32_50 : i32 to vector<1x512xi32>
    %111 = arith.cmpi slt, %109, %110 : vector<1x512xi32>
    %112 = arith.andi %107, %111 : vector<1x512xi1>
    %cst_51 = arith.constant 0.000000e+00 : f32
    %113 = vector.broadcast %cst_51 : f32 to vector<16x512xf32>
    %114 = vector.shape_cast %112 : vector<1x512xi1> to vector<1x512xi1>
    %115 = vector.broadcast %114 : vector<1x512xi1> to vector<16x512xi1>
    %116 = arith.select %115, %93, %113 : vector<16x512xi1>, vector<16x512xf32>
    %117 = arith.truncf %116 : vector<16x512xf32> to vector<16x512xbf16>
    %c3 = arith.constant 3 : index
    %c0_52 = arith.constant 0 : index
    %c0_53 = arith.constant 0 : index
    %118 = vector.load %arg1[%c3, %c0_52, %c0_53] : memref<9x16x16xf32, #tpu.memory_space<vmem>>, vector<1x16x16xf32>
    %119 = vector.shape_cast %118 : vector<1x16x16xf32> to vector<16x16xf32>
    %120 = arith.truncf %119 : vector<16x16xf32> to vector<16x16xbf16>
    %cst_54 = arith.constant dense<0.000000e+00> : vector<16x512xf32>
    %121 = tpu.matmul %120, %117, %cst_54 {dimension_numbers = #tpu.dot_dimension_numbers<[1], [0], [0], [1], [0, 0, 1, 1], [], []>} : vector<16x16xbf16>, vector<16x512xbf16>, vector<16x512xf32> -> vector<16x512xf32>
    %122 = arith.addf %92, %121 : vector<16x512xf32>
    %c0_55 = arith.constant 0 : index
    %c17 = arith.constant 17 : index
    %123 = vector.load %arg2[%c0_55, %c17] : memref<16x546xf32, #tpu.memory_space<vmem>>, vector<16x512xf32>
    %c0_i32_56 = arith.constant 0 : i32
    %124 = vector.broadcast %c0_i32_56 : i32 to vector<1x512xi32>
    %125 = arith.addi %0, %124 : vector<1x512xi32>
    %c0_i32_57 = arith.constant 0 : i32
    %126 = vector.broadcast %c0_i32_57 : i32 to vector<1x512xi32>
    %127 = arith.cmpi sge, %125, %126 : vector<1x512xi32>
    %c0_i32_58 = arith.constant 0 : i32
    %128 = vector.broadcast %c0_i32_58 : i32 to vector<1x512xi32>
    %129 = arith.addi %0, %128 : vector<1x512xi32>
    %c16_i32_59 = arith.constant 16 : i32
    %130 = vector.broadcast %c16_i32_59 : i32 to vector<1x512xi32>
    %131 = arith.cmpi slt, %129, %130 : vector<1x512xi32>
    %132 = arith.andi %127, %131 : vector<1x512xi1>
    %c0_i32_60 = arith.constant 0 : i32
    %133 = vector.broadcast %c0_i32_60 : i32 to vector<1x512xi32>
    %134 = arith.addi %1, %133 : vector<1x512xi32>
    %c0_i32_61 = arith.constant 0 : i32
    %135 = vector.broadcast %c0_i32_61 : i32 to vector<1x512xi32>
    %136 = arith.cmpi sge, %134, %135 : vector<1x512xi32>
    %137 = arith.andi %132, %136 : vector<1x512xi1>
    %c0_i32_62 = arith.constant 0 : i32
    %138 = vector.broadcast %c0_i32_62 : i32 to vector<1x512xi32>
    %139 = arith.addi %1, %138 : vector<1x512xi32>
    %c16_i32_63 = arith.constant 16 : i32
    %140 = vector.broadcast %c16_i32_63 : i32 to vector<1x512xi32>
    %141 = arith.cmpi slt, %139, %140 : vector<1x512xi32>
    %142 = arith.andi %137, %141 : vector<1x512xi1>
    %cst_64 = arith.constant 0.000000e+00 : f32
    %143 = vector.broadcast %cst_64 : f32 to vector<16x512xf32>
    %144 = vector.shape_cast %142 : vector<1x512xi1> to vector<1x512xi1>
    %145 = vector.broadcast %144 : vector<1x512xi1> to vector<16x512xi1>
    %146 = arith.select %145, %123, %143 : vector<16x512xi1>, vector<16x512xf32>
    %147 = arith.truncf %146 : vector<16x512xf32> to vector<16x512xbf16>
    %c4 = arith.constant 4 : index
    %c0_65 = arith.constant 0 : index
    %c0_66 = arith.constant 0 : index
    %148 = vector.load %arg1[%c4, %c0_65, %c0_66] : memref<9x16x16xf32, #tpu.memory_space<vmem>>, vector<1x16x16xf32>
    %149 = vector.shape_cast %148 : vector<1x16x16xf32> to vector<16x16xf32>
    %150 = arith.truncf %149 : vector<16x16xf32> to vector<16x16xbf16>
    %cst_67 = arith.constant dense<0.000000e+00> : vector<16x512xf32>
    %151 = tpu.matmul %150, %147, %cst_67 {dimension_numbers = #tpu.dot_dimension_numbers<[1], [0], [0], [1], [0, 0, 1, 1], [], []>} : vector<16x16xbf16>, vector<16x512xbf16>, vector<16x512xf32> -> vector<16x512xf32>
    %152 = arith.addf %122, %151 : vector<16x512xf32>
    %c0_68 = arith.constant 0 : index
    %c18 = arith.constant 18 : index
    %153 = vector.load %arg2[%c0_68, %c18] : memref<16x546xf32, #tpu.memory_space<vmem>>, vector<16x512xf32>
    %c0_i32_69 = arith.constant 0 : i32
    %154 = vector.broadcast %c0_i32_69 : i32 to vector<1x512xi32>
    %155 = arith.addi %0, %154 : vector<1x512xi32>
    %c0_i32_70 = arith.constant 0 : i32
    %156 = vector.broadcast %c0_i32_70 : i32 to vector<1x512xi32>
    %157 = arith.cmpi sge, %155, %156 : vector<1x512xi32>
    %c0_i32_71 = arith.constant 0 : i32
    %158 = vector.broadcast %c0_i32_71 : i32 to vector<1x512xi32>
    %159 = arith.addi %0, %158 : vector<1x512xi32>
    %c16_i32_72 = arith.constant 16 : i32
    %160 = vector.broadcast %c16_i32_72 : i32 to vector<1x512xi32>
    %161 = arith.cmpi slt, %159, %160 : vector<1x512xi32>
    %162 = arith.andi %157, %161 : vector<1x512xi1>
    %c1_i32_73 = arith.constant 1 : i32
    %163 = vector.broadcast %c1_i32_73 : i32 to vector<1x512xi32>
    %164 = arith.addi %1, %163 : vector<1x512xi32>
    %c0_i32_74 = arith.constant 0 : i32
    %165 = vector.broadcast %c0_i32_74 : i32 to vector<1x512xi32>
    %166 = arith.cmpi sge, %164, %165 : vector<1x512xi32>
    %167 = arith.andi %162, %166 : vector<1x512xi1>
    %c1_i32_75 = arith.constant 1 : i32
    %168 = vector.broadcast %c1_i32_75 : i32 to vector<1x512xi32>
    %169 = arith.addi %1, %168 : vector<1x512xi32>
    %c16_i32_76 = arith.constant 16 : i32
    %170 = vector.broadcast %c16_i32_76 : i32 to vector<1x512xi32>
    %171 = arith.cmpi slt, %169, %170 : vector<1x512xi32>
    %172 = arith.andi %167, %171 : vector<1x512xi1>
    %cst_77 = arith.constant 0.000000e+00 : f32
    %173 = vector.broadcast %cst_77 : f32 to vector<16x512xf32>
    %174 = vector.shape_cast %172 : vector<1x512xi1> to vector<1x512xi1>
    %175 = vector.broadcast %174 : vector<1x512xi1> to vector<16x512xi1>
    %176 = arith.select %175, %153, %173 : vector<16x512xi1>, vector<16x512xf32>
    %177 = arith.truncf %176 : vector<16x512xf32> to vector<16x512xbf16>
    %c5 = arith.constant 5 : index
    %c0_78 = arith.constant 0 : index
    %c0_79 = arith.constant 0 : index
    %178 = vector.load %arg1[%c5, %c0_78, %c0_79] : memref<9x16x16xf32, #tpu.memory_space<vmem>>, vector<1x16x16xf32>
    %179 = vector.shape_cast %178 : vector<1x16x16xf32> to vector<16x16xf32>
    %180 = arith.truncf %179 : vector<16x16xf32> to vector<16x16xbf16>
    %cst_80 = arith.constant dense<0.000000e+00> : vector<16x512xf32>
    %181 = tpu.matmul %180, %177, %cst_80 {dimension_numbers = #tpu.dot_dimension_numbers<[1], [0], [0], [1], [0, 0, 1, 1], [], []>} : vector<16x16xbf16>, vector<16x512xbf16>, vector<16x512xf32> -> vector<16x512xf32>
    %182 = arith.addf %152, %181 : vector<16x512xf32>
    %c0_81 = arith.constant 0 : index
    %c32 = arith.constant 32 : index
    %183 = vector.load %arg2[%c0_81, %c32] : memref<16x546xf32, #tpu.memory_space<vmem>>, vector<16x512xf32>
    %c1_i32_82 = arith.constant 1 : i32
    %184 = vector.broadcast %c1_i32_82 : i32 to vector<1x512xi32>
    %185 = arith.addi %0, %184 : vector<1x512xi32>
    %c0_i32_83 = arith.constant 0 : i32
    %186 = vector.broadcast %c0_i32_83 : i32 to vector<1x512xi32>
    %187 = arith.cmpi sge, %185, %186 : vector<1x512xi32>
    %c1_i32_84 = arith.constant 1 : i32
    %188 = vector.broadcast %c1_i32_84 : i32 to vector<1x512xi32>
    %189 = arith.addi %0, %188 : vector<1x512xi32>
    %c16_i32_85 = arith.constant 16 : i32
    %190 = vector.broadcast %c16_i32_85 : i32 to vector<1x512xi32>
    %191 = arith.cmpi slt, %189, %190 : vector<1x512xi32>
    %192 = arith.andi %187, %191 : vector<1x512xi1>
    %c-1_i32_86 = arith.constant -1 : i32
    %193 = vector.broadcast %c-1_i32_86 : i32 to vector<1x512xi32>
    %194 = arith.addi %1, %193 : vector<1x512xi32>
    %c0_i32_87 = arith.constant 0 : i32
    %195 = vector.broadcast %c0_i32_87 : i32 to vector<1x512xi32>
    %196 = arith.cmpi sge, %194, %195 : vector<1x512xi32>
    %197 = arith.andi %192, %196 : vector<1x512xi1>
    %c-1_i32_88 = arith.constant -1 : i32
    %198 = vector.broadcast %c-1_i32_88 : i32 to vector<1x512xi32>
    %199 = arith.addi %1, %198 : vector<1x512xi32>
    %c16_i32_89 = arith.constant 16 : i32
    %200 = vector.broadcast %c16_i32_89 : i32 to vector<1x512xi32>
    %201 = arith.cmpi slt, %199, %200 : vector<1x512xi32>
    %202 = arith.andi %197, %201 : vector<1x512xi1>
    %cst_90 = arith.constant 0.000000e+00 : f32
    %203 = vector.broadcast %cst_90 : f32 to vector<16x512xf32>
    %204 = vector.shape_cast %202 : vector<1x512xi1> to vector<1x512xi1>
    %205 = vector.broadcast %204 : vector<1x512xi1> to vector<16x512xi1>
    %206 = arith.select %205, %183, %203 : vector<16x512xi1>, vector<16x512xf32>
    %207 = arith.truncf %206 : vector<16x512xf32> to vector<16x512xbf16>
    %c6 = arith.constant 6 : index
    %c0_91 = arith.constant 0 : index
    %c0_92 = arith.constant 0 : index
    %208 = vector.load %arg1[%c6, %c0_91, %c0_92] : memref<9x16x16xf32, #tpu.memory_space<vmem>>, vector<1x16x16xf32>
    %209 = vector.shape_cast %208 : vector<1x16x16xf32> to vector<16x16xf32>
    %210 = arith.truncf %209 : vector<16x16xf32> to vector<16x16xbf16>
    %cst_93 = arith.constant dense<0.000000e+00> : vector<16x512xf32>
    %211 = tpu.matmul %210, %207, %cst_93 {dimension_numbers = #tpu.dot_dimension_numbers<[1], [0], [0], [1], [0, 0, 1, 1], [], []>} : vector<16x16xbf16>, vector<16x512xbf16>, vector<16x512xf32> -> vector<16x512xf32>
    %212 = arith.addf %182, %211 : vector<16x512xf32>
    %c0_94 = arith.constant 0 : index
    %c33 = arith.constant 33 : index
    %213 = vector.load %arg2[%c0_94, %c33] : memref<16x546xf32, #tpu.memory_space<vmem>>, vector<16x512xf32>
    %c1_i32_95 = arith.constant 1 : i32
    %214 = vector.broadcast %c1_i32_95 : i32 to vector<1x512xi32>
    %215 = arith.addi %0, %214 : vector<1x512xi32>
    %c0_i32_96 = arith.constant 0 : i32
    %216 = vector.broadcast %c0_i32_96 : i32 to vector<1x512xi32>
    %217 = arith.cmpi sge, %215, %216 : vector<1x512xi32>
    %c1_i32_97 = arith.constant 1 : i32
    %218 = vector.broadcast %c1_i32_97 : i32 to vector<1x512xi32>
    %219 = arith.addi %0, %218 : vector<1x512xi32>
    %c16_i32_98 = arith.constant 16 : i32
    %220 = vector.broadcast %c16_i32_98 : i32 to vector<1x512xi32>
    %221 = arith.cmpi slt, %219, %220 : vector<1x512xi32>
    %222 = arith.andi %217, %221 : vector<1x512xi1>
    %c0_i32_99 = arith.constant 0 : i32
    %223 = vector.broadcast %c0_i32_99 : i32 to vector<1x512xi32>
    %224 = arith.addi %1, %223 : vector<1x512xi32>
    %c0_i32_100 = arith.constant 0 : i32
    %225 = vector.broadcast %c0_i32_100 : i32 to vector<1x512xi32>
    %226 = arith.cmpi sge, %224, %225 : vector<1x512xi32>
    %227 = arith.andi %222, %226 : vector<1x512xi1>
    %c0_i32_101 = arith.constant 0 : i32
    %228 = vector.broadcast %c0_i32_101 : i32 to vector<1x512xi32>
    %229 = arith.addi %1, %228 : vector<1x512xi32>
    %c16_i32_102 = arith.constant 16 : i32
    %230 = vector.broadcast %c16_i32_102 : i32 to vector<1x512xi32>
    %231 = arith.cmpi slt, %229, %230 : vector<1x512xi32>
    %232 = arith.andi %227, %231 : vector<1x512xi1>
    %cst_103 = arith.constant 0.000000e+00 : f32
    %233 = vector.broadcast %cst_103 : f32 to vector<16x512xf32>
    %234 = vector.shape_cast %232 : vector<1x512xi1> to vector<1x512xi1>
    %235 = vector.broadcast %234 : vector<1x512xi1> to vector<16x512xi1>
    %236 = arith.select %235, %213, %233 : vector<16x512xi1>, vector<16x512xf32>
    %237 = arith.truncf %236 : vector<16x512xf32> to vector<16x512xbf16>
    %c7 = arith.constant 7 : index
    %c0_104 = arith.constant 0 : index
    %c0_105 = arith.constant 0 : index
    %238 = vector.load %arg1[%c7, %c0_104, %c0_105] : memref<9x16x16xf32, #tpu.memory_space<vmem>>, vector<1x16x16xf32>
    %239 = vector.shape_cast %238 : vector<1x16x16xf32> to vector<16x16xf32>
    %240 = arith.truncf %239 : vector<16x16xf32> to vector<16x16xbf16>
    %cst_106 = arith.constant dense<0.000000e+00> : vector<16x512xf32>
    %241 = tpu.matmul %240, %237, %cst_106 {dimension_numbers = #tpu.dot_dimension_numbers<[1], [0], [0], [1], [0, 0, 1, 1], [], []>} : vector<16x16xbf16>, vector<16x512xbf16>, vector<16x512xf32> -> vector<16x512xf32>
    %242 = arith.addf %212, %241 : vector<16x512xf32>
    %c0_107 = arith.constant 0 : index
    %c34 = arith.constant 34 : index
    %243 = vector.load %arg2[%c0_107, %c34] : memref<16x546xf32, #tpu.memory_space<vmem>>, vector<16x512xf32>
    %c1_i32_108 = arith.constant 1 : i32
    %244 = vector.broadcast %c1_i32_108 : i32 to vector<1x512xi32>
    %245 = arith.addi %0, %244 : vector<1x512xi32>
    %c0_i32_109 = arith.constant 0 : i32
    %246 = vector.broadcast %c0_i32_109 : i32 to vector<1x512xi32>
    %247 = arith.cmpi sge, %245, %246 : vector<1x512xi32>
    %c1_i32_110 = arith.constant 1 : i32
    %248 = vector.broadcast %c1_i32_110 : i32 to vector<1x512xi32>
    %249 = arith.addi %0, %248 : vector<1x512xi32>
    %c16_i32_111 = arith.constant 16 : i32
    %250 = vector.broadcast %c16_i32_111 : i32 to vector<1x512xi32>
    %251 = arith.cmpi slt, %249, %250 : vector<1x512xi32>
    %252 = arith.andi %247, %251 : vector<1x512xi1>
    %c1_i32_112 = arith.constant 1 : i32
    %253 = vector.broadcast %c1_i32_112 : i32 to vector<1x512xi32>
    %254 = arith.addi %1, %253 : vector<1x512xi32>
    %c0_i32_113 = arith.constant 0 : i32
    %255 = vector.broadcast %c0_i32_113 : i32 to vector<1x512xi32>
    %256 = arith.cmpi sge, %254, %255 : vector<1x512xi32>
    %257 = arith.andi %252, %256 : vector<1x512xi1>
    %c1_i32_114 = arith.constant 1 : i32
    %258 = vector.broadcast %c1_i32_114 : i32 to vector<1x512xi32>
    %259 = arith.addi %1, %258 : vector<1x512xi32>
    %c16_i32_115 = arith.constant 16 : i32
    %260 = vector.broadcast %c16_i32_115 : i32 to vector<1x512xi32>
    %261 = arith.cmpi slt, %259, %260 : vector<1x512xi32>
    %262 = arith.andi %257, %261 : vector<1x512xi1>
    %cst_116 = arith.constant 0.000000e+00 : f32
    %263 = vector.broadcast %cst_116 : f32 to vector<16x512xf32>
    %264 = vector.shape_cast %262 : vector<1x512xi1> to vector<1x512xi1>
    %265 = vector.broadcast %264 : vector<1x512xi1> to vector<16x512xi1>
    %266 = arith.select %265, %243, %263 : vector<16x512xi1>, vector<16x512xf32>
    %267 = arith.truncf %266 : vector<16x512xf32> to vector<16x512xbf16>
    %c8 = arith.constant 8 : index
    %c0_117 = arith.constant 0 : index
    %c0_118 = arith.constant 0 : index
    %268 = vector.load %arg1[%c8, %c0_117, %c0_118] : memref<9x16x16xf32, #tpu.memory_space<vmem>>, vector<1x16x16xf32>
    %269 = vector.shape_cast %268 : vector<1x16x16xf32> to vector<16x16xf32>
    %270 = arith.truncf %269 : vector<16x16xf32> to vector<16x16xbf16>
    %cst_119 = arith.constant dense<0.000000e+00> : vector<16x512xf32>
    %271 = tpu.matmul %270, %267, %cst_119 {dimension_numbers = #tpu.dot_dimension_numbers<[1], [0], [0], [1], [0, 0, 1, 1], [], []>} : vector<16x16xbf16>, vector<16x512xbf16>, vector<16x512xf32> -> vector<16x512xf32>
    %272 = arith.addf %242, %271 : vector<16x512xf32>
    %cst_120 = arith.constant dense<0.000000e+00> : vector<16xf32>
    %273 = vector.multi_reduction <add>, %272, %cst_120 [1] : vector<16x512xf32> to vector<16xf32>
    %274 = vector.shape_cast %273 : vector<16xf32> to vector<16x1xf32>
    %cst_121 = arith.constant 0.001953125 : f32
    %275 = vector.broadcast %cst_121 : f32 to vector<16x1xf32>
    %276 = arith.mulf %274, %275 : vector<16x1xf32>
    %277 = arith.mulf %272, %272 : vector<16x512xf32>
    %cst_122 = arith.constant dense<0.000000e+00> : vector<16xf32>
    %278 = vector.multi_reduction <add>, %277, %cst_122 [1] : vector<16x512xf32> to vector<16xf32>
    %279 = vector.shape_cast %278 : vector<16xf32> to vector<16x1xf32>
    %cst_123 = arith.constant 0.001953125 : f32
    %280 = vector.broadcast %cst_123 : f32 to vector<16x1xf32>
    %281 = arith.mulf %279, %280 : vector<16x1xf32>
    %282 = arith.mulf %276, %276 : vector<16x1xf32>
    %283 = arith.subf %281, %282 : vector<16x1xf32>
    %cst_124 = arith.constant 0.000000e+00 : f32
    %284 = vector.broadcast %cst_124 : f32 to vector<16x1xf32>
    %285 = arith.maximumf %283, %284 : vector<16x1xf32>
    %c0_125 = arith.constant 0 : index
    %c0_126 = arith.constant 0 : index
    %286 = vector.load %arg3[%c0_125, %c0_126] : memref<16x1xf32, #tpu.memory_space<vmem>>, vector<16x1xf32>
    %cst_127 = arith.constant 9.99999974E-6 : f32
    %287 = vector.broadcast %cst_127 : f32 to vector<16x1xf32>
    %288 = arith.addf %285, %287 : vector<16x1xf32>
    %289 = math.rsqrt %288 : vector<16x1xf32>
    %290 = arith.mulf %286, %289 : vector<16x1xf32>
    %c0_128 = arith.constant 0 : index
    %c0_129 = arith.constant 0 : index
    %291 = vector.load %arg4[%c0_128, %c0_129] : memref<16x1xf32, #tpu.memory_space<vmem>>, vector<16x1xf32>
    %292 = arith.mulf %276, %290 : vector<16x1xf32>
    %293 = arith.subf %291, %292 : vector<16x1xf32>
    %294 = vector.broadcast %290 : vector<16x1xf32> to vector<16x512xf32>
    %295 = arith.mulf %272, %294 : vector<16x512xf32>
    %296 = vector.broadcast %293 : vector<16x1xf32> to vector<16x512xf32>
    %297 = arith.addf %295, %296 : vector<16x512xf32>
    %cst_130 = arith.constant 0.000000e+00 : f32
    %298 = vector.broadcast %cst_130 : f32 to vector<16x512xf32>
    %299 = arith.maximumf %297, %298 : vector<16x512xf32>
    %300 = arith.truncf %299 : vector<16x512xf32> to vector<16x512xbf16>
    %c0_131 = arith.constant 0 : index
    %c0_132 = arith.constant 0 : index
    %301 = vector.load %arg7[%c0_131, %c0_132] : memref<16x512xbf16, #tpu.memory_space<vmem>>, vector<16x512xbf16>
    tpu.vector_store %arg7[%c0_131, %c0_132], %300 {strides = array<i32>} : memref<16x512xbf16, #tpu.memory_space<vmem>>, vector<16x512xbf16>,
    return
  }
  func.func @transform_0(%arg0: i32) -> (i32, i32, i32) {
    %c0_i32 = arith.constant 0 : i32
    %c0_i32_0 = arith.constant 0 : i32
    %c0_i32_1 = arith.constant 0 : i32
    return %c0_i32, %arg0, %c0_i32_0 : i32, i32, i32
  }
  func.func @transform_1(%arg0: i32) -> (i32, i32) {
    %c0_i32 = arith.constant 0 : i32
    %c0_i32_0 = arith.constant 0 : i32
    %c0_i32_1 = arith.constant 0 : i32
    return %c0_i32, %c0_i32_0 : i32, i32
  }
  func.func @transform_2(%arg0: i32) -> (i32, i32) {
    %c0_i32 = arith.constant 0 : i32
    %c0_i32_0 = arith.constant 0 : i32
    return %arg0, %c0_i32 : i32, i32
  }
  func.func @transform_3(%arg0: i32) -> (i32, i32) {
    %c0_i32 = arith.constant 0 : i32
    %c0_i32_0 = arith.constant 0 : i32
    return %arg0, %c0_i32 : i32, i32
  }
  func.func @transform_4(%arg0: i32) -> (i32, i32) {
    %c0_i32 = arith.constant 0 : i32
    %c0_i32_0 = arith.constant 0 : i32
    %c0_i32_1 = arith.constant 0 : i32
    return %c0_i32, %c0_i32_0 : i32, i32
  }
  func.func @transform_5(%arg0: i32) -> (i32, i32) {
    %c0_i32 = arith.constant 0 : i32
    %c0_i32_0 = arith.constant 0 : i32
    %c0_i32_1 = arith.constant 0 : i32
    return %c0_i32, %c0_i32_0 : i32, i32
  }
  func.func @transform_6(%arg0: i32) -> (i32, i32) {
    %c0_i32 = arith.constant 0 : i32
    %c0_i32_0 = arith.constant 0 : i32
    return %arg0, %c0_i32 : i32, i32
  }
}

</mosaic_0001>

<bundles_post_ra>
// kernel: basic_block_forward.2
= control target key start
LH: loop header
LB: loop body
LE: loop exit
PB: predicated region body
PF: predicated region fallthrough
CT: control target
= control target key end

     0   :  { %v2126_v3 = vmov 0   ;;  %s2127_s13 = smov 127   ;;  %s2128_s18 = smov 126   ;;  %v3177_v26 = vmov 0  ;;  %v44_v29 = vlaneseq  ;;  %s3159_s1 = inlined_call_operand.vmem [shape: f32[16,546], index: 1, kind: input, shape index: {}]   ;;  %s3160_s4 = inlined_call_operand.vmem [shape: s32[1,512], index: 4, kind: input, shape index: {}]   ;;  %s3161_s5 = inlined_call_operand.vmem [shape: s32[1,512], index: 5, kind: input, shape index: {}]   ;;  %s3162_s0 = inlined_call_operand.vmem [shape: f32[9,16,16], index: 0, kind: input, shape index: {}]   ;;  %s3163_s2 = inlined_call_operand.vmem [shape: f32[16,1], index: 2, kind: input, shape index: {}]   ;;  %s3164_s3 = inlined_call_operand.vmem [shape: f32[16,1], index: 3, kind: input, shape index: {}]   ;;  %s3165_s6 = inlined_call_operand.vmem [shape: bf16[16,512], index: 6, kind: output, shape index: {}]  }
   0x1   :  { %v2173_v0 = vld [vmem:[%s3159_s1 + $0x8] sm:$0xff]  ;;  %v2178_v1 = vld [vmem:[%s3159_s1 + $0x10] sm:$0xff]  ;;  %v2183_v2 = vld [vmem:[%s3159_s1] sm:$0xff]  ;;  %205 = vmatprep.mubr.bf16.mxu0 %v2126_v3  ;;  %248 = vmatprep.mubr.bf16.mxu1 %v2126_v3  ;;  %s2130_s19 = smov 111   ;;  %s2131_s20 = smov 110  }
   0x2   :  { %v2189_v4 = vpack.i.bf16 %v2178_v1, %v2173_v0  ;;  %v2194_v5 = vld [vmem:[%s3159_s1 + $0x28] sm:$0xff]  ;;  %v2199_v6 = vld [vmem:[%s3159_s1 + $0x30] sm:$0xff]  ;;  %v2204_v7 = vld [vmem:[%s3159_s1 + $0x38] sm:$0xff]  ;;  %2120 = vset.pattern.permute.xlu1 %v2126_v3  ;;  %2121 = vset.pattern.permute.xlu0 %v2126_v3  ;;  %s2132_s21 = smov 96   ;;  %s2133_s24 = smov 95   ;;  %v45_v31 = vshrl.u32 %v44_v29, 7 }
   0x3   :  { %v2209_v8 = vpack.i.bf16 %v2194_v5, %v2183_v2  ;;  %v2214_v9 = vld [vmem:[%s3159_s1 + $0x18] sm:$0xff]  ;;  %v79_v10 = vld [vmem:[%s3159_s1 + $0x20] sm:$0xff]  ;;  %v1925_v11 = vpack.i.bf16 %v2204_v7, %v2199_v6  ;;  %v80_v14 = vld [vmem:[%s3159_s1 + $0x48] sm:$0xff]  ;;  %v1714_v16 = vpack.c.bf16 %v2199_v6, %v2173_v0  ;;  %v1717_v17 = vpack.c.bf16 %v2194_v5, %v2183_v2 }
   0x4   :  { %1921 = vrot.lane.b32.xlu0 %v2189_v4, %s2127_s13  ;;  %v2225_v12 = vpack.i.bf16 %v79_v10, %v2214_v9  ;;  %v2230_v13 = vld [vmem:[%s3159_s1 + $0x40] sm:$0xff]  ;;  %v1724_v19 = vpack.c.bf16 %v2204_v7, %v2178_v1  ;;  %s2129_s1 = smov 112   ;;  %v2328_v32 = vsub.s32 1, %v45_v31  ;;  %v2331_v34 = vsub.s32 0, %v45_v31 }
   0x5   :  { %1931 = vrot.lane.b32.xlu1 %v2209_v8, %s2127_s13  ;;  %v1940_v15 = vpack.i.bf16 %v80_v14, %v2230_v13  ;;  %v1721_v18 = vpack.c.bf16 %v2230_v13, %v2214_v9  ;;  %v2263_v20 = vld [vmem:[%s3160_s4] sm:$0xf]  ;;  %s2134_s4 = smov 94   ;;  %v2335_v35 = vsub.s32 3, %v45_v31  ;;  %v2337_v36 = vsub.s32 2, %v45_v31 }
   0x6   :  { %v1046_v21 = vadd.s32 1, %v2263_v20  ;;  %v2270_v22 = vld [vmem:[%s3161_s5] sm:$0xf]  ;;  %v34_v27 = vadd.s32 4294967295, %v2263_v20 }
   0x7   :  { %vm3168_vm2 = vcmp.ge.s32.totalorder %v2270_v22, 0  ;;  %vm3167_vm4 = vcmp.lt.s32.totalorder %v2270_v22, 16  ;;  %v2293_v25 = vadd.s32 1, %v2270_v22  ;;  %v2314_v30 = vadd.s32 4294967295, %v2270_v22 }
   0x8   :  { %1926 = vrot.lane.b32.xlu0 %v1925_v11, %s2127_s13  ;;  %vm1047_vm0 = vcmp.ge.s32.totalorder %v1046_v21, 0  ;;  %vm1048_vm1 = vcmp.lt.s32.totalorder %v1046_v21, 16  ;;  %vm35_vm11 = vcmp.ge.s32.totalorder %v34_v27, 0  ;;  %vm36_vm12 = vcmp.lt.s32.totalorder %v34_v27, 16  ;;  %v1698_v21 = vld [vmem:[%s3162_s0 + $0x18] sm:$0xff] }
   0x9   :  { %1936 = vrot.lane.b32.xlu1 %v2225_v12, %s2127_s13  ;;  %vm2275_vm3 = vmand %vm1047_vm0, %vm1048_vm1  ;;  %vm3166_vm7 = vcmp.ge.s32.totalorder %v2293_v25, 0  ;;  %vm3169_vm8 = vcmp.lt.s32.totalorder %v2293_v25, 16  ;;  %vm3171_vm15 = vcmp.ge.s32.totalorder %v2314_v30, 0 }
   0xa   :  { %vm1223_vm5 = vmand %vm2275_vm3, %vm3168_vm2 }
   0xb   :  { %vm2286_vm6 = vmand %vm1223_vm5, %vm3167_vm4  ;;  %vm3170_vm5 = vcmp.lt.s32.totalorder %v2314_v30, 16 }
   0xc   :  { %1941 = vrot.lane.b32.xlu0 %v1940_v15, %s2127_s13  ;;  %vm1396_vm9 = vmand %vm2275_vm3, %vm3166_vm7 }
   0xd   :  { %1946 = vrot.lane.b32.xlu1 %v2189_v4, %s2128_s18  ;;  %vm2304_vm10 = vmand %vm1396_vm9, %vm3169_vm8 }
   0xe   :  { %v3178_v26 = vsel %vm2304_vm10, 4294967295, %v3177_v26  ;;  %vm2309_vm13 = vmand %vm35_vm11, %vm36_vm12  ;;  %vm3202_vm10 = vcmask 1039360  }
   0xf   :  { %vm82_vm14 = vmand %vm2309_vm13, %vm3168_vm2 }
  0x10   :  { %1951 = vrot.lane.b32.xlu0 %v1925_v11, %s2128_s18  ;;  %vm84_vm0 = vmand %vm82_vm14, %vm3167_vm4  ;;  %vm3172_vm14 = vcmask 1039360  }
  0x11   :  { %1956 = vrot.lane.b32.xlu1 %v2209_v8, %s2128_s18  ;;  %vm40_vm1 = vmand %vm2309_vm13, %vm3171_vm15  ;;  %v85_v33 = vsel %vm84_vm0, 1, %v2126_v3 }
  0x12   :  { %vm42_vm9 = vmand %vm40_vm1, %vm3170_vm5  ;;  %v93_v37 = vrot.slane %v85_v33, %v2328_v32  ;;  %v89_v38 = vrot.slane %v85_v33, %v2331_v34  ;;  %v101_v41 = vrot.slane %v85_v33, %v2335_v35  ;;  %v97_v42 = vrot.slane %v85_v33, %v2337_v36 }
  0x13   :  { %v2342_v39 = vsel %vm42_vm9, 1, %v2126_v3  ;;  %vm350_vm11 = vmand %vm2309_vm13, %vm3166_vm7  ;;  %vm524_vm1 = vcmp.ge.s32.totalorder %v2263_v20, 0  ;;  %vm525_vm9 = vcmp.lt.s32.totalorder %v2263_v20, 16 }
  0x14   :  { %1961 = vrot.lane.b32.xlu0 %v2225_v12, %s2128_s18  ;;  %vm2350_vm12 = vcmp.eq.s32.totalorder %v93_v37, 1  ;;  %v51_v45 = vrot.slane %v2342_v39, %v2328_v32  ;;  %vm2356_vm0 = vcmp.eq.s32.totalorder %v89_v38, 1  ;;  %vm2362_vm13 = vmand %vm350_vm11, %vm3169_vm8  ;;  %vm2371_vm4 = vcmp.eq.s32.totalorder %v101_v41, 1 }
  0x15   :  { %1966 = vrot.lane.b32.xlu1 %v1940_v15, %s2128_s18  ;;  %vm1699_vm7 = vmpackc.low %vm2350_vm12, %vm2350_vm12  ;;  %vm2375_vm2 = vcmp.eq.s32.totalorder %v97_v42, 1  ;;  %v47_v55 = vrot.slane %v2342_v39, %v2331_v34  ;;  %v2391_v60 = vsel %vm2362_vm13, 1, %v2126_v3  ;;  %v59_v63 = vrot.slane %v2342_v39, %v2335_v35 }
  0x16   :  { %vm2384_vm8 = vcmp.eq.s32.totalorder %v51_v45, 1  ;;  %vm2402_vm5 = vmand %vm524_vm1, %vm525_vm9  ;;  %v361_v31 = vrot.slane %v2391_v60, %v2328_v32  ;;  %vm3211_vm11 = vcmask 1031168   ;;  %v357_v2 = vrot.slane %v2391_v60, %v2331_v34 }
  0x17   :  { %vm2421_vm9 = vcmp.eq.s32.totalorder %v47_v55, 1  ;;  %vm2434_vm13 = vmand %vm2402_vm5, %vm3171_vm15  ;;  %vm2448_vm1 = vcmp.eq.s32.totalorder %v59_v63, 1 }
  0x18   :  { %1971 = vrot.lane.b32.xlu0 %v2189_v4, %s2129_s1  ;;  %vm3201_vm15 = vmpackc.low %vm2356_vm0, %vm2356_vm0  ;;  %vm2477_vm0 = vcmp.eq.s32.totalorder %v361_v31, 1 }
  0x19   :  { %1976 = vrot.lane.b32.xlu1 %v1925_v11, %s2129_s1  ;;  %vm3203_vm12 = vmmov %vm3202_vm10 }
  0x1c   :  { %1981 = vrot.lane.b32.xlu0 %v2209_v8, %s2129_s1 }
  0x1d   :  { %1986 = vrot.lane.b32.xlu1 %v2225_v12, %s2129_s1 }
  0x20   :  { %1991 = vrot.lane.b32.xlu0 %v1940_v15, %s2129_s1 }
  0x21   :  { %1996 = vrot.lane.b32.xlu1 %v2189_v4, %s2130_s19 }
  0x24   :  { %2001 = vrot.lane.b32.xlu0 %v1925_v11, %s2130_s19 }
  0x25   :  { %2006 = vrot.lane.b32.xlu1 %v2209_v8, %s2130_s19 }
  0x28   :  { %2011 = vrot.lane.b32.xlu0 %v2225_v12, %s2130_s19 }
  0x29   :  { %2016 = vrot.lane.b32.xlu1 %v1940_v15, %s2130_s19 }
  0x2c   :  { %2021 = vrot.lane.b32.xlu0 %v2189_v4, %s2131_s20 }
  0x2d   :  { %2026 = vrot.lane.b32.xlu1 %v1925_v11, %s2131_s20 }
  0x30   :  { %2031 = vrot.lane.b32.xlu0 %v2209_v8, %s2131_s20 }
  0x31   :  { %2036 = vrot.lane.b32.xlu1 %v2225_v12, %s2131_s20 }
  0x34   :  { %2041 = vrot.lane.b32.xlu0 %v1940_v15, %s2131_s20 }
  0x35   :  { %2046 = vrot.lane.b32.xlu1 %v2189_v4, %s2132_s21 }
  0x38   :  { %2051 = vrot.lane.b32.xlu0 %v1925_v11, %s2132_s21 }
  0x39   :  { %2056 = vrot.lane.b32.xlu1 %v2209_v8, %s2132_s21 }
  0x3c   :  { %2061 = vrot.lane.b32.xlu0 %v2225_v12, %s2132_s21 }
  0x3d   :  { %2066 = vrot.lane.b32.xlu1 %v1940_v15, %s2132_s21 }
  0x40   :  { %2071 = vrot.lane.b32.xlu0 %v2189_v4, %s2133_s24 }
  0x41   :  { %2076 = vrot.lane.b32.xlu1 %v1925_v11, %s2133_s24 }
  0x44   :  { %2081 = vrot.lane.b32.xlu0 %v2209_v8, %s2133_s24 }
  0x45   :  { %2086 = vrot.lane.b32.xlu1 %v2225_v12, %s2133_s24 }
  0x48   :  { %2091 = vrot.lane.b32.xlu0 %v1940_v15, %s2133_s24 }
  0x49   :  { %2096 = vrot.lane.b32.xlu1 %v2189_v4, %s2134_s4  ;;  %v55_v4 = vrot.slane %v2342_v39, %v2337_v36 }
  0x4c   :  { %2101 = vrot.lane.b32.xlu0 %v1925_v11, %s2134_s4 }
  0x4d   :  { %2106 = vrot.lane.b32.xlu1 %v2209_v8, %s2134_s4 }
  0x50   :  { %2111 = vrot.lane.b32.xlu0 %v2225_v12, %s2134_s4 }
  0x51   :  { %2116 = vrot.lane.b32.xlu1 %v1940_v15, %s2134_s4  ;;  %v1697_v15 = vld [vmem:[%s3162_s0 + $0x10] sm:$0xff] }
  0x76   :  { %v1922_v40 = vpop.permute.xlu0 %1921 }
  0x77   :  { %v1932_v43 = vpop.permute.xlu1 %1931  ;;  %v1924_v46 = vunpack.i.h.bf16 %v1922_v40  ;;  %v1923_v47 = vunpack.i.l.bf16 %v1922_v40 }
  0x78   :  { %v1934_v50 = vunpack.i.h.bf16 %v1932_v43  ;;  %v1933_v51 = vunpack.i.l.bf16 %v1932_v43  ;;  %v168_v43 = vpack.c.bf16 %v1698_v21, %v1697_v15 }
  0x79   :  { %v138_v62 = vsel %vm3172_vm14, %v1923_v47, %v1924_v46 }
  0x7a   :  { %v1927_v52 = vpop.permute.xlu0 %1926  ;;  %v137_v12 = vsel %vm3172_vm14, %v1933_v51, %v1923_v47 }
  0x7b   :  { %v1929_v56 = vunpack.i.h.bf16 %v1927_v52  ;;  %v1928_v57 = vunpack.i.l.bf16 %v1927_v52  ;;  %v1937_v58 = vpop.permute.xlu1 %1936 }
  0x7c   :  { %v1939_v61 = vunpack.i.h.bf16 %v1937_v58  ;;  %v1938_v10 = vunpack.i.l.bf16 %v1937_v58 }
  0x7d   :  { %v142_v11 = vsel %vm3172_vm14, %v1928_v57, %v1929_v56  ;;  %v141_v14 = vsel %vm3172_vm14, %v1934_v50, %v1928_v57 }
  0x7e   :  { %v1942_v20 = vpop.permute.xlu0 %1941  ;;  %v1700_v27 = vpack.c.bf16 %v142_v11, %v138_v62  ;;  %v1703_v28 = vpack.c.bf16 %v141_v14, %v137_v12  ;;  %v140_v39 = vsel %vm3172_vm14, %v1938_v10, %v1939_v61  ;;  %vm169_vm14 = vcmask 130048   ;;  %v77_v11 = vld [vmem:[%s3162_s0 + $0x8] sm:$0xff] }
  0x7f   :  { %v1944_v33 = vunpack.i.h.bf16 %v1942_v20  ;;  %v1943_v37 = vunpack.i.l.bf16 %v1942_v20  ;;  %v2427_v38 = vpop.permute.xlu1 %1946  ;;  %v139_v47 = vsel %vm3203_vm12, %v1924_v46, %v1938_v10  ;;  %vm3210_vm12 = vcmp.lt.s32.totalorder %v2314_v30, 16 }
  0x80   :  { %v1949_v41 = vunpack.i.h.bf16 %v2427_v38  ;;  %v1948_v42 = vunpack.i.l.bf16 %v2427_v38  ;;  %1701 = vmatprep.subr.msk.bf16.mxu0 %vm1699_vm7, %v1700_v27  ;;  %vm3204_vm7 = vmmov %vm3202_vm10 }
  0x81   :  { %1704 = vmatpush1.bf16.msk.msra.mxu0 %vm3201_vm15, %v1703_v28  ;;  %v144_v44 = vsel %vm3202_vm10, %v1943_v37, %v1944_v33  ;;  %v143_v49 = vsel %vm3204_vm7, %v1929_v56, %v1943_v37  ;;  %vm3205_vm10 = vmpackc.low %vm2384_vm8, %vm2384_vm8  ;;  %vm2473_vm15 = vcmp.eq.s32.totalorder %v55_v4, 1  ;;  %v369_v56 = vrot.slane %v2391_v60, %v2335_v35 }
  0x82   :  { %v2463_v50 = vpop.permute.xlu0 %1951  ;;  %v1707_v51 = vpack.c.bf16 %v144_v44, %v140_v39  ;;  %v1710_v52 = vpack.c.bf16 %v143_v49, %v139_v47  ;;  %1715 = vmatprep.subr.msk.bf16.mxu0 %vm3205_vm10, %v1714_v16  ;;  %vm528_vm7 = vmand %vm2434_vm13, %vm3210_vm12  ;;  %v396_v0 = vsel %vm3211_vm11, %v1948_v42, %v1949_v41  ;;  %vm570_vm12 = vcmask 916480  }
  0x83   :  { %v1954_v6 = vunpack.i.h.bf16 %v2463_v50  ;;  %v1953_v16 = vunpack.i.l.bf16 %v2463_v50  ;;  %v1957_v55 = vpop.permute.xlu1 %1956  ;;  %vm1720_vm8 = vmpackc.low %vm2448_vm1, %vm2448_vm1  ;;  %v2519_v53 = vsel %vm528_vm7, 1, %v2126_v3  ;;  %v365_v28 = vrot.slane %v2391_v60, %v2337_v36 }
  0x84   :  { %1705 = vmatmul.mubr.msk.bf16.vlgmr.msra.gmra.mrb[0].mxu0 %vm169_vm14, %v168_v43  ;;  %vm3212_vm13 = vmpackc.low %vm2371_vm4, %vm2371_vm4  ;;  %v1959_v54 = vunpack.i.h.bf16 %v1957_v55  ;;  %v1958_v59 = vunpack.i.l.bf16 %v1957_v55  ;;  %v537_v9 = vrot.slane %v2519_v53, %v2328_v32  ;;  %v545_v44 = vrot.slane %v2519_v53, %v2335_v35 }
  0x85   :  { %1708 = vmatprep.subr.msk.bf16.mxu1 %vm3212_vm13, %v1707_v51  ;;  %v400_v57 = vsel %vm3211_vm11, %v1953_v16, %v1954_v6  ;;  %vm3213_vm10 = vmpackc.low %vm2375_vm2, %vm2375_vm2  ;;  %294 = vmatprep.mubr.bf16.mxu0 %v2126_v3  ;;  %vm2558_vm13 = vcmp.eq.s32.totalorder %v357_v2, 1  ;;  %v1727_v2 = vld [vmem:[%s3162_s0 + $0x20] sm:$0xff] }
  0x86   :  { %1711 = vmatpush1.bf16.msk.msra.mxu1 %vm3213_vm10, %v1710_v52  ;;  %vm3214_vm1 = vmpackc.low %vm2421_vm9, %vm2421_vm9  ;;  %v1730_v58 = vpack.c.bf16 %v400_v57, %v396_v0  ;;  %v1962_v61 = vpop.permute.xlu0 %1961  ;;  %vm2530_vm9 = vcmp.eq.s32.totalorder %v369_v56, 1  ;;  %vm3223_vm10 = vcmp.ge.s32.totalorder %v2270_v22, 0  ;;  %v533_v0 = vrot.slane %v2519_v53, %v2331_v34 }
  0x87   :  { %1718 = vmatpush1.bf16.msk.msra.mxu0 %vm3214_vm1, %v1717_v17  ;;  %vm1729_vm4 = vmpackc.low %vm2477_vm0, %vm2477_vm0  ;;  %1722 = vmatprep.subr.msk.bf16.mxu1 %vm1720_vm8, %v1721_v18  ;;  %v1964_v5 = vunpack.i.h.bf16 %v1962_v61  ;;  %v1963_v17 = vunpack.i.l.bf16 %v1962_v61  ;;  %v1967_v62 = vpop.permute.xlu1 %1966  ;;  %v76_v18 = vld [vmem:[%s3162_s0] sm:$0xff] }
  0x88   :  { %vm1723_vm2 = vmpackc.low %vm2473_vm15, %vm2473_vm15  ;;  %v1969_v4 = vunpack.i.h.bf16 %v1967_v62  ;;  %v1968_v10 = vunpack.i.l.bf16 %v1967_v62  ;;  %1731 = vmatprep.subr.msk.bf16.mxu0 %vm1729_vm4, %v1730_v58  ;;  %v78_v33 = vpack.c.bf16 %v77_v11, %v76_v18  ;;  %vm2577_vm4 = vcmp.eq.s32.totalorder %v537_v9, 1 }
  0x89   :  { %1712 = vmatmul.mubr.msk.bf16.vlgmr.msra.gmra.mrb[0].mxu1 %vm169_vm14, %v168_v43  ;;  %vm3217_vm15 = vmmov %vm3211_vm11 }
  0x8a   :  { %v398_v13 = vsel %vm3217_vm15, %v1963_v17, %v1964_v5  ;;  %1725 = vmatpush1.bf16.msk.msra.mxu1 %vm1723_vm2, %v1724_v19  ;;  %337 = vmatprep.mubr.bf16.mxu1 %v2126_v3  ;;  %vm3218_vm0 = vmmov %vm3211_vm11  ;;  %v2556_v21 = vpop.permute.xlu0 %1971  ;;  %v1728_v5 = vld [vmem:[%s3162_s0 + $0x28] sm:$0xff] }
  0x8b   :  { %v399_v12 = vsel %vm3218_vm0, %v1959_v54, %v1953_v16  ;;  %vm3219_vm7 = vmmov %vm3218_vm0  ;;  %v1974_v19 = vunpack.i.h.bf16 %v2556_v21  ;;  %v1973_v20 = vunpack.i.l.bf16 %v2556_v21  ;;  %v2567_v27 = vpop.permute.xlu1 %1976 }
  0x8c   :  { %v395_v14 = vsel %vm3219_vm7, %v1958_v59, %v1948_v42  ;;  %vm3220_vm8 = vmmov %vm3218_vm0  ;;  %v1979_v29 = vunpack.i.h.bf16 %v2567_v27  ;;  %v1978_v31 = vunpack.i.l.bf16 %v2567_v27 }
  0x8d   :  { %v402_v15 = vsel %vm3220_vm8, %v1968_v10, %v1969_v4  ;;  %vm1736_vm11 = vmpackc.low %vm2530_vm9, %vm2530_vm9  ;;  %v1733_v39 = vpack.c.bf16 %v399_v12, %v395_v14  ;;  %v572_v40 = vsel %vm570_vm12, %v1973_v20, %v1974_v19  ;;  %vm2598_vm8 = vcmp.eq.s32.totalorder %v365_v28, 1 }
  0x8e   :  { %v1737_v7 = vpack.c.bf16 %v402_v15, %v398_v13  ;;  %vm700_vm1 = vmand %vm2402_vm5, %vm3223_vm10  ;;  %v1982_v43 = vpop.permute.xlu0 %1981  ;;  %v576_v45 = vsel %vm570_vm12, %v1978_v31, %v1979_v29  ;;  %v541_v12 = vrot.slane %v2519_v53, %v2337_v36  ;;  %v426_v14 = vpack.c.bf16 %v1728_v5, %v1727_v2 }
  0x8f   :  { %vm1732_vm2 = vmpackc.low %vm2558_vm13, %vm2558_vm13  ;;  %v1746_v47 = vpack.c.bf16 %v576_v45, %v572_v40  ;;  %v1987_v49 = vpop.permute.xlu1 %1986  ;;  %v1984_v52 = vunpack.i.h.bf16 %v1982_v43  ;;  %v1983_v46 = vunpack.i.l.bf16 %v1982_v43  ;;  %vm743_vm13 = vcmask 908288  }
  0x90   :  { %1738 = vmatprep.subr.msk.bf16.mxu1 %vm1736_vm11, %v1737_v7  ;;  %vm3226_vm9 = vmmov %vm3218_vm0  ;;  %1719 = vmatmul.mubr.msk.bf16.vlgmr.msra.gmra.mrb[0].mxu0 %vm169_vm14, %v78_v33  ;;  %v1989_v38 = vunpack.i.h.bf16 %v1987_v49 }
  0x91   :  { %v397_v60 = vsel %vm3226_vm9, %v1949_v41, %v1963_v17  ;;  %vm3227_vm15 = vmmov %vm3218_vm0  ;;  %vm3228_vm0 = vcmp.lt.s32.totalorder %v2270_v22, 16  ;;  %v1988_v41 = vunpack.i.l.bf16 %v1987_v49  ;;  %1734 = vmatpush1.bf16.msk.msra.mxu0 %vm1732_vm2, %v1733_v39  ;;  %462 = vmatprep.mubr.bf16.mxu0 %v2126_v3  ;;  %v571_v17 = vsel %vm570_vm12, %v1983_v46, %v1973_v20  ;;  %v1743_v46 = vld [vmem:[%s3162_s0 + $0x30] sm:$0xff] }
  0x92   :  { %v401_v42 = vsel %vm3227_vm15, %v1954_v6, %v1968_v10  ;;  %vm701_vm7 = vmand %vm700_vm1, %vm3228_vm0  ;;  %v1992_v48 = vpop.permute.xlu0 %1991  ;;  %vm2620_vm1 = vcmp.eq.s32.totalorder %v545_v44, 1  ;;  %v575_v62 = vsel %vm570_vm12, %v1984_v52, %v1978_v31  ;;  %vm2647_vm2 = vcmp.eq.s32.totalorder %v533_v0, 1 }
  0x93   :  { %vm1745_vm11 = vmpackc.low %vm2577_vm4, %vm2577_vm4  ;;  %v1740_v51 = vpack.c.bf16 %v401_v42, %v397_v60  ;;  %v2613_v22 = vsel %vm701_vm7, 1, %v2126_v3  ;;  %v1994_v16 = vunpack.i.h.bf16 %v1992_v48  ;;  %v1993_v55 = vunpack.i.l.bf16 %v1992_v48  ;;  %v2625_v57 = vpop.permute.xlu1 %1996  ;;  %v1744_v48 = vld [vmem:[%s3162_s0 + $0x38] sm:$0xff] }
  0x94   :  { %vm1739_vm10 = vmpackc.low %vm2598_vm8, %vm2598_vm8  ;;  %1747 = vmatprep.subr.msk.bf16.mxu0 %vm1745_vm11, %v1746_v47  ;;  %v574_v56 = vsel %vm570_vm12, %v1988_v41, %v1989_v38  ;;  %v1999_v58 = vunpack.i.h.bf16 %v2625_v57  ;;  %v1998_v54 = vunpack.i.l.bf16 %v2625_v57  ;;  %v710_v59 = vrot.slane %v2613_v22, %v2328_v32 }
  0x95   :  { %1726 = vmatmul.mubr.msk.bf16.vlgmr.msra.gmra.mrb[0].mxu1 %vm169_vm14, %v78_v33  ;;  %v578_v61 = vsel %vm570_vm12, %v1993_v55, %v1994_v16  ;;  %vm1752_vm4 = vmpackc.low %vm2620_vm1, %vm2620_vm1  ;;  %vm3235_vm9 = vcmp.ge.s32.totalorder %v2293_v25, 0  ;;  %v718_v1 = vrot.slane %v2613_v22, %v2335_v35  ;;  %v1749_v7 = vpack.c.bf16 %v575_v62, %v571_v17 }
  0x96   :  { %1741 = vmatpush1.bf16.msk.msra.mxu1 %vm1739_vm10, %v1740_v51  ;;  %505 = vmatprep.mubr.bf16.mxu1 %v2126_v3  ;;  %v1753_v63 = vpack.c.bf16 %v578_v61, %v574_v56  ;;  %v2645_v4 = vpop.permute.xlu0 %2001  ;;  %v745_v9 = vsel %vm743_vm13, %v1998_v54, %v1999_v58  ;;  %vm873_vm15 = vmand %vm2402_vm5, %vm3235_vm9  ;;  %vm2664_vm0 = vcmp.eq.s32.totalorder %v710_v59, 1  ;;  %v577_v8 = vsel %vm570_vm12, %v1979_v29, %v1993_v55 }
  0x97   :  { %v2004_v13 = vunpack.i.h.bf16 %v2645_v4  ;;  %v2003_v18 = vunpack.i.l.bf16 %v2645_v4  ;;  %v2007_v11 = vpop.permute.xlu1 %2006  ;;  %vm1748_vm7 = vmpackc.low %vm2647_vm2, %vm2647_vm2  ;;  %v573_v53 = vsel %vm570_vm12, %v1974_v19, %v1988_v41  ;;  %vm3238_vm5 = vcmp.lt.s32.totalorder %v2293_v25, 16 }
  0x98   :  { %1754 = vmatprep.subr.msk.bf16.mxu1 %vm1752_vm4, %v1753_v63  ;;  %vm874_vm8 = vmand %vm873_vm15, %vm3238_vm5  ;;  %vm2684_vm11 = vcmp.eq.s32.totalorder %v541_v12, 1  ;;  %vm2692_vm12 = vcmp.eq.s32.totalorder %v718_v1, 1  ;;  %v1756_v25 = vpack.c.bf16 %v577_v8, %v573_v53  ;;  %v2009_v42 = vunpack.i.h.bf16 %v2007_v11  ;;  %v1776_v1 = vld [vmem:[%s3162_s0 + $0x58] sm:$0xff] }
  0x99   :  { %v749_v20 = vsel %vm743_vm13, %v2003_v18, %v2004_v13  ;;  %vm1761_vm10 = vmpackc.low %vm2664_vm0, %vm2664_vm0  ;;  %v2704_v60 = vsel %vm874_vm8, 1, %v2126_v3  ;;  %v2008_v43 = vunpack.i.l.bf16 %v2007_v11  ;;  %v706_v47 = vrot.slane %v2613_v22, %v2331_v34 }
  0x9a   :  { %v1762_v28 = vpack.c.bf16 %v749_v20, %v745_v9  ;;  %v2012_v31 = vpop.permute.xlu0 %2011  ;;  %vm1755_vm1 = vmpackc.low %vm2684_vm11, %vm2684_vm11  ;;  %vm916_vm2 = vcmask 900096   ;;  %v883_v0 = vrot.slane %v2704_v60, %v2328_v32  ;;  %v748_v6 = vsel %vm743_vm13, %v2009_v42, %v2003_v18 }
  0x9b   :  { %v2014_v33 = vunpack.i.h.bf16 %v2012_v31  ;;  %v2013_v37 = vunpack.i.l.bf16 %v2012_v31  ;;  %v2017_v39 = vpop.permute.xlu1 %2016  ;;  %vm1768_vm4 = vmpackc.low %vm2692_vm12, %vm2692_vm12  ;;  %v744_v16 = vsel %vm743_vm13, %v2008_v43, %v1998_v54  ;;  %vm2742_vm9 = vcmp.eq.s32.totalorder %v706_v47, 1  ;;  %v1760_v31 = vld [vmem:[%s3162_s0 + $0x48] sm:$0xff] }
  0x9c   :  { %1735 = vmatmul.mubr.msk.bf16.vlgmr.msra.gmra.mrb[0].mxu0 %vm169_vm14, %v426_v14  ;;  %v2019_v21 = vunpack.i.h.bf16 %v2017_v39  ;;  %v2018_v19 = vunpack.i.l.bf16 %v2017_v39  ;;  %v602_v2 = vpack.c.bf16 %v1744_v48, %v1743_v46  ;;  %v714_v5 = vrot.slane %v2613_v22, %v2337_v36  ;;  %vm1764_vm5 = vmpackc.low %vm2742_vm9, %vm2742_vm9 }
  0x9d   :  { %1750 = vmatpush1.bf16.msk.msra.mxu0 %vm1748_vm7, %v1749_v7  ;;  %v747_v29 = vsel %vm743_vm13, %v2013_v37, %v2014_v33  ;;  %638 = vmatprep.mubr.bf16.mxu0 %v2126_v3  ;;  %vm3245_vm15 = vcmp.ge.s32.totalorder %v2314_v30, 0  ;;  %vm2766_vm7 = vcmp.eq.s32.totalorder %v883_v0, 1  ;;  %v891_v10 = vrot.slane %v2704_v60, %v2335_v35 }
  0x9e   :  { %v751_v45 = vsel %vm743_vm13, %v2018_v19, %v2019_v21  ;;  %v2710_v44 = vpop.permute.xlu0 %2021  ;;  %1763 = vmatprep.subr.msk.bf16.mxu0 %vm1761_vm10, %v1762_v28  ;;  %vm1050_vm0 = vmand %vm2275_vm3, %vm3245_vm15  ;;  %v1765_v9 = vpack.c.bf16 %v748_v6, %v744_v16  ;;  %v746_v23 = vsel %vm743_vm13, %v1999_v58, %v2013_v37  ;;  %v750_v22 = vsel %vm743_vm13, %v2004_v13, %v2018_v19  ;;  %v1759_v28 = vld [vmem:[%s3162_s0 + $0x40] sm:$0xff] }
  0x9f   :  { %v1769_v49 = vpack.c.bf16 %v751_v45, %v747_v29  ;;  %v2024_v50 = vunpack.i.h.bf16 %v2710_v44  ;;  %v2023_v38 = vunpack.i.l.bf16 %v2710_v44  ;;  %v2716_v41 = vpop.permute.xlu1 %2026  ;;  %vm3248_vm3 = vcmp.lt.s32.totalorder %v2314_v30, 16  ;;  %vm1777_vm10 = vmpackc.low %vm2766_vm7, %vm2766_vm7 }
  0xa0   :  { %v2029_v51 = vunpack.i.h.bf16 %v2716_v41  ;;  %v2028_v52 = vunpack.i.l.bf16 %v2716_v41  ;;  %vm1051_vm8 = vmand %vm1050_vm0, %vm3248_vm3  ;;  %vm2784_vm11 = vcmp.eq.s32.totalorder %v714_v5, 1  ;;  %vm2794_vm13 = vcmp.eq.s32.totalorder %v891_v10, 1 }
  0xa1   :  { %1742 = vmatmul.mubr.msk.bf16.vlgmr.msra.gmra.mrb[0].mxu1 %vm169_vm14, %v426_v14  ;;  %v918_v59 = vsel %vm916_vm2, %v2023_v38, %v2024_v50  ;;  %v1772_v30 = vpack.c.bf16 %v750_v22, %v746_v23  ;;  %v2801_v13 = vsel %vm1051_vm8, 1, %v2126_v3  ;;  %vm1771_vm12 = vmpackc.low %vm2784_vm11, %vm2784_vm11  ;;  %v879_v33 = vrot.slane %v2704_v60, %v2331_v34 }
  0xa2   :  { %1757 = vmatpush1.bf16.msk.msra.mxu1 %vm1755_vm1, %v1756_v25  ;;  %681 = vmatprep.mubr.bf16.mxu1 %v2126_v3  ;;  %v2032_v55 = vpop.permute.xlu0 %2031  ;;  %v922_v61 = vsel %vm916_vm2, %v2028_v52, %v2029_v51  ;;  %vm1784_vm1 = vmpackc.low %vm2794_vm13, %vm2794_vm13  ;;  %v1060_v27 = vrot.slane %v2801_v13, %v2328_v32  ;;  %v775_v25 = vpack.c.bf16 %v1760_v31, %v1759_v28 }
  0xa3   :  { %1770 = vmatprep.subr.msk.bf16.mxu1 %vm1768_vm4, %v1769_v49  ;;  %v2756_v54 = vpop.permute.xlu1 %2036  ;;  %v1778_v18 = vpack.c.bf16 %v922_v61, %v918_v59  ;;  %v2034_v7 = vunpack.i.h.bf16 %v2032_v55  ;;  %v2033_v20 = vunpack.i.l.bf16 %v2032_v55  ;;  %vm1093_vm4 = vcmask 785408  }
  0xa4   :  { %v2039_v17 = vunpack.i.h.bf16 %v2756_v54  ;;  %v2038_v62 = vunpack.i.l.bf16 %v2756_v54  ;;  %vm2835_vm9 = vcmp.eq.s32.totalorder %v879_v33, 1  ;;  %v887_v47 = vrot.slane %v2704_v60, %v2337_v36 }
  0xa5   :  { %v917_v29 = vsel %vm916_vm2, %v2033_v20, %v2023_v38  ;;  %v921_v42 = vsel %vm916_vm2, %v2034_v7, %v2028_v52  ;;  %vm2855_vm15 = vcmp.eq.s32.totalorder %v1060_v27, 1  ;;  %v1068_v16 = vrot.slane %v2801_v13, %v2335_v35  ;;  %vm1780_vm0 = vmpackc.low %vm2835_vm9, %vm2835_vm9 }
  0xa6   :  { %v2042_v11 = vpop.permute.xlu0 %2041  ;;  %v920_v15 = vsel %vm916_vm2, %v2038_v62, %v2039_v17  ;;  %v1781_v55 = vpack.c.bf16 %v921_v42, %v917_v29  ;;  %v919_v56 = vsel %vm916_vm2, %v2024_v50, %v2038_v62  ;;  %vm2874_vm7 = vcmp.eq.s32.totalorder %v887_v47, 1 }
  0xa7   :  { %v2044_v12 = vunpack.i.h.bf16 %v2042_v11  ;;  %v2043_v14 = vunpack.i.l.bf16 %v2042_v11  ;;  %v2788_v57 = vpop.permute.xlu1 %2046  ;;  %v1056_v50 = vrot.slane %v2801_v13, %v2331_v34  ;;  %vm1787_vm3 = vmpackc.low %vm2874_vm7, %vm2874_vm7  ;;  %vm3269_vm9 = vnez %v3178_v26 }
  0xa8   :  { %1751 = vmatmul.mubr.msk.bf16.vlgmr.msra.gmra.mrb[0].mxu0 %vm169_vm14, %v602_v2  ;;  %v2049_v37 = vunpack.i.h.bf16 %v2788_v57  ;;  %v2048_v39 = vunpack.i.l.bf16 %v2788_v57 }
  0xa9   :  { %1766 = vmatpush1.bf16.msk.msra.mxu0 %vm1764_vm5, %v1765_v9  ;;  %v924_v4 = vsel %vm916_vm2, %v2043_v14, %v2044_v12  ;;  %811 = vmatprep.mubr.bf16.mxu0 %v2126_v3  ;;  %v923_v59 = vsel %vm916_vm2, %v2029_v51, %v2043_v14  ;;  %vm1793_vm5 = vmpackc.low %vm2855_vm15, %vm2855_vm15  ;;  %vm2886_vm2 = vcmp.eq.s32.totalorder %v1068_v16, 1  ;;  %v2893_v51 = vsel %vm2286_vm6, 1, %v2126_v3 }
  0xaa   :  { %v1785_v8 = vpack.c.bf16 %v924_v4, %v920_v15  ;;  %1779 = vmatprep.subr.msk.bf16.mxu0 %vm1777_vm10, %v1778_v18  ;;  %v2806_v53 = vpop.permute.xlu0 %2051  ;;  %v1095_v49 = vsel %vm1093_vm4, %v2048_v39, %v2049_v37  ;;  %v1788_v62 = vpack.c.bf16 %v923_v59, %v919_v56  ;;  %vm1266_vm6 = vcmask 777216   ;;  %vm1800_vm8 = vmpackc.low %vm2886_vm2, %vm2886_vm2  ;;  %v1775_v15 = vld [vmem:[%s3162_s0 + $0x50] sm:$0xff] }
  0xab   :  { %v2054_v40 = vunpack.i.h.bf16 %v2806_v53  ;;  %v2053_v21 = vunpack.i.l.bf16 %v2806_v53  ;;  %v2820_v19 = vpop.permute.xlu1 %2056  ;;  %v1233_v14 = vrot.slane %v2893_v51, %v2328_v32  ;;  %vm2921_vm11 = vcmp.eq.s32.totalorder %v1056_v50, 1 }
  0xac   :  { %v2059_v63 = vunpack.i.h.bf16 %v2820_v19  ;;  %v2058_v10 = vunpack.i.l.bf16 %v2820_v19  ;;  %v948_v19 = vpack.c.bf16 %v1776_v1, %v1775_v15  ;;  %vm1796_vm13 = vmpackc.low %vm2921_vm11, %vm2921_vm11  ;;  %v1229_v53 = vrot.slane %v2893_v51, %v2331_v34 }
  0xad   :  { %1758 = vmatmul.mubr.msk.bf16.vlgmr.msra.gmra.mrb[0].mxu1 %vm169_vm14, %v602_v2  ;;  %v1099_v38 = vsel %vm1093_vm4, %v2053_v21, %v2054_v40  ;;  %vm2952_vm10 = vcmp.eq.s32.totalorder %v1233_v14, 1  ;;  %v1237_v50 = vrot.slane %v2893_v51, %v2337_v36 }
  0xae   :  { %1773 = vmatpush1.bf16.msk.msra.mxu1 %vm1771_vm12, %v1772_v30  ;;  %854 = vmatprep.mubr.bf16.mxu1 %v2126_v3  ;;  %v2839_v45 = vpop.permute.xlu0 %2061  ;;  %v1794_v61 = vpack.c.bf16 %v1099_v38, %v1095_v49  ;;  %v1064_v30 = vrot.slane %v2801_v13, %v2337_v36  ;;  %v1098_v4 = vsel %vm1093_vm4, %v2059_v63, %v2053_v21 }
  0xaf   :  { %1786 = vmatprep.subr.msk.bf16.mxu1 %vm1784_vm1, %v1785_v8  ;;  %v2064_v52 = vunpack.i.h.bf16 %v2839_v45  ;;  %v2063_v46 = vunpack.i.l.bf16 %v2839_v45  ;;  %v2067_v48 = vpop.permute.xlu1 %2066  ;;  %v1094_v7 = vsel %vm1093_vm4, %v2058_v10, %v2048_v39  ;;  %vm1809_vm1 = vmpackc.low %vm2952_vm10, %vm2952_vm10 }
  0xb0   :  { %v2069_v0 = vunpack.i.h.bf16 %v2067_v48  ;;  %v2068_v6 = vunpack.i.l.bf16 %v2067_v48  ;;  %v1797_v29 = vpack.c.bf16 %v1098_v4, %v1094_v7  ;;  %vm2971_vm12 = vcmp.eq.s32.totalorder %v1064_v30, 1 }
  0xb1   :  { %v1097_v2 = vsel %vm1093_vm4, %v2063_v46, %v2064_v52  ;;  %v1096_v42 = vsel %vm1093_vm4, %v2049_v37, %v2063_v46  ;;  %vm1803_vm15 = vmpackc.low %vm2971_vm12, %vm2971_vm12 }
  0xb2   :  { %v1101_v54 = vsel %vm1093_vm4, %v2068_v6, %v2069_v0  ;;  %v2872_v5 = vpop.permute.xlu0 %2071  ;;  %v1100_v43 = vsel %vm1093_vm4, %v2054_v40, %v2068_v6  ;;  %v2990_v40 = vsel %vm3269_vm9, 1, %v2126_v3 }
  0xb3   :  { %v2881_v44 = vpop.permute.xlu1 %2076  ;;  %v1801_v9 = vpack.c.bf16 %v1101_v54, %v1097_v2  ;;  %v2074_v23 = vunpack.i.h.bf16 %v2872_v5  ;;  %v2073_v22 = vunpack.i.l.bf16 %v2872_v5  ;;  %v1804_v46 = vpack.c.bf16 %v1100_v43, %v1096_v42  ;;  %v1791_v2 = vld [vmem:[%s3162_s0 + $0x60] sm:$0xff]  ;;  %v1792_v54 = vld [vmem:[%s3162_s0 + $0x68] sm:$0xff] }
  0xb4   :  { %1767 = vmatmul.mubr.msk.bf16.vlgmr.msra.gmra.mrb[0].mxu0 %vm169_vm14, %v775_v25  ;;  %v2079_v18 = vunpack.i.h.bf16 %v2881_v44  ;;  %v2078_v11 = vunpack.i.l.bf16 %v2881_v44 }
  0xb5   :  { %1782 = vmatpush1.bf16.msk.msra.mxu0 %vm1780_vm0, %v1781_v55  ;;  %984 = vmatprep.mubr.bf16.mxu0 %v2126_v3  ;;  %v1268_v20 = vsel %vm1266_vm6, %v2073_v22, %v2074_v23  ;;  %vm1439_vm0 = vcmask 769024  }
  0xb6   :  { %1795 = vmatprep.subr.msk.bf16.mxu0 %vm1793_vm5, %v1794_v61  ;;  %v2903_v24 = vpop.permute.xlu0 %2081  ;;  %v1272_v13 = vsel %vm1266_vm6, %v2078_v11, %v2079_v18  ;;  %v1406_v61 = vrot.slane %v2990_v40, %v2328_v32  ;;  %vm3014_vm5 = vcmp.eq.s32.totalorder %v1229_v53, 1 }
  0xb7   :  { %v2907_v12 = vpop.permute.xlu1 %2086  ;;  %v1810_v45 = vpack.c.bf16 %v1272_v13, %v1268_v20  ;;  %v2084_v48 = vunpack.i.h.bf16 %v2903_v24  ;;  %v2083_v0 = vunpack.i.l.bf16 %v2903_v24  ;;  %v1402_v20 = vrot.slane %v2990_v40, %v2331_v34  ;;  %v1807_v13 = vld [vmem:[%s3162_s0 + $0x70] sm:$0xff] }
  0xb8   :  { %v2089_v33 = vunpack.i.h.bf16 %v2907_v12  ;;  %v2088_v39 = vunpack.i.l.bf16 %v2907_v12  ;;  %vm3031_vm2 = vcmp.eq.s32.totalorder %v1406_v61, 1 }
  0xb9   :  { %1774 = vmatmul.mubr.msk.bf16.vlgmr.msra.gmra.mrb[0].mxu1 %vm169_vm14, %v775_v25  ;;  %v1241_v25 = vrot.slane %v2893_v51, %v2335_v35  ;;  %v1267_v32 = vsel %vm1266_vm6, %v2083_v0, %v2073_v22  ;;  %v1271_v41 = vsel %vm1266_vm6, %v2084_v48, %v2078_v11  ;;  %v1125_v51 = vpack.c.bf16 %v1792_v54, %v1791_v2  ;;  %vm1825_vm11 = vmpackc.low %vm3031_vm2, %vm3031_vm2 }
  0xba   :  { %1789 = vmatpush1.bf16.msk.msra.mxu1 %vm1787_vm3, %v1788_v62  ;;  %1027 = vmatprep.mubr.bf16.mxu1 %v2126_v3  ;;  %v2944_v8 = vpop.permute.xlu0 %2091  ;;  %v1270_v38 = vsel %vm1266_vm6, %v2088_v39, %v2089_v33  ;;  %v1414_v22 = vrot.slane %v2990_v40, %v2335_v35  ;;  %v1813_v11 = vpack.c.bf16 %v1271_v41, %v1267_v32  ;;  %vm1812_vm3 = vmpackc.low %vm3014_vm5, %vm3014_vm5  ;;  %vm1415_vm12 = vcmp.eq.s32.totalorder %v1402_v20, 1  ;;  %v1607_v35 = vld [vmem:[%s3163_s2] sm:$0xff] }
  0xbb   :  { %1802 = vmatprep.subr.msk.bf16.mxu1 %vm1800_vm8, %v1801_v9  ;;  %v2094_v28 = vunpack.i.h.bf16 %v2944_v8  ;;  %v2093_v31 = vunpack.i.l.bf16 %v2944_v8  ;;  %v2950_v21 = vpop.permute.xlu1 %2096  ;;  %vm2983_vm4 = vcmp.eq.s32.totalorder %v1241_v25, 1  ;;  %v1269_v1 = vsel %vm1266_vm6, %v2074_v23, %v2088_v39  ;;  %v1808_v8 = vld [vmem:[%s3162_s0 + $0x78] sm:$0xff] }
  0xbc   :  { %v2099_v6 = vunpack.i.h.bf16 %v2950_v21  ;;  %v2098_v16 = vunpack.i.l.bf16 %v2950_v21  ;;  %vm1816_vm7 = vmpackc.low %vm2983_vm4, %vm2983_vm4  ;;  %vm3048_vm8 = vcmp.eq.s32.totalorder %v1237_v50, 1  ;;  %v1298_v33 = vpack.c.bf16 %v1808_v8, %v1807_v13  ;;  %v1824_v21 = vld [vmem:[%s3162_s0 + $0x88] sm:$0xff] }
  0xbd   :  { %v1274_v49 = vsel %vm1266_vm6, %v2093_v31, %v2094_v28  ;;  %v1273_v15 = vsel %vm1266_vm6, %v2079_v18, %v2093_v31  ;;  %vm3056_vm6 = vcmp.eq.s32.totalorder %v1414_v22, 1  ;;  %vm1819_vm10 = vmpackc.low %vm3048_vm8, %vm3048_vm8  ;;  %v1410_v31 = vrot.slane %v2990_v40, %v2337_v36  ;;  %v1823_v36 = vld [vmem:[%s3162_s0 + $0x80] sm:$0xff] }
  0xbe   :  { %v2967_v47 = vpop.permute.xlu0 %2101  ;;  %v1817_v60 = vpack.c.bf16 %v1274_v49, %v1270_v38  ;;  %v1441_v62 = vsel %vm1439_vm0, %v2098_v16, %v2099_v6  ;;  %v1820_v44 = vpack.c.bf16 %v1273_v15, %v1269_v1 }
  0xbf   :  { %v2978_v57 = vpop.permute.xlu1 %2106  ;;  %v2104_v26 = vunpack.i.h.bf16 %v2967_v47  ;;  %v2103_v55 = vunpack.i.l.bf16 %v2967_v47  ;;  %vm1417_vm4 = vcmp.eq.s32.totalorder %v1410_v31, 1 }
  0xc0   :  { %1783 = vmatmul.mubr.msk.bf16.vlgmr.msra.gmra.mrb[0].mxu0 %vm169_vm14, %v948_v19  ;;  %v2109_v23 = vunpack.i.h.bf16 %v2978_v57  ;;  %v2108_v18 = vunpack.i.l.bf16 %v2978_v57  ;;  %vm1835_vm9 = vmpackc.low %vm1417_vm4, %vm1417_vm4 }
  0xc1   :  { %1798 = vmatpush1.bf16.msk.msra.mxu0 %vm1796_vm13, %v1797_v29  ;;  %1161 = vmatprep.mubr.bf16.mxu0 %v2126_v3  ;;  %v1445_v63 = vsel %vm1439_vm0, %v2103_v55, %v2104_v26  ;;  %vm1832_vm13 = vmpackc.low %vm3056_vm6, %vm3056_vm6  ;;  %v1471_v29 = vpack.c.bf16 %v1824_v21, %v1823_v36 }
  0xc2   :  { %1811 = vmatprep.subr.msk.bf16.mxu0 %vm1809_vm1, %v1810_v45  ;;  %v2112_v56 = vpop.permute.xlu0 %2111  ;;  %v1826_v58 = vpack.c.bf16 %v1445_v63, %v1441_v62  ;;  %v1444_v28 = vsel %vm1439_vm0, %v2109_v23, %v2103_v55  ;;  %v1440_v34 = vsel %vm1439_vm0, %v2108_v18, %v2098_v16  ;;  %vm1828_vm1 = vmpackc.low %vm1415_vm12, %vm1415_vm12  ;;  %v1615_v23 = vld [vmem:[%s3164_s3] sm:$0xff]  ;;  %v1608_v18 = vld [vmem:[%s3163_s2 + $0x8] sm:$0xff] }
  0xc3   :  { %v2117_v59 = vpop.permute.xlu1 %2116  ;;  %v2114_v10 = vunpack.i.h.bf16 %v2112_v56  ;;  %v2113_v9 = vunpack.i.l.bf16 %v2112_v56  ;;  %v1829_v39 = vpack.c.bf16 %v1444_v28, %v1440_v34  ;;  %v1616_v28 = vld [vmem:[%s3164_s3 + $0x8] sm:$0xff] }
  0xc4   :  { %v2119_v24 = vunpack.i.h.bf16 %v2117_v59  ;;  %v2118_v12 = vunpack.i.l.bf16 %v2117_v59 }
  0xc5   :  { %1790 = vmatmul.mubr.msk.bf16.vlgmr.msra.gmra.mrb[0].mxu1 %vm169_vm14, %v948_v19  ;;  %v1443_v30 = vsel %vm1439_vm0, %v2113_v9, %v2114_v10  ;;  %v1442_v19 = vsel %vm1439_vm0, %v2099_v6, %v2113_v9 }
  0xc6   :  { %1805 = vmatpush1.bf16.msk.msra.mxu1 %vm1803_vm15, %v1804_v46  ;;  %1204 = vmatprep.mubr.bf16.mxu1 %v2126_v3  ;;  %v1447_v4 = vsel %vm1439_vm0, %v2118_v12, %v2119_v24  ;;  %v1446_v27 = vsel %vm1439_vm0, %v2104_v26, %v2118_v12 }
  0xc7   :  { %1818 = vmatprep.subr.msk.bf16.mxu1 %vm1816_vm7, %v1817_v60  ;;  %v1833_v7 = vpack.c.bf16 %v1447_v4, %v1443_v30  ;;  %v1836_v25 = vpack.c.bf16 %v1446_v27, %v1442_v19 }
  0xcc   :  { %1799 = vmatmul.mubr.msk.bf16.vlgmr.msra.gmra.mrb[0].mxu0 %vm169_vm14, %v1125_v51 }
  0xcd   :  { %1814 = vmatpush1.bf16.msk.msra.mxu0 %vm1812_vm3, %v1813_v11  ;;  %1334 = vmatprep.mubr.bf16.mxu0 %v2126_v3 }
  0xce   :  { %1827 = vmatprep.subr.msk.bf16.mxu0 %vm1825_vm11, %v1826_v58 }
  0xd1   :  { %1806 = vmatmul.mubr.msk.bf16.vlgmr.msra.gmra.mrb[0].mxu1 %vm169_vm14, %v1125_v51 }
  0xd2   :  { %1821 = vmatpush1.bf16.msk.msra.mxu1 %vm1819_vm10, %v1820_v44  ;;  %1377 = vmatprep.mubr.bf16.mxu1 %v2126_v3 }
  0xd3   :  { %1834 = vmatprep.subr.msk.bf16.mxu1 %vm1832_vm13, %v1833_v7 }
  0xd8   :  { %1815 = vmatmul.mubr.msk.bf16.vlgmr.msra.gmra.mrb[0].mxu0 %vm169_vm14, %v1298_v33 }
  0xd9   :  { %1830 = vmatpush1.bf16.msk.msra.mxu0 %vm1828_vm1, %v1829_v39  ;;  %1507 = vmatprep.mubr.bf16.mxu0 %v2126_v3 }
  0xdd   :  { %1822 = vmatmul.mubr.msk.bf16.vlgmr.msra.gmra.mrb[0].mxu1 %vm169_vm14, %v1298_v33 }
  0xde   :  { %1837 = vmatpush1.bf16.msk.msra.mxu1 %vm1835_vm9, %v1836_v25  ;;  %1550 = vmatprep.mubr.bf16.mxu1 %v2126_v3 }
  0xe4   :  { %1831 = vmatmul.mubr.msk.bf16.vlgmr.msra.gmra.mrb[0].mxu0 %vm169_vm14, %v1471_v29 }
  0xe9   :  { %1838 = vmatmul.mubr.msk.bf16.vlgmr.msra.gmra.mrb[0].mxu1 %vm169_vm14, %v1471_v29 }
 0x1b7   :  { %v3099_v42 = vpop.f32.mrb[0].mxu0 }
 0x1b8   :  { %v1581_v43 = vmul.f32 %v3099_v42, %v3099_v42  ;;  %v3103_v45 = vpop.f32.mrb[1].mxu0 }
 0x1b9   :  { %v1569_v47 = vadd.f32 %v3103_v45, %v3099_v42  ;;  %v1582_v49 = vmul.f32 %v3103_v45, %v3103_v45  ;;  %v3109_v38 = vpop.f32.mrb[2].mxu0 }
 0x1ba   :  { %v1585_v3 = vmul.f32 %v3109_v38, %v3109_v38  ;;  %v3113_v52 = vpop.f32.mrb[3].mxu0 }
 0x1bb   :  { %v1574_v57 = vadd.f32 %v3113_v52, %v3109_v38  ;;  %v1586_v53 = vmul.f32 %v3113_v52, %v3113_v52  ;;  %v1589_v40 = vadd.f32 %v1582_v49, %v1581_v43 }
 0x1bc   :  { %v1552_v37 = vpop.f32.mrb[0].mxu1 }
 0x1bd   :  { %v1583_v46 = vmul.f32 %v1552_v37, %v1552_v37  ;;  %v1554_v48 = vpop.f32.mrb[1].mxu1  ;;  %v1570_v0 = vadd.f32 %v1569_v47, %v1552_v37  ;;  %v1594_v6 = vadd.f32 %v1586_v53, %v1585_v3 }
 0x1be   :  { %v3119_v60 = vpop.f32.mrb[2].mxu1  ;;  %v1584_v16 = vmul.f32 %v1554_v48, %v1554_v48 }
 0x1bf   :  { %v1587_v26 = vmul.f32 %v3119_v60, %v3119_v60  ;;  %v3123_v55 = vpop.f32.mrb[3].mxu1  ;;  %v1571_v56 = vadd.f32 %v1570_v0, %v1554_v48  ;;  %v1575_v59 = vadd.f32 %v1574_v57, %v3119_v60  ;;  %v1590_v61 = vadd.f32 %v1589_v40, %v1583_v46 }
 0x1c0   :  { %v1588_v2 = vmul.f32 %v3123_v55, %v3123_v55 }
 0x1c1   :  { %1572 = vadd.xlane.f32.xlu0 %v1571_v56  ;;  %v1576_v54 = vadd.f32 %v1575_v59, %v3123_v55  ;;  %v1591_v17 = vadd.f32 %v1590_v61, %v1584_v16  ;;  %v1595_v50 = vadd.f32 %v1594_v6, %v1587_v26 }
 0x1c3   :  { %1577 = vadd.xlane.f32.xlu1 %v1576_v54  ;;  %v1596_v32 = vadd.f32 %v1595_v50, %v1588_v2 }
 0x1c5   :  { %1592 = vadd.xlane.f32.xlu0 %v1591_v17 }
 0x1c9   :  { %1597 = vadd.xlane.f32.xlu0 %v1596_v32 }
 0x24e   :  { %v1573_v41 = vpop.xlane.xlu0 %1572 }
 0x24f   :  { %v1579_v62 = vmul.f32 0.001953125, %v1573_v41 }
 0x250   :  { %v1578_v63 = vpop.xlane.xlu1 %1577 }
 0x251   :  { %v1601_v9 = vmul.f32 %v1579_v62, %v1579_v62  ;;  %v1580_v24 = vmul.f32 0.001953125, %v1578_v63 }
 0x252   :  { %v1593_v10 = vpop.xlane.xlu0 %1592 }
 0x253   :  { %v1599_v12 = vmul.f32 0.001953125, %v1593_v10  ;;  %v1602_v22 = vmul.f32 %v1580_v24, %v1580_v24 }
 0x255   :  { %v1603_v51 = vsub.f32 %v1599_v12, %v1601_v9 }
 0x256   :  { %v1598_v14 = vpop.xlane.xlu0 %1597 }
 0x257   :  { %v1605_v11 = vmax.f32 %v1603_v51, 0.0  ;;  %v1600_v15 = vmul.f32 0.001953125, %v1598_v14 }
 0x259   :  { %v1609_v1 = vadd.f32 1e-05, %v1605_v11  ;;  %v1604_v58 = vsub.f32 %v1600_v15, %v1602_v22 }
 0x25b   :  { %2122 = vrsqrt.f32 %v1609_v1  ;;  %v1606_v30 = vmax.f32 %v1604_v58, 0.0 }
 0x25d   :  { %v1610_v4 = vadd.f32 1e-05, %v1606_v30 }
 0x25f   :  { %2124 = vrsqrt.f32 %v1610_v4 }
 0x265   :  { %v2123_v5 = vpop.eup %2122 }
 0x266   :  { %v1613_v44 = vmul.f32 %v2123_v5, %v1607_v35 }
 0x268   :  { %1623 = vperm.xlu1 %2120, %v1613_v44   ;;  %v1617_v7 = vmul.f32 %v1613_v44, %v1579_v62 }
 0x269   :  { %v2125_v20 = vpop.eup %2124 }
 0x26a   :  { %v1619_v13 = vsub.f32 %v1615_v23, %v1617_v7  ;;  %v1614_v8 = vmul.f32 %v2125_v20, %v1608_v18 }
 0x26c   :  { %1641 = vperm.xlu1 %2120, %v1619_v13   ;;  %1628 = vperm.xlu0 %2121, %v1614_v8   ;;  %v1618_v34 = vmul.f32 %v1614_v8, %v1580_v24 }
 0x26e   :  { %v1620_v31 = vsub.f32 %v1616_v28, %v1618_v34 }
 0x270   :  { %1646 = vperm.xlu1 %2120, %v1620_v31  }
 0x2e7   :  { %v1624_v33 = vpop.permute.xlu1 %1623 }
 0x2e8   :  { %v1631_v39 = vmul.f32 %v1624_v33, %v3099_v42  ;;  %v1632_v19 = vmul.f32 %v1624_v33, %v3103_v45  ;;  %v1633_v27 = vmul.f32 %v1624_v33, %v1552_v37  ;;  %v1634_v25 = vmul.f32 %v1624_v33, %v1554_v48 }
 0x2eb   :  { %v1629_v36 = vpop.permute.xlu0 %1628  ;;  %v1642_v21 = vpop.permute.xlu1 %1641 }
 0x2ec   :  { %v1649_v29 = vadd.f32 %v1642_v21, %v1631_v39  ;;  %v1650_v43 = vadd.f32 %v1642_v21, %v1632_v19  ;;  %v1651_v47 = vadd.f32 %v1642_v21, %v1633_v27  ;;  %v1652_v49 = vadd.f32 %v1642_v21, %v1634_v25 }
 0x2ed   :  { %v1635_v3 = vmul.f32 %v1629_v36, %v3109_v38  ;;  %v1636_v57 = vmul.f32 %v1629_v36, %v3113_v52  ;;  %v1637_v53 = vmul.f32 %v1629_v36, %v3119_v60  ;;  %v1638_v40 = vmul.f32 %v1629_v36, %v3123_v55 }
 0x2ee   :  { %v1657_v46 = vmax.f32 %v1649_v29, 0.0  ;;  %v1658_v42 = vmax.f32 %v1650_v43, 0.0  ;;  %v1659_v0 = vmax.f32 %v1651_v47, 0.0  ;;  %v1660_v45 = vmax.f32 %v1652_v49, 0.0 }
 0x2ef   :  { %v1647_v37 = vpop.permute.xlu1 %1646 }
 0x2f0   :  { %v1653_v48 = vadd.f32 %v1647_v37, %v1635_v3  ;;  %v1654_v6 = vadd.f32 %v1647_v37, %v1636_v57  ;;  %v1655_v16 = vadd.f32 %v1647_v37, %v1637_v53  ;;  %v1656_v26 = vadd.f32 %v1647_v37, %v1638_v40 }
 0x2f1   :  { %v1843_v56 = vpack.c.bf16 %v1658_v42, %v1657_v46  ;;  %v1844_v59 = vpack.c.bf16 %v1660_v45, %v1659_v0 }
 0x2f2   :  { %v1661_v61 = vmax.f32 %v1653_v48, 0.0  ;;  %v1662_v2 = vmax.f32 %v1654_v6, 0.0  ;;  %v1663_v38 = vmax.f32 %v1655_v16, 0.0  ;;  %v1664_v54 = vmax.f32 %v1656_v26, 0.0 }
 0x2f3   :  { %1689 = vst [vmem:[%s3165_s6] sm:$0xff] %v1843_v56  ;;  %1690 = vst [vmem:[%s3165_s6 + $0x8] sm:$0xff] %v1844_v59 }
 0x2f4   :  { %v1845_v52 = vpack.c.bf16 %v1662_v2, %v1661_v61  ;;  %v1846_v60 = vpack.c.bf16 %v1664_v54, %v1663_v38 }
 0x2f6   :  { %1691 = vst [vmem:[%s3165_s6 + $0x10] sm:$0xff] %v1845_v52  ;;  %1692 = vst [vmem:[%s3165_s6 + $0x18] sm:$0xff] %v1846_v60 }

// kernel: basic_block_forward.3
= control target key start
LH: loop header
LB: loop body
LE: loop exit
PB: predicated region body
PF: predicated region fallthrough
CT: control target
= control target key end

     0   :  { %s2422_s24 = smov 0   ;;  %s2424_s25 = smov 0   ;;  %s3006_s0 = inlined_call_operand.vmem [shape: f32[9,16,16], index: 0, kind: input, shape index: {}]   ;;  %s3007_s1 = inlined_call_operand.vmem [shape: bf16[16,546], index: 1, kind: input, shape index: {}]   ;;  %s3008_s2 = inlined_call_operand.vmem [shape: f32[16,1], index: 2, kind: input, shape index: {}]   ;;  %s3009_s3 = inlined_call_operand.vmem [shape: f32[16,1], index: 3, kind: input, shape index: {}]   ;;  %s3010_s4 = inlined_call_operand.vmem [shape: s32[1,512], index: 4, kind: input, shape index: {}]   ;;  %s3011_s5 = inlined_call_operand.vmem [shape: s32[1,512], index: 5, kind: input, shape index: {}]   ;;  %s3012_s6 = inlined_call_operand.vmem [shape: f32[16,512], index: 6, kind: input, shape index: {}]   ;;  %s3013_s7 = inlined_call_operand.vmem [shape: f32[16,512], index: 7, kind: output, shape index: {}]  }
   0x1   :  { %s2426_s26 = smov 0  }
   0x2 LB: > { %s2144_s27 = sadd.s32 4294967295, %s2363_s26   ;;  %s2439_s28 = sadd.s32 1, %s2363_s26   ;;  %s2363_s26 = sphi %s2426_s26, %s3079_s26   ;;  %s2359_s25 = sphi %s2424_s25, %s3078_s25   ;;  %s2355_s24 = sphi %s2422_s24, %s3077_s24  }
   0x3   : > { %s21_s29 = ssub.s32 %s2363_s26, %s2439_s28  ;;  %s24_s30 = sadd.s32 1, %s2359_s25 }
   0x4   : > { %p22_p0 = scmp.eq.s32.totalorder %s21_s29, 0  ;;  %p31_p1 = scmp.ne.s32.totalorder %s2359_s25, %s2355_s24 }
   0x5   : > { %p32_p2 = scmp.eq.s32.totalorder %s2363_s26, 0  ;;  %p2147_p4 = scmp.ge.s32.totalorder %s2363_s26, 2 }
   0x6   : > { %s2448_s8 = scalar_select %p22_p0, %s2359_s25, %s24_s30  }
   0x7   : > { %p33_p3 = por %p32_p2, %p31_p1  ;;  %233 = sbr.rel (%p2147_p4) target bundleno = 23 (0x17), region = 28 }
   0xe   : > { %236 = sbr.rel (!%p33_p3) target bundleno = 23 (0x17), region = 32  ;;  %s238_s9 = sand.u32 (%p33_p3), 1, %s2359_s25  }
   0xf   : > { %s2148_s10 = sshll.u32 (%p33_p3), %s2363_s26, 3  ;;  %s2294_s11 = smul.u32 (%p33_p3), 72, %s238_s9 }
  0x10   : > { %s242_s14 = scalar_lea.vmem (%p33_p3), %s3006_s0, %s2148_s10 }
  0x11   : > { %v286_v0 = vld [vmem:[%s242_s14] sm:$0xff] (%p33_p3)  ;;  %v288_v1 = vld [vmem:[%s242_s14 + $0x10] sm:$0xff] (%p33_p3)  ;;  %s240_s15 = scalar_lea.vmem (%p33_p3), [#allocation2], %s2294_s11 }
  0x12   : > { %v290_v2 = vld [vmem:[%s242_s14 + $0x20] sm:$0xff] (%p33_p3)  ;;  %v292_v3 = vld [vmem:[%s242_s14 + $0x30] sm:$0xff] (%p33_p3)  ;;  %287 = vst [vmem:[%s240_s15] sm:$0xff] (%p33_p3), %v286_v0  ;;  %289 = vst [vmem:[%s240_s15 + $0x8] sm:$0xff] (%p33_p3), %v288_v1 }
  0x13   : > { %v294_v4 = vld [vmem:[%s242_s14 + $0x40] sm:$0xff] (%p33_p3)  ;;  %v296_v5 = vld [vmem:[%s242_s14 + $0x50] sm:$0xff] (%p33_p3)  ;;  %291 = vst [vmem:[%s240_s15 + $0x10] sm:$0xff] (%p33_p3), %v290_v2  ;;  %293 = vst [vmem:[%s240_s15 + $0x18] sm:$0xff] (%p33_p3), %v292_v3 }
  0x14   : > { %295 = vst [vmem:[%s240_s15 + $0x20] sm:$0xff] (%p33_p3), %v294_v4  ;;  %297 = vst [vmem:[%s240_s15 + $0x28] sm:$0xff] (%p33_p3), %v296_v5  ;;  %v298_v6 = vld [vmem:[%s242_s14 + $0x60] sm:$0xff] (%p33_p3)  ;;  %v300_v7 = vld [vmem:[%s242_s14 + $0x70] sm:$0xff] (%p33_p3) }
  0x15   : > { %v302_v8 = vld [vmem:[%s242_s14 + $0x80] sm:$0xff]  ;;  %299 = vst [vmem:[%s240_s15 + $0x30] sm:$0xff] %v298_v6  ;;  %301 = vst [vmem:[%s240_s15 + $0x38] sm:$0xff] %v300_v7 }
  0x16   : > { %303 = vst [vmem:[%s240_s15 + $0x40] sm:$0xff] %v302_v8 }
  0x17 PF: > { %p2149_p5 = scmp.ge.s32.totalorder %s2363_s26, 1  ;;  %p330_p6 = scmp.lt.s32.totalorder %s2363_s26, 3 }
  0x19   : > { %p331_p7 = pnand %p2149_p5, %p330_p6 }
  0x1a   : > { %v2461_v9 = vld [vmem:[%s3010_s4] sm:$0xf] (!%p331_p7)  ;;  %v418_v11 = vlaneseq (!%p331_p7)  ;;  %v2365_v14 = vmov (!%p331_p7), 0   ;;  %s2366_s20 = smov (!%p331_p7), 1   ;;  %s2367_s21 = smov (!%p331_p7), 2   ;;  %v2628_v6 = vld [vmem:[%s3007_s1 + $0x14] sm:$0xff] (!%p331_p7) }
  0x1b   : > { %334 = sbr.rel (%p331_p7) target bundleno = 969 (0x3c9), region = 82  ;;  %v2466_v10 = vld [vmem:[%s3011_s5] sm:$0xf] (!%p331_p7)  ;;  %v408_v12 = vadd.s32 (!%p331_p7), 4294967295, %v2461_v9  ;;  %576 = vmatprep.mubr.bf16.mxu0 (!%p331_p7), %v2365_v14  ;;  %617 = vmatprep.mubr.bf16.mxu1 (!%p331_p7), %v2365_v14  ;;  %vm912_vm1 = vcmp.ge.s32.totalorder (!%p331_p7), %v2461_v9, 0  ;;  %vm913_vm2 = vcmp.lt.s32.totalorder (!%p331_p7), %v2461_v9, 16 }
  0x1c   : > { %vm448_vm0 = vcmp.ge.s32.totalorder (!%p331_p7), %v2466_v10, 0  ;;  %v2471_v13 = vadd.s32 (!%p331_p7), 1, %v2466_v10  ;;  %v419_v15 = vshrl.u32 (!%p331_p7), %v418_v11, 7  ;;  %v2476_v16 = vadd.s32 (!%p331_p7), 4294967295, %v2466_v10  ;;  %2337 = vset.pattern.permute.xlu0 (!%p331_p7), %v2365_v14  ;;  %2338 = vset.pattern.permute.xlu1 (!%p331_p7), %v2365_v14  ;;  %vm2484_vm7 = vmand (!%p331_p7), %vm912_vm1, %vm913_vm2  ;;  %s2368_s22 = smov (!%p331_p7), 16   ;;  %s2369_s23 = smov (!%p331_p7), 17  }
  0x1d   : > { %vm409_vm3 = vcmp.ge.s32.totalorder (!%p331_p7), %v408_v12, 0  ;;  %vm410_vm4 = vcmp.lt.s32.totalorder (!%p331_p7), %v408_v12, 16  ;;  %vm450_vm5 = vcmp.lt.s32.totalorder (!%p331_p7), %v2466_v10, 16  ;;  %v1449_v51 = vadd.s32 (!%p331_p7), 1, %v2461_v9  ;;  %s2370_s29 = smov (!%p331_p7), 18   ;;  %v2623_v5 = vld [vmem:[%s3007_s1] sm:$0xff] (!%p331_p7) }
  0x1e   : > { %vm3014_vm6 = vcmp.ge.s32.totalorder (!%p331_p7), %v2471_v13, 0  ;;  %vm2488_vm8 = vmand (!%p331_p7), %vm409_vm3, %vm410_vm4  ;;  %v2492_v19 = vsub.s32 (!%p331_p7), 0, %v419_v15  ;;  %v2494_v20 = vsub.s32 (!%p331_p7), 1, %v419_v15  ;;  %v2496_v21 = vsub.s32 (!%p331_p7), 2, %v419_v15  ;;  %s2376_s30 = smov (!%p331_p7), 112   ;;  %s2377_s9 = smov (!%p331_p7), 111  }
  0x1f   : > { %v2498_v22 = vsub.s32 (!%p331_p7), 3, %v419_v15  ;;  %vm449_vm9 = vmand (!%p331_p7), %vm2488_vm8, %vm448_vm0  ;;  %vm734_vm10 = vcmp.lt.s32.totalorder (!%p331_p7), %v2471_v13, 16  ;;  %vm3016_vm12 = vcmp.ge.s32.totalorder (!%p331_p7), %v2476_v16, 0  ;;  %vm3015_vm14 = vcmp.lt.s32.totalorder (!%p331_p7), %v2476_v16, 16  ;;  %s2378_s10 = smov (!%p331_p7), 110   ;;  %s337_s11 = sand.u32 (!%p331_p7), 1, %s2355_s24  }
  0x20   : > { %vm451_vm11 = vmand (!%p331_p7), %vm449_vm9, %vm450_vm5  ;;  %s2295_s12 = smul.u32 (!%p331_p7), 72, %s337_s11  ;;  %s2379_s24 = smov (!%p331_p7), 96  }
  0x21   : > { %v452_v23 = vsel (!%p331_p7), %vm451_vm11, 1, %v2365_v14  ;;  %vm733_vm13 = vmand (!%p331_p7), %vm2488_vm8, %vm3014_vm6  ;;  %s2380_s14 = smov (!%p331_p7), 95   ;;  %s2381_s15 = smov (!%p331_p7), 94  }
  0x22   : > { %v456_v24 = vrot.slane %v452_v23, %v2492_v19  ;;  %v460_v25 = vrot.slane %v452_v23, %v2494_v20  ;;  %v464_v26 = vrot.slane %v452_v23, %v2496_v21  ;;  %v468_v27 = vrot.slane %v452_v23, %v2498_v22  ;;  %vm735_vm15 = vmand %vm733_vm13, %vm734_vm10  ;;  %s2840_s13 = scalar_lea.vmem [#allocation2], %s2295_s12  ;;  %p381_p8 = scmp.lt.s32.totalorder %s2144_s27, 1 }
  0x23   : > { %v736_v28 = vsel %vm735_vm15, 1, %v2365_v14  ;;  %vm915_vm1 = vmand %vm2484_vm7, %vm3016_vm12 }
  0x24   : > { %vm469_vm2 = vcmp.eq.s32.totalorder %v456_v24, 1  ;;  %vm470_vm3 = vcmp.eq.s32.totalorder %v460_v25, 1  ;;  %vm471_vm4 = vcmp.eq.s32.totalorder %v464_v26, 1  ;;  %vm472_vm9 = vcmp.eq.s32.totalorder %v468_v27, 1  ;;  %vm916_vm11 = vmand %vm915_vm1, %vm3015_vm14  ;;  %v2643_v26 = vld [vmem:[%s3007_s1 + $0x8] sm:$0xff]  ;;  %v2648_v27 = vld [vmem:[%s3007_s1 + $0x1c] sm:$0xff] }
  0x25   : > { %vm473_vm6 = vmpackc.low %vm470_vm3, %vm469_vm2  ;;  %v740_v29 = vrot.slane %v736_v28, %v2492_v19  ;;  %v744_v30 = vrot.slane %v736_v28, %v2494_v20  ;;  %v748_v31 = vrot.slane %v736_v28, %v2496_v21  ;;  %v752_v32 = vrot.slane %v736_v28, %v2498_v22  ;;  %v2653_v28 = vld [vmem:[%s3007_s1 + $0x10] sm:$0xf]  ;;  %s3081_s27 = smov (!%p381_p8, %s2144_s27), 1 }
  0x26   : > { %v475_v33 = vsel %vm473_vm6, 65537, %v2365_v14  ;;  %vm474_vm13 = vmpackc.low %vm472_vm9, %vm471_vm4  ;;  %v917_v34 = vsel %vm916_vm11, 1, %v2365_v14  ;;  %s2150_s16 = sshll.u32 %s3081_s27, 3  ;;  %s2228_s26 = sshll.u32 %s3081_s27, 5 }
  0x27   : > { %477 = vrot.lane.b32.xlu0 %v475_v33, %s2366_s20  ;;  %v476_v35 = vsel %vm474_vm13, 65537, %v2365_v14  ;;  %vm753_vm15 = vcmp.eq.s32.totalorder %v740_v29, 1  ;;  %vm754_vm1 = vcmp.eq.s32.totalorder %v744_v30, 1  ;;  %vm2534_vm2 = vcmp.eq.s32.totalorder %v748_v31, 1  ;;  %vm1093_vm3 = vmand %vm2484_vm7, %vm448_vm0  ;;  %v2659_v30 = vld [vmem:[%s3007_s1 + $0x24] sm:$0xf]  ;;  %s384_s19 = scalar_lea.vmem %s3008_s2, %s2150_s16 }
  0x28   : > { %vm757_vm14 = vmpackc.low %vm754_vm1, %vm753_vm15  ;;  %vm756_vm6 = vcmp.eq.s32.totalorder %v752_v32, 1  ;;  %v921_v37 = vrot.slane %v917_v34, %v2492_v19  ;;  %v925_v38 = vrot.slane %v917_v34, %v2494_v20  ;;  %v929_v39 = vrot.slane %v917_v34, %v2496_v21 }
  0x29   : > { %v759_v40 = vsel %vm757_vm14, 65537, %v2365_v14  ;;  %vm758_vm4 = vmpackc.low %vm756_vm6, %vm2534_vm2  ;;  %v933_v41 = vrot.slane %v917_v34, %v2498_v22 }
  0x2a   : > { %761 = vrot.lane.b32.xlu1 %v759_v40, %s2367_s21  ;;  %vm934_vm9 = vcmp.eq.s32.totalorder %v921_v37, 1  ;;  %vm935_vm11 = vcmp.eq.s32.totalorder %v925_v38, 1  ;;  %vm2549_vm13 = vcmp.eq.s32.totalorder %v929_v39, 1  ;;  %vm1094_vm15 = vmand %vm1093_vm3, %vm450_vm5  ;;  %v760_v43 = vsel %vm758_vm4, 65537, %v2365_v14 }
  0x2b   : > { %479 = vrot.lane.b32.xlu0 %v476_v35, %s2366_s20  ;;  %vm938_vm14 = vmpackc.low %vm935_vm11, %vm934_vm9  ;;  %vm2556_vm1 = vcmp.eq.s32.totalorder %v933_v41, 1  ;;  %v1095_v45 = vsel %vm1094_vm15, 1, %v2365_v14  ;;  %vm3027_vm3 = vcmp.ge.s32.totalorder %v2471_v13, 0  ;;  %s2371_s20 = smov 127  }
  0x2c   : > { %v940_v46 = vsel %vm938_vm14, 65537, %v2365_v14  ;;  %vm939_vm2 = vmpackc.low %vm2556_vm1, %vm2549_vm13  ;;  %v1107_v47 = vrot.slane %v1095_v45, %v2496_v21  ;;  %v1111_v48 = vrot.slane %v1095_v45, %v2498_v22  ;;  %v1099_v49 = vrot.slane %v1095_v45, %v2492_v19 }
  0x2d   : > { %v1103_v50 = vrot.slane %v1095_v45, %v2494_v20  ;;  %vm1271_vm6 = vmand %vm2484_vm7, %vm3027_vm3  ;;  %v941_v54 = vsel %vm939_vm2, 65537, %v2365_v14  ;;  %vm1450_vm1 = vcmp.ge.s32.totalorder %v1449_v51, 0 }
  0x2e   : > { %763 = vrot.lane.b32.xlu1 %v760_v43, %s2367_s21  ;;  %vm2575_vm4 = vcmp.eq.s32.totalorder %v1107_v47, 1  ;;  %vm2579_vm9 = vcmp.eq.s32.totalorder %v1111_v48, 1  ;;  %vm1112_vm11 = vcmp.eq.s32.totalorder %v1099_v49, 1  ;;  %vm1272_vm13 = vmand %vm1271_vm6, %vm734_vm10  ;;  %s2372_s21 = smov 32  }
  0x2f   : > { %942 = vrot.lane.b32.xlu0 %v940_v46, %s2368_s22  ;;  %vm1117_vm7 = vmpackc.low %vm2579_vm9, %vm2575_vm4  ;;  %vm1113_vm15 = vcmp.eq.s32.totalorder %v1103_v50, 1  ;;  %v1273_v55 = vsel %vm1272_vm13, 1, %v2365_v14  ;;  %vm1451_vm4 = vcmp.lt.s32.totalorder %v1449_v51, 16 }
  0x30   : > { %vm1116_vm14 = vmpackc.low %vm1113_vm15, %vm1112_vm11  ;;  %v1277_v56 = vrot.slane %v1273_v55, %v2492_v19  ;;  %v1281_v57 = vrot.slane %v1273_v55, %v2494_v20  ;;  %v1285_v58 = vrot.slane %v1273_v55, %v2496_v21  ;;  %v1289_v60 = vrot.slane %v1273_v55, %v2498_v22 }
  0x31   : > { %v1118_v59 = vsel %vm1116_vm14, 65537, %v2365_v14  ;;  %v1119_v61 = vsel %vm1117_vm7, 65537, %v2365_v14  ;;  %vm1452_vm15 = vmand %vm1450_vm1, %vm1451_vm4  ;;  %vm3034_vm7 = vcmp.ge.s32.totalorder %v2471_v13, 0 }
  0x32   : > { %944 = vrot.lane.b32.xlu1 %v941_v54, %s2368_s22  ;;  %vm1290_vm2 = vcmp.eq.s32.totalorder %v1277_v56, 1  ;;  %vm1291_vm3 = vcmp.eq.s32.totalorder %v1281_v57, 1  ;;  %vm1292_vm6 = vcmp.eq.s32.totalorder %v1285_v58, 1  ;;  %vm1293_vm11 = vcmp.eq.s32.totalorder %v1289_v60, 1  ;;  %vm1631_vm14 = vmand %vm1452_vm15, %vm448_vm0  ;;  %s2373_s22 = smov 33  }
  0x33   : > { %1120 = vrot.lane.b32.xlu0 %v1118_v59, %s2369_s23  ;;  %vm1294_vm9 = vmpackc.low %vm1291_vm3, %vm1290_vm2  ;;  %vm3037_vm0 = vcmp.ge.s32.totalorder %v2476_v16, 0 }
  0x34   : > { %v1296_v62 = vsel %vm1294_vm9, 65537, %v2365_v14  ;;  %vm1295_vm13 = vmpackc.low %vm1293_vm11, %vm1292_vm6  ;;  %vm3038_vm6 = vcmp.lt.s32.totalorder %v2476_v16, 16 }
  0x35   : > { %v1297_v63 = vsel %vm1295_vm13, 65537, %v2365_v14  ;;  %vm2603_vm12 = vmand %vm1631_vm14, %vm450_vm5  ;;  %vm483_vm5 = vcmask 7168  }
  0x36   : > { %1122 = vrot.lane.b32.xlu1 %v1119_v61, %s2369_s23  ;;  %vm1809_vm2 = vmand %vm1452_vm15, %vm3034_vm7  ;;  %v1633_v25 = vsel %vm2603_vm12, 1, %v2365_v14  ;;  %s2374_s23 = smov 34  }
  0x37   : > { %1298 = vrot.lane.b32.xlu0 %v1296_v62, %s2370_s29  ;;  %vm2611_vm1 = vmand %vm1809_vm2, %vm734_vm10  ;;  %vm485_vm10 = vcmask 1043456   ;;  %v1645_v38 = vrot.slane %v1633_v25, %v2496_v21  ;;  %v1649_v42 = vrot.slane %v1633_v25, %v2498_v22  ;;  %v1637_v49 = vrot.slane %v1633_v25, %v2492_v19 }
  0x38   : > { %vm1453_vm3 = vmand %vm1452_vm15, %vm3037_vm0  ;;  %v2696_v46 = vsel %vm2611_vm1, 1, %v2365_v14  ;;  %v1641_v50 = vrot.slane %v1633_v25, %v2494_v20  ;;  %vm767_vm2 = vcmask 15360  }
  0x39   : > { %vm1454_vm4 = vmand %vm1453_vm3, %vm3038_vm6  ;;  %v1815_v52 = vrot.slane %v2696_v46, %v2492_v19  ;;  %v1819_v53 = vrot.slane %v2696_v46, %v2494_v20  ;;  %vm2714_vm3 = vcmp.eq.s32.totalorder %v1645_v38, 1  ;;  %vm2718_vm6 = vcmp.eq.s32.totalorder %v1649_v42, 1 }
  0x3a   : > { %1300 = vrot.lane.b32.xlu1 %v1297_v63, %s2370_s29  ;;  %v1455_v4 = vsel %vm1454_vm4, 1, %v2365_v14  ;;  %vm2725_vm4 = vcmp.eq.s32.totalorder %v1637_v49, 1  ;;  %v1827_v25 = vrot.slane %v2696_v46, %v2498_v22  ;;  %s2375_s29 = smov 126  }
  0x3b   : > { %v1467_v10 = vrot.slane %v1455_v4, %v2496_v21  ;;  %v1471_v11 = vrot.slane %v1455_v4, %v2498_v22  ;;  %v1459_v12 = vrot.slane %v1455_v4, %v2492_v19  ;;  %v1463_v23 = vrot.slane %v1455_v4, %v2494_v20 }
  0x3d   : > { %vm2667_vm11 = vcmp.eq.s32.totalorder %v1467_v10, 1  ;;  %vm2671_vm13 = vcmp.eq.s32.totalorder %v1471_v11, 1  ;;  %vm2675_vm14 = vcmp.eq.s32.totalorder %v1459_v12, 1  ;;  %vm2679_vm7 = vcmp.eq.s32.totalorder %v1463_v23, 1 }
  0x3e   : > { %vm1477_vm0 = vmpackc.low %vm2671_vm13, %vm2667_vm11  ;;  %vm2744_vm11 = vcmp.eq.s32.totalorder %v1819_v53, 1 }
  0x3f   : > { %vm1476_vm1 = vmpackc.low %vm2679_vm7, %vm2675_vm14  ;;  %v1479_v61 = vsel %vm1477_vm0, 65537, %v2365_v14 }
  0x40   : > { %v1478_v62 = vsel %vm1476_vm1, 65537, %v2365_v14 }
  0x99   : > { %v478_v2 = vpop.permute.xlu0 %477 }
  0x9a   : > { %v481_v3 = vrot.slane %v478_v2, 4 }
  0x9c   : > { %v484_v7 = vsel %vm483_vm5, %v481_v3, %v478_v2  ;;  %v762_v8 = vpop.permute.xlu1 %761 }
  0x9d   : > { %vm488_vm9 = vcmp.ne.s16.totalorder %v484_v7, 0  ;;  %v480_v9 = vpop.permute.xlu0 %479  ;;  %v765_v47 = vrot.slane %v762_v8, 4 }
  0x9e   : > { %v491_v13 = vsel %vm488_vm9, %v2623_v5, 0  ;;  %v494_v15 = vsel %vm488_vm9, %v2628_v6, 0  ;;  %v482_v17 = vrot.slane %v480_v9, 4  ;;  %vm1655_vm9 = vmpackc.low %vm2718_vm6, %vm2714_vm3  ;;  %vm2785_vm6 = vcmp.eq.s32.totalorder %v1827_v25, 1 }
  0x9f   : > { %v2158_v24 = vcombine.high %v491_v13, %v494_v15  ;;  %v2157_v41 = vcombine.low %v491_v13, %v494_v15  ;;  %v768_v57 = vsel %vm767_vm2, %v765_v47, %v762_v8 }
  0xa0   : > { %v486_v29 = vsel %vm485_vm10, %v481_v3, %v482_v17  ;;  %vm2662_vm12 = vcmp.ne.s16.totalorder %v482_v17, 0  ;;  %v764_v37 = vpop.permute.xlu1 %763  ;;  %vm771_vm13 = vcmp.ne.s16.totalorder %v768_v57, 0  ;;  %v1657_v3 = vsel %vm1655_vm9, 65537, %v2365_v14 }
  0xa1   : > { %v487_v31 = vsel %vm483_vm5, %v486_v29, %v480_v9  ;;  %523 = vrot.lane.b32.xlu0 %v2158_v24, %s2371_s20  ;;  %v493_v43 = vsel %vm2662_vm12, %v2653_v28, 0  ;;  %v496_v44 = vsel %vm2662_vm12, %v2659_v30, 0  ;;  %v766_v48 = vrot.slane %v764_v37, 4  ;;  %v943_v2 = vpop.permute.xlu0 %942 }
  0xa2   : > { %vm489_vm15 = vcmp.ne.s16.totalorder %v487_v31, 0  ;;  %v2161_v51 = vcombine.low %v493_v43, %v496_v44  ;;  %vm2729_vm5 = vcmp.eq.s32.totalorder %v1641_v50, 1  ;;  %vm2740_vm12 = vcmp.eq.s32.totalorder %v1815_v52, 1 }
  0xa3   : > { %v492_v39 = vsel %vm489_vm15, %v2643_v26, 0  ;;  %v495_v40 = vsel %vm489_vm15, %v2648_v27, 0  ;;  %v769_v58 = vsel %vm485_vm10, %v765_v47, %v766_v48  ;;  %vm1654_vm15 = vmpackc.low %vm2729_vm5, %vm2725_vm4  ;;  %v774_v4 = vsel %vm771_vm13, %v2623_v5, 0 }
  0xa4   : > { %v2159_v45 = vcombine.low %v492_v39, %v495_v40  ;;  %v2160_v54 = vcombine.high %v492_v39, %v495_v40  ;;  %v770_v1 = vsel %vm767_vm2, %v769_v58, %v764_v37  ;;  %vm1832_vm14 = vmpackc.low %vm2744_vm11, %vm2740_vm12  ;;  %v777_v7 = vsel %vm771_vm13, %v2628_v6, 0  ;;  %v945_v9 = vpop.permute.xlu1 %944 }
  0xa5   : > { %521 = vrot.lane.b32.xlu0 %v2157_v41, %s2371_s20  ;;  %vm772_vm7 = vcmp.ne.s16.totalorder %v770_v1, 0  ;;  %v1656_v8 = vsel %vm1654_vm15, 65537, %v2365_v14  ;;  %v946_v10 = vrot.slane %v943_v2, 4  ;;  %v1834_v11 = vsel %vm1832_vm14, 65537, %v2365_v14  ;;  %v1121_v35 = vpop.permute.xlu0 %1120 }
  0xa6   : > { %525 = vrot.lane.b32.xlu1 %v2159_v45, %s2371_s20  ;;  %vm540_vm2 = vcmask 130048   ;;  %v775_v12 = vsel %vm772_vm7, %v2643_v26, 0  ;;  %v778_v13 = vsel %vm772_vm7, %v2648_v27, 0  ;;  %v2172_v15 = vcombine.high %v774_v4, %v777_v7 }
  0xa7   : > { %v947_v17 = vrot.slane %v945_v9, 4  ;;  %vm2764_vm0 = vcmp.ne.s16.totalorder %v766_v48, 0  ;;  %v1823_v24 = vrot.slane %v2696_v46, %v2496_v21  ;;  %v949_v29 = vsel %vm540_vm2, %v946_v10, %v943_v2 }
  0xa8   : > { %v2173_v31 = vcombine.low %v775_v12, %v778_v13  ;;  %v2171_v32 = vcombine.low %v774_v4, %v777_v7  ;;  %v1123_v34 = vpop.permute.xlu1 %1122  ;;  %v776_v36 = vsel %vm2764_vm0, %v2653_v28, 0  ;;  %v779_v37 = vsel %vm2764_vm0, %v2659_v30, 0 }
  0xa9   : > { %529 = vrot.lane.b32.xlu0 %v2161_v51, %s2371_s20  ;;  %v950_v33 = vsel %vm485_vm10, %v946_v10, %v947_v17  ;;  %vm952_vm1 = vcmp.ne.s16.totalorder %v949_v29, 0  ;;  %vm2781_vm3 = vcmp.eq.s32.totalorder %v1823_v24, 1  ;;  %v2174_v40 = vcombine.high %v775_v12, %v778_v13  ;;  %v1299_v56 = vpop.permute.xlu0 %1298 }
  0xaa   : > { %527 = vrot.lane.b32.xlu1 %v2160_v54, %s2371_s20  ;;  %v951_v41 = vsel %vm540_vm2, %v950_v33, %v945_v9  ;;  %v1125_v42 = vrot.slane %v1123_v34, 4  ;;  %v1124_v43 = vrot.slane %v1121_v35, 4  ;;  %v2175_v44 = vcombine.low %v776_v36, %v779_v37  ;;  %vm1833_vm4 = vmpackc.low %vm2785_vm6, %vm2781_vm3 }
  0xab   : > { %v955_v45 = vsel %vm952_vm1, %v2623_v5, 0  ;;  %v958_v46 = vsel %vm952_vm1, %v2628_v6, 0  ;;  %vm953_vm5 = vcmp.ne.s16.totalorder %v951_v41, 0  ;;  %vm1126_vm9 = vcmask 138240  }
  0xac   : > { %v2180_v47 = vcombine.high %v955_v45, %v958_v46  ;;  %v1128_v48 = vsel %vm485_vm10, %v1124_v43, %v1125_v42  ;;  %v1835_v49 = vsel %vm1833_vm4, 65537, %v2365_v14  ;;  %vm2798_vm12 = vcmp.ne.s16.totalorder %v947_v17, 0  ;;  %v1301_v60 = vpop.permute.xlu1 %1300 }
  0xad   : > { %1482 = vrot.lane.b32.xlu0 %v1479_v61, %s2372_s21  ;;  %v956_v51 = vsel %vm953_vm5, %v2643_v26, 0  ;;  %v959_v52 = vsel %vm953_vm5, %v2648_v27, 0  ;;  %v1129_v53 = vsel %vm1126_vm9, %v1128_v48, %v1123_v34  ;;  %v2179_v54 = vcombine.low %v955_v45, %v958_v46 }
  0xae   : > { %1480 = vrot.lane.b32.xlu1 %v1478_v62, %s2372_s21  ;;  %v1127_v55 = vsel %vm1126_vm9, %v1124_v43, %v1121_v35  ;;  %v957_v57 = vsel %vm2798_vm12, %v2653_v28, 0  ;;  %v960_v58 = vsel %vm2798_vm12, %v2659_v30, 0  ;;  %v2181_v59 = vcombine.low %v956_v51, %v959_v52 }
  0xaf   : > { %vm1131_vm11 = vcmp.ne.s16.totalorder %v1129_v53, 0  ;;  %vm1130_vm13 = vcmp.ne.s16.totalorder %v1127_v55, 0  ;;  %v1302_v61 = vrot.slane %v1299_v56, 4  ;;  %v2183_v62 = vcombine.low %v957_v57, %v960_v58 }
  0xb0   : > { %vm1304_vm15 = vcmask 146432   ;;  %v2182_v63 = vcombine.high %v956_v51, %v959_v52  ;;  %v1134_v0 = vsel %vm1131_vm11, %v2643_v26, 0  ;;  %v1137_v1 = vsel %vm1131_vm11, %v2648_v27, 0 }
  0xb1   : > { %1660 = vrot.lane.b32.xlu0 %v1657_v3, %s2373_s22  ;;  %v1303_v2 = vrot.slane %v1301_v60, 4  ;;  %v1133_v3 = vsel %vm1130_vm13, %v2623_v5, 0  ;;  %v1136_v4 = vsel %vm1130_vm13, %v2628_v6, 0  ;;  %v1305_v7 = vsel %vm1304_vm15, %v1302_v61, %v1299_v56 }
  0xb2   : > { %1658 = vrot.lane.b32.xlu1 %v1656_v8, %s2373_s22  ;;  %v2189_v8 = vcombine.low %v1134_v0, %v1137_v1  ;;  %v2188_v9 = vcombine.high %v1133_v3, %v1136_v4  ;;  %vm1308_vm14 = vcmp.ne.s16.totalorder %v1305_v7, 0  ;;  %vm1132_vm7 = vcmp.ne.s16.totalorder %v1125_v42, 0  ;;  %s388_s22 = scalar_lea.vmem %s3009_s3, %s2150_s16 }
  0xb3   : > { %v1306_v10 = vsel %vm485_vm10, %v1302_v61, %v1303_v2  ;;  %v2190_v12 = vcombine.high %v1134_v0, %v1137_v1  ;;  %v1311_v13 = vsel %vm1308_vm14, %v2623_v5, 0  ;;  %v2187_v17 = vcombine.low %v1133_v3, %v1136_v4  ;;  %v444_v0 = vld [vmem:[%s2840_s13] sm:$0xff] }
  0xb4   : > { %v1135_v23 = vsel %vm1132_vm7, %v2653_v28, 0  ;;  %v1138_v24 = vsel %vm1132_vm7, %v2659_v30, 0  ;;  %vm1310_vm1 = vcmp.ne.s16.totalorder %v1303_v2, 0  ;;  %vm3069_vm3 = vcmp.ge.s32.totalorder %v2476_v16, 0 }
  0xb5   : > { %1836 = vrot.lane.b32.xlu0 %v1834_v11, %s2374_s23  ;;  %v1307_v11 = vsel %vm1304_vm15, %v1306_v10, %v1301_v60  ;;  %v2191_v29 = vcombine.low %v1135_v23, %v1138_v24  ;;  %v1313_v34 = vsel %vm1310_vm1, %v2653_v28, 0  ;;  %v1316_v35 = vsel %vm1310_vm1, %v2659_v30, 0  ;;  %vm414_vm6 = vmand %vm2488_vm8, %vm3069_vm3 }
  0xb6   : > { %806 = vrot.lane.b32.xlu1 %v2172_v15, %s2375_s29  ;;  %v1314_v15 = vsel %vm1308_vm14, %v2628_v6, 0  ;;  %vm1309_vm0 = vcmp.ne.s16.totalorder %v1307_v11, 0  ;;  %v2199_v37 = vcombine.low %v1313_v34, %v1316_v35  ;;  %vm3070_vm4 = vcmp.lt.s32.totalorder %v2476_v16, 16 }
  0xb7   : > { %v2196_v25 = vcombine.high %v1311_v13, %v1314_v15  ;;  %v2195_v33 = vcombine.low %v1311_v13, %v1314_v15  ;;  %vm416_vm5 = vmand %vm414_vm6, %vm3070_vm4  ;;  %vm531_vm15 = vcmask 1039360   ;;  %vm1486_vm7 = vcmask 261120  }
  0xb8   : > { %v417_v39 = vsel %vm416_vm5, 1, %v2365_v14  ;;  %vm1664_vm1 = vcmask 269312   ;;  %vm814_vm5 = vcmask 1031168  }
  0xb9   : > { %808 = vrot.lane.b32.xlu0 %v2173_v31, %s2375_s29  ;;  %v1312_v31 = vsel %vm1309_vm0, %v2643_v26, 0  ;;  %v425_v41 = vrot.slane %v417_v39, %v2494_v20  ;;  %v429_v42 = vrot.slane %v417_v39, %v2496_v21  ;;  %v433_v43 = vrot.slane %v417_v39, %v2498_v22  ;;  %v2156_v20 = vld [vmem:[%s2840_s13 + $0x8] sm:$0xff] }
  0xba   : > { %804 = vrot.lane.b32.xlu1 %v2171_v32, %s2375_s29  ;;  %v1315_v32 = vsel %vm1309_vm0, %v2648_v27, 0 }
  0xbb   : > { %v2197_v36 = vcombine.low %v1312_v31, %v1315_v32  ;;  %v2198_v38 = vcombine.high %v1312_v31, %v1315_v32  ;;  %vm435_vm12 = vcmp.eq.s32.totalorder %v425_v41, 1  ;;  %vm436_vm8 = vcmp.eq.s32.totalorder %v429_v42, 1 }
  0xbc   : > { %vm437_vm13 = vcmp.eq.s32.totalorder %v433_v43, 1 }
  0xbd   : > { %810 = vrot.lane.b32.xlu0 %v2174_v40, %s2375_s29  ;;  %v421_v40 = vrot.slane %v417_v39, %v2492_v19  ;;  %vm439_vm14 = vmpackc.low %vm437_vm13, %vm436_vm8  ;;  %vm995_vm13 = vcmask 916480  }
  0xbe   : > { %812 = vrot.lane.b32.xlu1 %v2175_v44, %s2375_s29  ;;  %v441_v46 = vsel %vm439_vm14, %v2643_v26, 0 }
  0xbf   : > { %vm434_vm9 = vcmp.eq.s32.totalorder %v421_v40, 1 }
  0xc0   : > { %vm438_vm11 = vmpackc.low %vm435_vm12, %vm434_vm9  ;;  %vm1842_vm12 = vcmask 277504  }
  0xc1   : > { %987 = vrot.lane.b32.xlu0 %v2180_v47, %s2376_s30  ;;  %v440_v16 = vsel %vm438_vm11, %v2623_v5, 0  ;;  %v442_v44 = vsel %vm438_vm11, %v2628_v6, 0  ;;  %v443_v47 = vsel %vm439_vm14, %v2648_v27, 0  ;;  %vm1173_vm14 = vcmask 908288  }
  0xc2   : > { %1838 = vrot.lane.b32.xlu1 %v1835_v49, %s2374_s23  ;;  %v2165_v21 = vcombine.high %v440_v16, %v442_v44  ;;  %v499_v49 = vpack.c.bf16 %v2156_v20, %v2156_v20  ;;  %v2164_v51 = vcombine.low %v440_v16, %v442_v44  ;;  %v2167_v53 = vcombine.high %v441_v46, %v443_v47  ;;  %v2170_v20 = vld [vmem:[%s2840_s13 + $0x10] sm:$0xff] }
  0xc3   : > { %v2166_v57 = vcombine.low %v441_v46, %v443_v47 }
  0xc5   : > { %985 = vrot.lane.b32.xlu0 %v2179_v54, %s2376_s30 }
  0xc6   : > { %989 = vrot.lane.b32.xlu1 %v2181_v59, %s2376_s30 }
  0xc9   : > { %993 = vrot.lane.b32.xlu0 %v2183_v62, %s2376_s30 }
  0xca   : > { %991 = vrot.lane.b32.xlu1 %v2182_v63, %s2376_s30  ;;  %s393_s30 = scalar_lea.vmem %s3012_s6, %s2228_s26 }
  0xcd   : > { %1167 = vrot.lane.b32.xlu0 %v2189_v8, %s2377_s9 }
  0xce   : > { %1165 = vrot.lane.b32.xlu1 %v2188_v9, %s2377_s9 }
  0xd1   : > { %1169 = vrot.lane.b32.xlu0 %v2190_v12, %s2377_s9  ;;  %v445_v12 = vpack.c.bf16 %v444_v0, %v444_v0 }
  0xd2   : > { %1163 = vrot.lane.b32.xlu1 %v2187_v17, %s2377_s9 }
  0xd5   : > { %1343 = vrot.lane.b32.xlu0 %v2196_v25, %s2378_s10 }
  0xd6   : > { %1171 = vrot.lane.b32.xlu1 %v2191_v29, %s2377_s9 }
  0xd9   : > { %1341 = vrot.lane.b32.xlu0 %v2195_v33, %s2378_s10 }
  0xda   : > { %1345 = vrot.lane.b32.xlu1 %v2197_v36, %s2378_s10 }
  0xdd   : > { %1349 = vrot.lane.b32.xlu0 %v2199_v37, %s2378_s10 }
  0xde   : > { %1347 = vrot.lane.b32.xlu1 %v2198_v38, %s2378_s10  ;;  %s398_s10 = scalar_lea.vmem %s3013_s7, %s2228_s26 }
 0x113   : > { %v524_v18 = vpop.permute.xlu0 %523 }
 0x117   : > { %v522_v19 = vpop.permute.xlu0 %521 }
 0x118   : > { %v526_v45 = vpop.permute.xlu1 %525  ;;  %v532_v48 = vsel %vm531_vm15, %v522_v19, %v524_v18 }
 0x119   : > { %v533_v22 = vsel %vm531_vm15, %v524_v18, %v526_v45 }
 0x11a   : > { %544 = vmatprep.subr.bf16.mxu0 %v533_v22 }
 0x11b   : > { %545 = vmatpush1.bf16.msra.mxu0 %v532_v48  ;;  %v530_v50 = vpop.permute.xlu0 %529  ;;  %v782_v48 = vpack.c.bf16 %v2170_v20, %v2170_v20  ;;  %v2202_v20 = vld [vmem:[%s2840_s13 + $0x30] sm:$0xff] }
 0x11c   : > { %v528_v52 = vpop.permute.xlu1 %527  ;;  %649 = vmatprep.subr.bf16.mxu0 %v2165_v21  ;;  %v1501_v46 = vpack.c.bf16 %v2202_v20, %v2202_v20 }
 0x11d   : > { %v535_v54 = vsel %vm531_vm15, %v528_v52, %v530_v50  ;;  %v534_v55 = vsel %vm531_vm15, %v526_v45, %v528_v52 }
 0x11e   : > { %585 = vmatprep.subr.bf16.mxu1 %v535_v54  ;;  %2162 = vmatmul.mubr.msk.bf16.vlgmr.msra.gmra.mrb[0].mxu0 %vm540_vm2, %v499_v49 }
 0x11f   : > { %586 = vmatpush1.bf16.msra.mxu1 %v534_v55  ;;  %v1483_v56 = vpop.permute.xlu0 %1482  ;;  %650 = vmatpush1.bf16.msra.mxu0 %v2164_v51 }
 0x120   : > { %v1481_v58 = vpop.permute.xlu1 %1480  ;;  %v1485_v59 = vrot.slane %v1483_v56, 4  ;;  %681 = vmatprep.mubr.bf16.mxu0 %v2365_v14  ;;  %690 = vmatprep.subr.bf16.mxu1 %v2167_v53 }
 0x121   : > { %v1484_v60 = vrot.slane %v1481_v58, 4 }
 0x122   : > { %2163 = vmatmul.mubr.msk.bf16.vlgmr.msra.gmra.mrb[0].mxu1 %vm540_vm2, %v499_v49  ;;  %vm2859_vm6 = vcmp.ne.s16.totalorder %v1485_v59, 0 }
 0x123   : > { %v1487_v61 = vsel %vm1486_vm7, %v1484_v60, %v1481_v58  ;;  %v1488_v62 = vsel %vm485_vm10, %v1484_v60, %v1485_v59  ;;  %v1661_v63 = vpop.permute.xlu0 %1660  ;;  %691 = vmatpush1.bf16.msra.mxu1 %v2166_v57  ;;  %722 = vmatprep.mubr.bf16.mxu1 %v2365_v14  ;;  %v1495_v31 = vsel %vm2859_vm6, %v2653_v28, 0  ;;  %v1498_v33 = vsel %vm2859_vm6, %v2659_v30, 0 }
 0x124   : > { %vm1490_vm0 = vcmp.ne.s16.totalorder %v1487_v61, 0  ;;  %v1489_v1 = vsel %vm1486_vm7, %v1488_v62, %v1483_v56  ;;  %v1659_v2 = vpop.permute.xlu1 %1658  ;;  %v1663_v3 = vrot.slane %v1661_v63, 4  ;;  %v2207_v18 = vcombine.low %v1495_v31, %v1498_v33  ;;  %v2186_v31 = vld [vmem:[%s2840_s13 + $0x20] sm:$0xff] }
 0x125   : > { %v1493_v4 = vsel %vm1490_vm0, %v2623_v5, 0  ;;  %v1496_v7 = vsel %vm1490_vm0, %v2628_v6, 0  ;;  %vm1491_vm3 = vcmp.ne.s16.totalorder %v1489_v1, 0  ;;  %v1662_v8 = vrot.slane %v1659_v2, 4 }
 0x126   : > { %v1494_v9 = vsel %vm1491_vm3, %v2643_v26, 0  ;;  %v1497_v10 = vsel %vm1491_vm3, %v2648_v27, 0  ;;  %v2204_v11 = vcombine.high %v1493_v4, %v1496_v7  ;;  %v2203_v32 = vcombine.low %v1493_v4, %v1496_v7  ;;  %v2178_v4 = vld [vmem:[%s2840_s13 + $0x18] sm:$0xff] }
 0x127   : > { %v1665_v15 = vsel %vm1664_vm1, %v1662_v8, %v1659_v2  ;;  %v1666_v17 = vsel %vm485_vm10, %v1662_v8, %v1663_v3  ;;  %v2865_v23 = vpop.permute.xlu0 %1836  ;;  %v2205_v29 = vcombine.low %v1494_v9, %v1497_v10  ;;  %v2206_v39 = vcombine.high %v1494_v9, %v1497_v10 }
 0x128   : > { %vm1668_vm4 = vcmp.ne.s16.totalorder %v1665_v15, 0  ;;  %v1667_v24 = vsel %vm1664_vm1, %v1666_v17, %v1661_v63  ;;  %v807_v25 = vpop.permute.xlu1 %806  ;;  %1525 = vrot.lane.b32.xlu1 %v2204_v11, %s2379_s24  ;;  %v1840_v36 = vrot.slane %v2865_v23, 4  ;;  %vm2896_vm11 = vcmp.ne.s16.totalorder %v1663_v3, 0 }
 0x129   : > { %vm1669_vm9 = vcmp.ne.s16.totalorder %v1667_v24, 0  ;;  %1527 = vrot.lane.b32.xlu0 %v2205_v29, %s2379_s24  ;;  %v1671_v34 = vsel %vm1668_vm4, %v2623_v5, 0  ;;  %v1674_v35 = vsel %vm1668_vm4, %v2628_v6, 0  ;;  %v1673_v50 = vsel %vm2896_vm11, %v2653_v28, 0 }
 0x12a   : > { %2168 = vmatmul.mubr.msk.bf16.vlgmr.msra.gmra.mrb[0].mxu0 %vm540_vm2, %v445_v12  ;;  %v1672_v41 = vsel %vm1669_vm9, %v2643_v26, 0  ;;  %v1675_v42 = vsel %vm1669_vm9, %v2648_v27, 0  ;;  %v2212_v16 = vcombine.high %v1671_v34, %v1674_v35  ;;  %v1843_v44 = vsel %vm1842_vm12, %v1840_v36, %v2865_v23 }
 0x12b   : > { %v809_v37 = vpop.permute.xlu0 %808  ;;  %858 = vmatprep.mubr.bf16.mxu0 %v2365_v14  ;;  %v2213_v22 = vcombine.low %v1672_v41, %v1675_v42  ;;  %vm1846_vm8 = vcmp.ne.s16.totalorder %v1843_v44, 0  ;;  %v2211_v52 = vcombine.low %v1671_v34, %v1674_v35  ;;  %v1676_v53 = vsel %vm2896_vm11, %v2659_v30, 0 }
 0x12c   : > { %v805_v38 = vpop.permute.xlu1 %804  ;;  %1523 = vrot.lane.b32.xlu1 %v2203_v32, %s2379_s24  ;;  %v816_v40 = vsel %vm814_vm5, %v807_v25, %v809_v37  ;;  %v1849_v54 = vsel %vm1846_vm8, %v2623_v5, 0  ;;  %v1852_v55 = vsel %vm1846_vm8, %v2628_v6, 0  ;;  %v2214_v57 = vcombine.high %v1672_v41, %v1675_v42 }
 0x12d   : > { %v815_v43 = vsel %vm814_vm5, %v805_v38, %v807_v25  ;;  %826 = vmatprep.subr.bf16.mxu0 %v816_v40  ;;  %1529 = vrot.lane.b32.xlu0 %v2206_v39, %s2379_s24  ;;  %v2215_v61 = vcombine.low %v1673_v50, %v1676_v53  ;;  %v2220_v5 = vcombine.high %v1849_v54, %v1852_v55  ;;  %vm1351_vm7 = vcmask 900096  }
 0x12e   : > { %827 = vmatpush1.bf16.msra.mxu0 %v815_v43  ;;  %2169 = vmatmul.mubr.msk.bf16.vlgmr.msra.gmra.mrb[0].mxu1 %vm540_vm2, %v445_v12  ;;  %v2219_v9 = vcombine.low %v1849_v54, %v1852_v55  ;;  %v963_v11 = vpack.c.bf16 %v2178_v4, %v2178_v4  ;;  %v1141_v35 = vpack.c.bf16 %v2186_v31, %v2186_v31  ;;  %vm1533_vm0 = vcmask 785408   ;;  %v2210_v55 = vld [vmem:[%s2840_s13 + $0x38] sm:$0xff] }
 0x12f   : > { %v811_v19 = vpop.permute.xlu0 %810  ;;  %899 = vmatprep.mubr.bf16.mxu1 %v2365_v14  ;;  %vm1711_vm1 = vcmask 777216   ;;  %vm1889_vm3 = vcmask 769024  }
 0x130   : > { %v813_v45 = vpop.permute.xlu1 %812  ;;  %1531 = vrot.lane.b32.xlu1 %v2207_v18, %s2379_s24  ;;  %v817_v21 = vsel %vm814_vm5, %v809_v37, %v811_v19  ;;  %v2194_v18 = vld [vmem:[%s2840_s13 + $0x28] sm:$0xff] }
 0x131   : > { %v818_v47 = vsel %vm814_vm5, %v811_v19, %v813_v45  ;;  %1703 = vrot.lane.b32.xlu0 %v2212_v16, %s2380_s14  ;;  %v1319_v16 = vpack.c.bf16 %v2194_v18, %v2194_v18  ;;  %v2010_v18 = vld [vmem:[%s388_s22] sm:$0xff] }
 0x132   : > { %867 = vmatprep.subr.bf16.mxu1 %v818_v47 }
 0x133   : > { %868 = vmatpush1.bf16.msra.mxu1 %v817_v21  ;;  %v988_v49 = vpop.permute.xlu0 %987 }
 0x134   : > { %v1839_v51 = vpop.permute.xlu1 %1838  ;;  %1705 = vrot.lane.b32.xlu1 %v2213_v22, %s2380_s14 }
 0x135   : > { %v1841_v56 = vrot.slane %v1839_v51, 4  ;;  %1701 = vrot.lane.b32.xlu0 %v2211_v52, %s2380_s14 }
 0x136   : > { %2176 = vmatmul.mubr.msk.bf16.vlgmr.msra.gmra.mrb[0].mxu0 %vm540_vm2, %v782_v48 }
 0x137   : > { %v1844_v58 = vsel %vm485_vm10, %v1840_v36, %v1841_v56  ;;  %v986_v59 = vpop.permute.xlu0 %985  ;;  %1039 = vmatprep.mubr.bf16.mxu0 %v2365_v14  ;;  %vm2924_vm10 = vcmp.ne.s16.totalorder %v1841_v56, 0 }
 0x138   : > { %v1845_v60 = vsel %vm1842_vm12, %v1844_v58, %v1839_v51  ;;  %1707 = vrot.lane.b32.xlu1 %v2214_v57, %s2380_s14  ;;  %v990_v62 = vpop.permute.xlu1 %989  ;;  %v996_v6 = vsel %vm995_vm13, %v986_v59, %v988_v49  ;;  %v1851_v12 = vsel %vm2924_vm10, %v2653_v28, 0  ;;  %v1854_v13 = vsel %vm2924_vm10, %v2659_v30, 0 }
 0x139   : > { %vm1847_vm15 = vcmp.ne.s16.totalorder %v1845_v60, 0  ;;  %v997_v63 = vsel %vm995_vm13, %v988_v49, %v990_v62  ;;  %1709 = vrot.lane.b32.xlu0 %v2215_v61, %s2380_s14  ;;  %v2223_v24 = vcombine.low %v1851_v12, %v1854_v13  ;;  %v1679_v58 = vpack.c.bf16 %v2210_v55, %v2210_v55 }
 0x13a   : > { %v1850_v0 = vsel %vm1847_vm15, %v2643_v26, 0  ;;  %v1853_v1 = vsel %vm1847_vm15, %v2648_v27, 0  ;;  %1007 = vmatprep.subr.bf16.mxu0 %v997_v63  ;;  %2177 = vmatmul.mubr.msk.bf16.vlgmr.msra.gmra.mrb[0].mxu1 %vm540_vm2, %v782_v48 }
 0x13b   : > { %v2221_v2 = vcombine.low %v1850_v0, %v1853_v1  ;;  %v994_v3 = vpop.permute.xlu0 %993  ;;  %1008 = vmatpush1.bf16.msra.mxu0 %v996_v6  ;;  %1080 = vmatprep.mubr.bf16.mxu1 %v2365_v14  ;;  %v2222_v10 = vcombine.high %v1850_v0, %v1853_v1  ;;  %v2218_v1 = vld [vmem:[%s2840_s13 + $0x40] sm:$0xff] }
 0x13c   : > { %1881 = vrot.lane.b32.xlu1 %v2220_v5, %s2381_s15  ;;  %v992_v8 = vpop.permute.xlu1 %991  ;;  %v1857_v7 = vpack.c.bf16 %v2218_v1, %v2218_v1 }
 0x13d   : > { %v998_v26 = vsel %vm995_vm13, %v990_v62, %v992_v8  ;;  %v999_v27 = vsel %vm995_vm13, %v992_v8, %v994_v3  ;;  %1883 = vrot.lane.b32.xlu0 %v2221_v2, %s2381_s15 }
 0x13e   : > { %1048 = vmatprep.subr.bf16.mxu1 %v999_v27 }
 0x13f   : > { %1049 = vmatpush1.bf16.msra.mxu1 %v998_v26  ;;  %v1168_v15 = vpop.permute.xlu0 %1167 }
 0x140   : > { %1879 = vrot.lane.b32.xlu1 %v2219_v9, %s2381_s15  ;;  %v1166_v17 = vpop.permute.xlu1 %1165 }
 0x141   : > { %v1175_v23 = vsel %vm1173_vm14, %v1166_v17, %v1168_v15  ;;  %1885 = vrot.lane.b32.xlu0 %v2222_v10, %s2381_s15 }
 0x142   : > { %2184 = vmatmul.mubr.msk.bf16.vlgmr.msra.gmra.mrb[0].mxu0 %vm540_vm2, %v963_v11  ;;  %1185 = vmatprep.subr.bf16.mxu0 %v1175_v23 }
 0x143   : > { %v1170_v25 = vpop.permute.xlu0 %1169  ;;  %1217 = vmatprep.mubr.bf16.mxu0 %v2365_v14 }
 0x144   : > { %1887 = vrot.lane.b32.xlu1 %v2223_v24, %s2381_s15  ;;  %v1164_v28 = vpop.permute.xlu1 %1163  ;;  %v1176_v32 = vsel %vm1173_vm14, %v1168_v15, %v1170_v25 }
 0x145   : > { %v1174_v29 = vsel %vm1173_vm14, %v1164_v28, %v1166_v17 }
 0x146   : > { %1186 = vmatpush1.bf16.msra.mxu0 %v1174_v29  ;;  %2185 = vmatmul.mubr.msk.bf16.vlgmr.msra.gmra.mrb[0].mxu1 %vm540_vm2, %v963_v11 }
 0x147   : > { %v1344_v30 = vpop.permute.xlu0 %1343  ;;  %1258 = vmatprep.mubr.bf16.mxu1 %v2365_v14 }
 0x148   : > { %v1172_v33 = vpop.permute.xlu1 %1171 }
 0x149   : > { %v1177_v34 = vsel %vm1173_vm14, %v1170_v25, %v1172_v33 }
 0x14a   : > { %1226 = vmatprep.subr.bf16.mxu1 %v1177_v34 }
 0x14b   : > { %1227 = vmatpush1.bf16.msra.mxu1 %v1176_v32  ;;  %v1342_v36 = vpop.permute.xlu0 %1341 }
 0x14c   : > { %v1346_v37 = vpop.permute.xlu1 %1345  ;;  %v1352_v38 = vsel %vm1351_vm7, %v1342_v36, %v1344_v30 }
 0x14d   : > { %v1353_v39 = vsel %vm1351_vm7, %v1344_v30, %v1346_v37 }
 0x14e   : > { %2192 = vmatmul.mubr.msk.bf16.vlgmr.msra.gmra.mrb[0].mxu0 %vm540_vm2, %v1141_v35  ;;  %1363 = vmatprep.subr.bf16.mxu0 %v1353_v39 }
 0x14f   : > { %v1350_v40 = vpop.permute.xlu0 %1349  ;;  %1364 = vmatpush1.bf16.msra.mxu0 %v1352_v38  ;;  %1395 = vmatprep.mubr.bf16.mxu0 %v2365_v14 }
 0x150   : > { %v1348_v41 = vpop.permute.xlu1 %1347 }
 0x151   : > { %v1354_v42 = vsel %vm1351_vm7, %v1346_v37, %v1348_v41  ;;  %v1355_v43 = vsel %vm1351_vm7, %v1348_v41, %v1350_v40  ;;  %v2006_v41 = vld [vmem:[%s384_s19] sm:$0xff] }
 0x152   : > { %1404 = vmatprep.subr.bf16.mxu1 %v1355_v43  ;;  %2193 = vmatmul.mubr.msk.bf16.vlgmr.msra.gmra.mrb[0].mxu1 %vm540_vm2, %v1141_v35 }
 0x153   : > { %1405 = vmatpush1.bf16.msra.mxu1 %v1354_v42  ;;  %1436 = vmatprep.mubr.bf16.mxu1 %v2365_v14 }
 0x15a   : > { %2200 = vmatmul.mubr.msk.bf16.vlgmr.msra.gmra.mrb[0].mxu0 %vm540_vm2, %v1319_v16 }
 0x15b   : > { %1577 = vmatprep.mubr.bf16.mxu0 %v2365_v14 }
 0x15e   : > { %2201 = vmatmul.mubr.msk.bf16.vlgmr.msra.gmra.mrb[0].mxu1 %vm540_vm2, %v1319_v16 }
 0x15f   : > { %1618 = vmatprep.mubr.bf16.mxu1 %v2365_v14 }
 0x19a   : > { %v1526_v44 = vpop.permute.xlu1 %1525 }
 0x19b   : > { %v1528_v19 = vpop.permute.xlu0 %1527 }
 0x19c   : > { %v1535_v45 = vsel %vm1533_vm0, %v1526_v44, %v1528_v19 }
 0x19d   : > { %1545 = vmatprep.subr.bf16.mxu0 %v1535_v45 }
 0x19e   : > { %v1524_v21 = vpop.permute.xlu1 %1523 }
 0x19f   : > { %v1534_v22 = vsel %vm1533_vm0, %v1524_v21, %v1526_v44  ;;  %v1530_v47 = vpop.permute.xlu0 %1529 }
 0x1a0   : > { %1546 = vmatpush1.bf16.msra.mxu0 %v1534_v22  ;;  %v1536_v50 = vsel %vm1533_vm0, %v1528_v19, %v1530_v47 }
 0x1a2   : > { %v1532_v48 = vpop.permute.xlu1 %1531 }
 0x1a3   : > { %2208 = vmatmul.mubr.msk.bf16.vlgmr.msra.gmra.mrb[0].mxu0 %vm540_vm2, %v1501_v46  ;;  %v1537_v49 = vsel %vm1533_vm0, %v1530_v47, %v1532_v48  ;;  %v1704_v51 = vpop.permute.xlu0 %1703  ;;  %v2032_v47 = vld [vmem:[%s393_s30 + $0x8] sm:$0xff]  ;;  %v2033_v48 = vld [vmem:[%s393_s30 + $0x10] sm:$0xff] }
 0x1a4   : > { %1586 = vmatprep.subr.bf16.mxu1 %v1537_v49  ;;  %1755 = vmatprep.mubr.bf16.mxu0 %v2365_v14  ;;  %v2034_v49 = vld [vmem:[%s393_s30 + $0x18] sm:$0xff] }
 0x1a5   : > { %1587 = vmatpush1.bf16.msra.mxu1 %v1536_v50 }
 0x1a6   : > { %v1706_v52 = vpop.permute.xlu1 %1705 }
 0x1a7   : > { %v1713_v53 = vsel %vm1711_vm1, %v1704_v51, %v1706_v52  ;;  %v1702_v54 = vpop.permute.xlu0 %1701 }
 0x1a8   : > { %2209 = vmatmul.mubr.msk.bf16.vlgmr.msra.gmra.mrb[0].mxu1 %vm540_vm2, %v1501_v46  ;;  %1723 = vmatprep.subr.bf16.mxu0 %v1713_v53  ;;  %v1712_v56 = vsel %vm1711_vm1, %v1702_v54, %v1704_v51  ;;  %v2031_v46 = vld [vmem:[%s393_s30] sm:$0xff] }
 0x1a9   : > { %1796 = vmatprep.mubr.bf16.mxu1 %v2365_v14  ;;  %1724 = vmatpush1.bf16.msra.mxu0 %v1712_v56 }
 0x1aa   : > { %v1708_v57 = vpop.permute.xlu1 %1707 }
 0x1ab   : > { %v1710_v59 = vpop.permute.xlu0 %1709  ;;  %v1714_v61 = vsel %vm1711_vm1, %v1706_v52, %v1708_v57 }
 0x1ac   : > { %v1715_v60 = vsel %vm1711_vm1, %v1708_v57, %v1710_v59 }
 0x1ad   : > { %1764 = vmatprep.subr.bf16.mxu1 %v1715_v60 }
 0x1ae   : > { %v1882_v5 = vpop.permute.xlu1 %1881  ;;  %1765 = vmatpush1.bf16.msra.mxu1 %v1714_v61 }
 0x1af   : > { %2216 = vmatmul.mubr.msk.bf16.vlgmr.msra.gmra.mrb[0].mxu0 %vm540_vm2, %v1679_v58  ;;  %v1884_v62 = vpop.permute.xlu0 %1883 }
 0x1b0   : > { %1933 = vmatprep.mubr.bf16.mxu0 %v2365_v14  ;;  %v1891_v6 = vsel %vm1889_vm3, %v1882_v5, %v1884_v62 }
 0x1b1   : > { %1901 = vmatprep.subr.bf16.mxu0 %v1891_v6 }
 0x1b2   : > { %v1880_v63 = vpop.permute.xlu1 %1879 }
 0x1b3   : > { %v1890_v0 = vsel %vm1889_vm3, %v1880_v63, %v1882_v5  ;;  %v1886_v2 = vpop.permute.xlu0 %1885 }
 0x1b4   : > { %2217 = vmatmul.mubr.msk.bf16.vlgmr.msra.gmra.mrb[0].mxu1 %vm540_vm2, %v1679_v58  ;;  %1902 = vmatpush1.bf16.msra.mxu0 %v1890_v0  ;;  %v1892_v8 = vsel %vm1889_vm3, %v1884_v62, %v1886_v2 }
 0x1b5   : > { %1974 = vmatprep.mubr.bf16.mxu1 %v2365_v14 }
 0x1b6   : > { %v1888_v3 = vpop.permute.xlu1 %1887 }
 0x1b7   : > { %v1893_v4 = vsel %vm1889_vm3, %v1886_v2, %v1888_v3 }
 0x1b8   : > { %1942 = vmatprep.subr.bf16.mxu1 %v1893_v4 }
 0x1b9   : > { %1943 = vmatpush1.bf16.msra.mxu1 %v1892_v8 }
 0x1bb   : > { %2224 = vmatmul.mubr.msk.bf16.vlgmr.msra.gmra.mrb[0].mxu0 %vm540_vm2, %v1857_v7 }
 0x1c0   : > { %2225 = vmatmul.mubr.msk.bf16.vlgmr.msra.gmra.mrb[0].mxu1 %vm540_vm2, %v1857_v7 }
 0x28e   : > { %v1935_v26 = vpop.f32.mrb[0].mxu0 }
 0x28f   : > { %v1993_v27 = vmul.f32 %v1935_v26, %v1935_v26  ;;  %v1937_v9 = vpop.f32.mrb[1].mxu0 }
 0x290   : > { %v1987_v10 = vadd.f32 %v1937_v9, %v1935_v26  ;;  %v1994_v11 = vmul.f32 %v1937_v9, %v1937_v9  ;;  %v1939_v12 = vpop.f32.mrb[2].mxu0 }
 0x291   : > { %v1940_v13 = vpop.f32.mrb[3].mxu0 }
 0x292   : > { %v1997_v14 = vadd.f32 %v1994_v11, %v1993_v27 }
 0x293   : > { %v1976_v15 = vpop.f32.mrb[0].mxu1 }
 0x294   : > { %v1995_v17 = vmul.f32 %v1976_v15, %v1976_v15  ;;  %v1978_v23 = vpop.f32.mrb[1].mxu1  ;;  %v1988_v24 = vadd.f32 %v1987_v10, %v1976_v15 }
 0x295   : > { %v1980_v25 = vpop.f32.mrb[2].mxu1  ;;  %v1996_v28 = vmul.f32 %v1978_v23, %v1978_v23 }
 0x296   : > { %v1981_v29 = vpop.f32.mrb[3].mxu1  ;;  %v1989_v30 = vadd.f32 %v1988_v24, %v1978_v23  ;;  %v1998_v31 = vadd.f32 %v1997_v14, %v1995_v17 }
 0x298   : > { %1990 = vadd.xlane.f32.xlu0 %v1989_v30  ;;  %v1999_v32 = vadd.f32 %v1998_v31, %v1996_v28 }
 0x29a   : > { %2000 = vadd.xlane.f32.xlu1 %v1999_v32 }
 0x325   : > { %v1991_v33 = vpop.xlane.xlu0 %1990 }
 0x326   : > { %v1992_v34 = vmul.f32 0.001953125, %v1991_v33 }
 0x327   : > { %v2001_v35 = vpop.xlane.xlu1 %2000 }
 0x328   : > { %v2003_v36 = vmul.f32 %v1992_v34, %v1992_v34  ;;  %v2002_v37 = vmul.f32 0.001953125, %v2001_v35 }
 0x32a   : > { %v2004_v38 = vsub.f32 %v2002_v37, %v2003_v36 }
 0x32c   : > { %v2005_v39 = vmax.f32 %v2004_v38, 0.0 }
 0x32e   : > { %v2007_v40 = vadd.f32 1e-05, %v2005_v39 }
 0x330   : > { %2339 = vrsqrt.f32 %v2007_v40 }
 0x33a   : > { %v2340_v42 = vpop.eup %2339 }
 0x33b   : > { %v2009_v43 = vmul.f32 %v2340_v42, %v2006_v41 }
 0x33d   : > { %2015 = vperm.xlu0 %2337, %v2009_v43   ;;  %v2011_v16 = vmul.f32 %v2009_v43, %v1992_v34 }
 0x33f   : > { %v2012_v44 = vsub.f32 %v2010_v18, %v2011_v16 }
 0x341   : > { %2024 = vperm.xlu1 %2338, %v2012_v44  }
 0x3bc   : > { %v2016_v19 = vpop.permute.xlu0 %2015 }
 0x3bd   : > { %v2018_v20 = vmul.f32 %v2016_v19, %v1935_v26  ;;  %v2019_v45 = vmul.f32 %v2016_v19, %v1937_v9  ;;  %v2020_v21 = vmul.f32 %v2016_v19, %v1976_v15  ;;  %v2021_v22 = vmul.f32 %v2016_v19, %v1978_v23 }
 0x3c0   : > { %v2025_v50 = vpop.permute.xlu1 %2024 }
 0x3c1   : > { %v2027_v51 = vadd.f32 %v2025_v50, %v2018_v20  ;;  %v2028_v52 = vadd.f32 %v2025_v50, %v2019_v45  ;;  %v2029_v53 = vadd.f32 %v2025_v50, %v2020_v21  ;;  %v2030_v54 = vadd.f32 %v2025_v50, %v2021_v22 }
 0x3c3   : > { %v2035_v55 = vadd.f32 %v2031_v46, %v2027_v51  ;;  %v2036_v56 = vadd.f32 %v2032_v47, %v2028_v52  ;;  %v2037_v57 = vadd.f32 %v2033_v48, %v2029_v53  ;;  %v2038_v58 = vadd.f32 %v2034_v49, %v2030_v54 }
 0x3c5   : > { %v2039_v59 = vmax.f32 %v2035_v55, 0.0  ;;  %v2040_v60 = vmax.f32 %v2036_v56, 0.0  ;;  %v2041_v61 = vmax.f32 %v2037_v57, 0.0  ;;  %v2042_v5 = vmax.f32 %v2038_v58, 0.0 }
 0x3c7   : > { %2043 = vst [vmem:[%s398_s10] sm:$0xff] %v2039_v59  ;;  %2044 = vst [vmem:[%s398_s10 + $0x8] sm:$0xff] %v2040_v60 }
 0x3c8   : > { %2045 = vst [vmem:[%s398_s10 + $0x10] sm:$0xff] %v2041_v61  ;;  %2046 = vst [vmem:[%s398_s10 + $0x18] sm:$0xff] %v2042_v5 }
 0x3c9 PF: > { %p14_p9 = scmp.ge.s32.totalorder %s2439_s28, 4   ;;  %s3077_s24 = smov %s2359_s25 }
 0x3ca   : > { %s3078_s25 = smov %s2448_s8  ;;  %s3079_s26 = smov %s2439_s28 }
 0x3cb   :  { %16 = sbr.rel (!%p14_p9) target bundleno = 2 (0x2), region = 138 }

</bundles_post_ra>
